<compile_context>
chip_gen: v5e
topology: v5e:2x2
jax: 0.10.0
libtpu: 0.0.40
codegen_flags: <defaults>
</compile_context>

<pallas_src>
import numpy as np
import jax
import jax.numpy as jnp
from jax.experimental import pallas as pl
from jax.experimental.pallas import tpu as pltpu

# ----------------------------- small config (CCT defaults, scaled down) ----------------------
IMG = 16          # img_size
CIN = 3           # n_input_channels
D = 32            # embedding_dim
HEADS = 4         # num_heads
HD = D // HEADS   # head dim
FF = 64           # dim_feedforward = embedding_dim * mlp_ratio (mlp_ratio = 2.0)
LAYERS = 2        # num_layers
NCLS = 10         # num_classes
NCLS_PAD = 128    # lane-padded classifier width (kernel-internal)
KSIZE, STRIDE, PAD = 3, 2, 3          # tokenizer conv
PK, PS, PP = 3, 2, 1                  # tokenizer max-pool
B = 2
EPS = 1e-5

H1 = (IMG + 2 * PAD - KSIZE) // STRIDE + 1      # conv output spatial = 10
H2 = (H1 + 2 * PP - PK) // PS + 1               # pool output spatial = 5
N_SEQ = H2 * H2                                 # sequence length = 25
PATCH = CIN * KSIZE * KSIZE                     # 27


# ----------------------------- kernel helpers -------------------------------------------------
def _layernorm(x, g, b):
    mu = jnp.mean(x, axis=-1, keepdims=True)
    xc = x - mu
    var = jnp.mean(xc * xc, axis=-1, keepdims=True)
    return xc * jax.lax.rsqrt(var + EPS) * g + b


# ----------------------------- the single fused kernel ---------------------------------------
def _cct_kernel(p_ref, wc_ref, pos_ref,
                ln0g_ref, ln0b_ref, wqkv_ref, wp_ref, bp_ref,
                ln1g_ref, ln1b_ref, w1_ref, b1_ref, w2_ref, b2_ref,
                ng_ref, nb_ref, pw_ref, pb_ref, fw_ref, fb_ref,
                o_ref):
    f32 = jnp.float32
    wc = wc_ref[...]                                                    # (PATCH, D)

    # ---- Tokenizer: conv(k=3,s=2,p=3,bias=False) + ReLU + MaxPool(3,2,1), fused ----
    # p_ref[0, w] holds the im2col patches of the conv positions feeding each pooled token for
    # pooling-window position w; out-of-range positions are zero patches (conv = 0), which is
    # exact because the ReLU epilogue makes every true window max >= 0.
    acc = jnp.dot(p_ref[0, 0], wc, preferred_element_type=f32)          # (N, D)
    for w in range(1, PK * PK):
        acc = jnp.maximum(acc, jnp.dot(p_ref[0, w], wc, preferred_element_type=f32))
    x = jnp.maximum(acc, 0.0) + pos_ref[...]                            # tokens + sine pos-emb

    # ---- TransformerEncoderLayer x LAYERS (eval mode: dropout / drop_path = identity) ----
    for l in range(LAYERS):
        # pre-norm self-attention; fused QKV matmul (1/sqrt(HD) already folded into Q columns)
        h = _layernorm(x, ln0g_ref[l], ln0b_ref[l])                     # (N, D)
        qkv = jnp.dot(h, wqkv_ref[l], preferred_element_type=f32)       # (N, 3D)
        wp = wp_ref[l]                                                  # (D, D)

        attn = None
        for hh in range(HEADS):
            q_h = qkv[:, hh * HD:(hh + 1) * HD]                         # (N, HD)
            k_h = qkv[:, D + hh * HD:D + (hh + 1) * HD]                 # (N, HD)
            v_h = qkv[:, 2 * D + hh * HD:2 * D + (hh + 1) * HD]         # (N, HD)

            s = jax.lax.dot_general(q_h, k_h, (((1,), (1,)), ((), ())),
                                    preferred_element_type=f32)         # (N, N)
            s = s - jnp.max(s, axis=-1, keepdims=True)
            e = jnp.exp(s)
            p = e * pl.reciprocal(jnp.sum(e, axis=-1, keepdims=True), approx=True)

            o_h = jnp.dot(p, v_h, preferred_element_type=f32)           # (N, HD)
            c = jnp.dot(o_h, wp[hh * HD:(hh + 1) * HD, :],
                        preferred_element_type=f32)                     # (N, D)
            attn = c if attn is None else attn + c
        attn = attn + bp_ref[l]                                         # (N, D)

        # residual -> norm1 -> MLP; PyTorch reassigns src = norm1(src) before the MLP residual,
        # so the second residual base is the normalized value (x2 + y).
        x1 = x + attn
        x2 = _layernorm(x1, ln1g_ref[l], ln1b_ref[l])
        # TODO(synk): F.gelu defaults to the exact erf formulation; using the tanh approximation
        # (jax.nn.gelu default) since erf lowering support in Mosaic varies.
        hmid = jax.nn.gelu(jnp.dot(x2, w1_ref[l], preferred_element_type=f32) + b1_ref[l])
        y = jnp.dot(hmid, w2_ref[l], preferred_element_type=f32) + b2_ref[l]
        x = x2 + y

    # ---- final LayerNorm + sequence attention pooling + fc (lane-padded output) ----
    xn = _layernorm(x, ng_ref[...], nb_ref[...])
    a = jnp.sum(xn * pw_ref[...], axis=-1, keepdims=True) + pb_ref[...]  # (N, 1)
    a = a - jnp.max(a, axis=0, keepdims=True)
    ea = jnp.exp(a)
    wgt = ea * pl.reciprocal(jnp.sum(ea, axis=0, keepdims=True), approx=True)
    pooled = jax.lax.dot_general(wgt, xn, (((0,), (0,)), ((), ())),
                                 preferred_element_type=f32)             # (1, D)
    logits = jnp.dot(pooled, fw_ref[...], preferred_element_type=f32) + fb_ref[...]
    o_ref[0] = logits.astype(o_ref.dtype)                               # (1, NCLS_PAD)


# ----------------------------- pallas_call wrapper --------------------------------------------
def _full_spec(shape):
    return pl.BlockSpec(shape, lambda b, _n=len(shape): (0,) * _n)


def cct_pallas(pool_patches, consts):
    Bn = pool_patches.shape[0]
    in_specs = [pl.BlockSpec((1, PK * PK, N_SEQ, PATCH), lambda b: (b, 0, 0, 0))]
    in_specs += [_full_spec(c.shape) for c in consts]
    out = pl.pallas_call(
        _cct_kernel,
        grid=(Bn,),
        in_specs=in_specs,
        out_specs=pl.BlockSpec((1, 1, NCLS_PAD), lambda b: (b, 0, 0)),
        out_shape=jax.ShapeDtypeStruct((Bn, 1, NCLS_PAD), jnp.float32),
        compiler_params=pltpu.CompilerParams(dimension_semantics=("parallel",)),
    )(pool_patches, *consts)
    return out[:, 0, :NCLS]


# ----------------------------- plain-JAX data / weight prep -----------------------------------
def im2col_grid(x_nchw):
    # (B, Cin, H, W) -> (B, H1, H1, Cin*k*k), patch order (cin, ki, kj) to match w.reshape(D,-1)
    Bn, Cc, _, _ = x_nchw.shape
    xp = jnp.pad(x_nchw, ((0, 0), (0, 0), (PAD, PAD), (PAD, PAD)))
    cols = []
    for ki in range(KSIZE):
        for kj in range(KSIZE):
            cols.append(xp[:, :, ki:ki + STRIDE * (H1 - 1) + 1:STRIDE,
                                 kj:kj + STRIDE * (H1 - 1) + 1:STRIDE])   # (B, Cin, H1, H1)
    stacked = jnp.stack(cols, axis=2)                                     # (B, Cin, k*k, H1, H1)
    return jnp.transpose(stacked, (0, 3, 4, 1, 2)).reshape(Bn, H1, H1, PATCH)


def pool_window_patches(pgrid):
    # Regroup conv patches per pooling window: (B, H1, H1, PATCH) -> (B, k*k, N_SEQ, PATCH).
    # Spatial zero-padding contributes zero patches (conv = 0), exact under the ReLU+max fusion.
    Bn = pgrid.shape[0]
    pp = jnp.pad(pgrid, ((0, 0), (PP, PP), (PP, PP), (0, 0)))
    wins = []
    for pi in range(PK):
        for pj in range(PK):
            sl = pp[:, pi:pi + PS * (H2 - 1) + 1:PS,
                        pj:pj + PS * (H2 - 1) + 1:PS, :]                  # (B, H2, H2, PATCH)
            wins.append(sl.reshape(Bn, N_SEQ, PATCH))
    return jnp.stack(wins, axis=1)                                        # (B, k*k, N, PATCH)


def sinusoidal_embedding(n, dim):
    pe = np.array([[p / (10000 ** (2 * (i // 2) / dim)) for i in range(dim)]
                   for p in range(n)], dtype=np.float32)
    pe[:, 0::2] = np.sin(pe[:, 0::2])
    pe[:, 1::2] = np.cos(pe[:, 1::2])
    return jnp.asarray(pe)                                                # (n, dim)


def init_params(key):
    keys = iter(jax.random.split(key, 32))
    p = {}
    fan_in = CIN * KSIZE * KSIZE
    # Conv2d kaiming_normal_ (fan_in, gain=sqrt(2)), bias=False
    p["conv_w"] = jax.random.normal(next(keys), (D, CIN, KSIZE, KSIZE), jnp.float32) \
        * np.float32(np.sqrt(2.0 / fan_in))
    blocks = []
    for _ in range(LAYERS):
        blk = {
            "ln0g": jnp.ones((1, D), jnp.float32), "ln0b": jnp.zeros((1, D), jnp.float32),
            "wqkv": jax.random.normal(next(keys), (D, 3 * D), jnp.float32) * 0.02,
            "wproj": jax.random.normal(next(keys), (D, D), jnp.float32) * 0.02,
            "bproj": jnp.zeros((1, D), jnp.float32),
            "ln1g": jnp.ones((1, D), jnp.float32), "ln1b": jnp.zeros((1, D), jnp.float32),
            "w1": jax.random.normal(next(keys), (D, FF), jnp.float32) * 0.02,
            "b1": jnp.zeros((1, FF), jnp.float32),
            "w2": jax.random.normal(next(keys), (FF, D), jnp.float32) * 0.02,
            "b2": jnp.zeros((1, D), jnp.float32),
        }
        blocks.append(blk)
    p["blocks"] = blocks
    p["norm_g"] = jnp.ones((1, D), jnp.float32)
    p["norm_b"] = jnp.zeros((1, D), jnp.float32)
    p["pool_w"] = jax.random.normal(next(keys), (1, D), jnp.float32) * 0.02
    p["pool_b"] = jnp.zeros((1, 1), jnp.float32)
    p["fc_w"] = jax.random.normal(next(keys), (D, NCLS), jnp.float32) * 0.02
    p["fc_b"] = jnp.zeros((1, NCLS), jnp.float32)
    p["pos_emb"] = sinusoidal_embedding(N_SEQ, D)
    return p


def _pack_layer_weights(params):
    # Fold 1/sqrt(HD) into the Q columns of the fused QKV weight; keep the output-projection
    # weight as (D, D) (row blocks of HD rows correspond to heads, matching the PyTorch
    # transpose(1,2).reshape concat order).  Stack everything over layers.
    scale = np.float32(HD ** -0.5)
    wqkv_l, wp_l = [], []
    for blk in params["blocks"]:
        wqkv = blk["wqkv"]                                                # (D, 3D)
        wqkv_l.append(jnp.concatenate([wqkv[:, :D] * scale, wqkv[:, D:]], axis=1))
        wp_l.append(blk["wproj"])                                         # (D, D)

    def stack(name):
        return jnp.stack([blk[name] for blk in params["blocks"]], axis=0)

    return [
        stack("ln0g"), stack("ln0b"),
        jnp.stack(wqkv_l), jnp.stack(wp_l), stack("bproj"),
        stack("ln1g"), stack("ln1b"),
        stack("w1"), stack("b1"), stack("w2"), stack("b2"),
    ]


def cct_forward(params, x_nchw):
    x = x_nchw.astype(jnp.float32)

    # im2col patches regrouped per pooling window (tiny XLA prep, all conv/pool math in-kernel)
    pool_patches = pool_window_patches(im2col_grid(x))            # (B, 9, N, PATCH)

    w_conv = params["conv_w"].reshape(D, -1).T                    # (PATCH, D)

    # lane-pad the classifier head to 128 output lanes (unmasked final store)
    fc_w_pad = jnp.zeros((D, NCLS_PAD), jnp.float32).at[:, :NCLS].set(params["fc_w"])
    fc_b_pad = jnp.zeros((1, NCLS_PAD), jnp.float32).at[:, :NCLS].set(params["fc_b"])

    consts = [w_conv, params["pos_emb"]]
    consts += _pack_layer_weights(params)
    consts += [params["norm_g"], params["norm_b"], params["pool_w"], params["pool_b"],
               fc_w_pad, fc_b_pad]

    return cct_pallas(pool_patches, consts)                       # (B, NCLS)


if __name__ == "__main__":
    key = jax.random.PRNGKey(0)
    pkey, xkey = jax.random.split(key)
    params = init_params(pkey)
    x = jax.random.normal(xkey, (B, CIN, IMG, IMG), jnp.float32)

    logits = jax.jit(cct_forward)(params, x)
    logits = jax.block_until_ready(logits)
    assert logits.shape == (B, NCLS), logits.shape
    assert bool(jnp.all(jnp.isfinite(logits)))
    print("KERNEL_OK")
</pallas_src>

<mosaic_0001>
module attributes {stable_mosaic.version = 11 : i64} {
  func.func @_cct_kernel(%arg0: i32, %arg1: memref<1x9x25x27xf32, #tpu.memory_space<vmem>>, %arg2: memref<27x32xf32, #tpu.memory_space<vmem>>, %arg3: memref<25x32xf32, #tpu.memory_space<vmem>>, %arg4: memref<2x1x32xf32, #tpu.memory_space<vmem>>, %arg5: memref<2x1x32xf32, #tpu.memory_space<vmem>>, %arg6: memref<2x32x96xf32, #tpu.memory_space<vmem>>, %arg7: memref<2x32x32xf32, #tpu.memory_space<vmem>>, %arg8: memref<2x1x32xf32, #tpu.memory_space<vmem>>, %arg9: memref<2x1x32xf32, #tpu.memory_space<vmem>>, %arg10: memref<2x1x32xf32, #tpu.memory_space<vmem>>, %arg11: memref<2x32x64xf32, #tpu.memory_space<vmem>>, %arg12: memref<2x1x64xf32, #tpu.memory_space<vmem>>, %arg13: memref<2x64x32xf32, #tpu.memory_space<vmem>>, %arg14: memref<2x1x32xf32, #tpu.memory_space<vmem>>, %arg15: memref<1x32xf32, #tpu.memory_space<vmem>>, %arg16: memref<1x32xf32, #tpu.memory_space<vmem>>, %arg17: memref<1x32xf32, #tpu.memory_space<vmem>>, %arg18: memref<1x1xf32, #tpu.memory_space<vmem>>, %arg19: memref<32x128xf32, #tpu.memory_space<vmem>>, %arg20: memref<1x128xf32, #tpu.memory_space<vmem>>, %arg21: memref<1x1x128xf32, #tpu.memory_space<vmem>>) attributes {dimension_semantics = [#tpu.dimension_semantics<parallel>], iteration_bounds = array<i64: 2>, scalar_prefetch = 0 : i64, scratch_operands = 0 : i64, tpu.core_type = #tpu.core_type<tc>, window_params = [{transform_indices = @transform_0, window_bounds = array<i64: 1, 9, 25, 27>}, {pipeline_mode = #tpu.pipeline_mode<synchronous>, transform_indices = @transform_1, window_bounds = array<i64: 27, 32>}, {pipeline_mode = #tpu.pipeline_mode<synchronous>, transform_indices = @transform_2, window_bounds = array<i64: 25, 32>}, {pipeline_mode = #tpu.pipeline_mode<synchronous>, transform_indices = @transform_3, window_bounds = array<i64: 2, 1, 32>}, {pipeline_mode = #tpu.pipeline_mode<synchronous>, transform_indices = @transform_4, window_bounds = array<i64: 2, 1, 32>}, {pipeline_mode = #tpu.pipeline_mode<synchronous>, transform_indices = @transform_5, window_bounds = array<i64: 2, 32, 96>}, {pipeline_mode = #tpu.pipeline_mode<synchronous>, transform_indices = @transform_6, window_bounds = array<i64: 2, 32, 32>}, {pipeline_mode = #tpu.pipeline_mode<synchronous>, transform_indices = @transform_7, window_bounds = array<i64: 2, 1, 32>}, {pipeline_mode = #tpu.pipeline_mode<synchronous>, transform_indices = @transform_8, window_bounds = array<i64: 2, 1, 32>}, {pipeline_mode = #tpu.pipeline_mode<synchronous>, transform_indices = @transform_9, window_bounds = array<i64: 2, 1, 32>}, {pipeline_mode = #tpu.pipeline_mode<synchronous>, transform_indices = @transform_10, window_bounds = array<i64: 2, 32, 64>}, {pipeline_mode = #tpu.pipeline_mode<synchronous>, transform_indices = @transform_11, window_bounds = array<i64: 2, 1, 64>}, {pipeline_mode = #tpu.pipeline_mode<synchronous>, transform_indices = @transform_12, window_bounds = array<i64: 2, 64, 32>}, {pipeline_mode = #tpu.pipeline_mode<synchronous>, transform_indices = @transform_13, window_bounds = array<i64: 2, 1, 32>}, {pipeline_mode = #tpu.pipeline_mode<synchronous>, transform_indices = @transform_14, window_bounds = array<i64: 1, 32>}, {pipeline_mode = #tpu.pipeline_mode<synchronous>, transform_indices = @transform_15, window_bounds = array<i64: 1, 32>}, {pipeline_mode = #tpu.pipeline_mode<synchronous>, transform_indices = @transform_16, window_bounds = array<i64: 1, 32>}, {pipeline_mode = #tpu.pipeline_mode<synchronous>, transform_indices = @transform_17, window_bounds = array<i64: 1, 1>}, {pipeline_mode = #tpu.pipeline_mode<synchronous>, transform_indices = @transform_18, window_bounds = array<i64: 32, 128>}, {pipeline_mode = #tpu.pipeline_mode<synchronous>, transform_indices = @transform_19, window_bounds = array<i64: 1, 128>}, {transform_indices = @transform_20, window_bounds = array<i64: 1, 1, 128>}]} {
    %c0 = arith.constant 0 : index
    %c0_0 = arith.constant 0 : index
    %0 = vector.load %arg2[%c0, %c0_0] : memref<27x32xf32, #tpu.memory_space<vmem>>, vector<27x32xf32>
    %c0_1 = arith.constant 0 : index
    %c0_2 = arith.constant 0 : index
    %c0_3 = arith.constant 0 : index
    %c0_4 = arith.constant 0 : index
    %1 = vector.load %arg1[%c0_1, %c0_2, %c0_3, %c0_4] : memref<1x9x25x27xf32, #tpu.memory_space<vmem>>, vector<1x1x25x27xf32>
    %2 = vector.shape_cast %1 : vector<1x1x25x27xf32> to vector<25x27xf32>
    %cst = arith.constant dense<0.000000e+00> : vector<25x32xf32>
    %3 = tpu.matmul %2, %0, %cst {dimension_numbers = #tpu.dot_dimension_numbers<[1], [0], [0], [1], [0, 0, 1, 1], [], []>} : vector<25x27xf32>, vector<27x32xf32>, vector<25x32xf32> -> vector<25x32xf32>
    %c0_5 = arith.constant 0 : index
    %c1 = arith.constant 1 : index
    %c0_6 = arith.constant 0 : index
    %c0_7 = arith.constant 0 : index
    %4 = vector.load %arg1[%c0_5, %c1, %c0_6, %c0_7] : memref<1x9x25x27xf32, #tpu.memory_space<vmem>>, vector<1x1x25x27xf32>
    %5 = vector.shape_cast %4 : vector<1x1x25x27xf32> to vector<25x27xf32>
    %cst_8 = arith.constant dense<0.000000e+00> : vector<25x32xf32>
    %6 = tpu.matmul %5, %0, %cst_8 {dimension_numbers = #tpu.dot_dimension_numbers<[1], [0], [0], [1], [0, 0, 1, 1], [], []>} : vector<25x27xf32>, vector<27x32xf32>, vector<25x32xf32> -> vector<25x32xf32>
    %7 = arith.maximumf %3, %6 : vector<25x32xf32>
    %c0_9 = arith.constant 0 : index
    %c2 = arith.constant 2 : index
    %c0_10 = arith.constant 0 : index
    %c0_11 = arith.constant 0 : index
    %8 = vector.load %arg1[%c0_9, %c2, %c0_10, %c0_11] : memref<1x9x25x27xf32, #tpu.memory_space<vmem>>, vector<1x1x25x27xf32>
    %9 = vector.shape_cast %8 : vector<1x1x25x27xf32> to vector<25x27xf32>
    %cst_12 = arith.constant dense<0.000000e+00> : vector<25x32xf32>
    %10 = tpu.matmul %9, %0, %cst_12 {dimension_numbers = #tpu.dot_dimension_numbers<[1], [0], [0], [1], [0, 0, 1, 1], [], []>} : vector<25x27xf32>, vector<27x32xf32>, vector<25x32xf32> -> vector<25x32xf32>
    %11 = arith.maximumf %7, %10 : vector<25x32xf32>
    %c0_13 = arith.constant 0 : index
    %c3 = arith.constant 3 : index
    %c0_14 = arith.constant 0 : index
    %c0_15 = arith.constant 0 : index
    %12 = vector.load %arg1[%c0_13, %c3, %c0_14, %c0_15] : memref<1x9x25x27xf32, #tpu.memory_space<vmem>>, vector<1x1x25x27xf32>
    %13 = vector.shape_cast %12 : vector<1x1x25x27xf32> to vector<25x27xf32>
    %cst_16 = arith.constant dense<0.000000e+00> : vector<25x32xf32>
    %14 = tpu.matmul %13, %0, %cst_16 {dimension_numbers = #tpu.dot_dimension_numbers<[1], [0], [0], [1], [0, 0, 1, 1], [], []>} : vector<25x27xf32>, vector<27x32xf32>, vector<25x32xf32> -> vector<25x32xf32>
    %15 = arith.maximumf %11, %14 : vector<25x32xf32>
    %c0_17 = arith.constant 0 : index
    %c4 = arith.constant 4 : index
    %c0_18 = arith.constant 0 : index
    %c0_19 = arith.constant 0 : index
    %16 = vector.load %arg1[%c0_17, %c4, %c0_18, %c0_19] : memref<1x9x25x27xf32, #tpu.memory_space<vmem>>, vector<1x1x25x27xf32>
    %17 = vector.shape_cast %16 : vector<1x1x25x27xf32> to vector<25x27xf32>
    %cst_20 = arith.constant dense<0.000000e+00> : vector<25x32xf32>
    %18 = tpu.matmul %17, %0, %cst_20 {dimension_numbers = #tpu.dot_dimension_numbers<[1], [0], [0], [1], [0, 0, 1, 1], [], []>} : vector<25x27xf32>, vector<27x32xf32>, vector<25x32xf32> -> vector<25x32xf32>
    %19 = arith.maximumf %15, %18 : vector<25x32xf32>
    %c0_21 = arith.constant 0 : index
    %c5 = arith.constant 5 : index
    %c0_22 = arith.constant 0 : index
    %c0_23 = arith.constant 0 : index
    %20 = vector.load %arg1[%c0_21, %c5, %c0_22, %c0_23] : memref<1x9x25x27xf32, #tpu.memory_space<vmem>>, vector<1x1x25x27xf32>
    %21 = vector.shape_cast %20 : vector<1x1x25x27xf32> to vector<25x27xf32>
    %cst_24 = arith.constant dense<0.000000e+00> : vector<25x32xf32>
    %22 = tpu.matmul %21, %0, %cst_24 {dimension_numbers = #tpu.dot_dimension_numbers<[1], [0], [0], [1], [0, 0, 1, 1], [], []>} : vector<25x27xf32>, vector<27x32xf32>, vector<25x32xf32> -> vector<25x32xf32>
    %23 = arith.maximumf %19, %22 : vector<25x32xf32>
    %c0_25 = arith.constant 0 : index
    %c6 = arith.constant 6 : index
    %c0_26 = arith.constant 0 : index
    %c0_27 = arith.constant 0 : index
    %24 = vector.load %arg1[%c0_25, %c6, %c0_26, %c0_27] : memref<1x9x25x27xf32, #tpu.memory_space<vmem>>, vector<1x1x25x27xf32>
    %25 = vector.shape_cast %24 : vector<1x1x25x27xf32> to vector<25x27xf32>
    %cst_28 = arith.constant dense<0.000000e+00> : vector<25x32xf32>
    %26 = tpu.matmul %25, %0, %cst_28 {dimension_numbers = #tpu.dot_dimension_numbers<[1], [0], [0], [1], [0, 0, 1, 1], [], []>} : vector<25x27xf32>, vector<27x32xf32>, vector<25x32xf32> -> vector<25x32xf32>
    %27 = arith.maximumf %23, %26 : vector<25x32xf32>
    %c0_29 = arith.constant 0 : index
    %c7 = arith.constant 7 : index
    %c0_30 = arith.constant 0 : index
    %c0_31 = arith.constant 0 : index
    %28 = vector.load %arg1[%c0_29, %c7, %c0_30, %c0_31] : memref<1x9x25x27xf32, #tpu.memory_space<vmem>>, vector<1x1x25x27xf32>
    %29 = vector.shape_cast %28 : vector<1x1x25x27xf32> to vector<25x27xf32>
    %cst_32 = arith.constant dense<0.000000e+00> : vector<25x32xf32>
    %30 = tpu.matmul %29, %0, %cst_32 {dimension_numbers = #tpu.dot_dimension_numbers<[1], [0], [0], [1], [0, 0, 1, 1], [], []>} : vector<25x27xf32>, vector<27x32xf32>, vector<25x32xf32> -> vector<25x32xf32>
    %31 = arith.maximumf %27, %30 : vector<25x32xf32>
    %c0_33 = arith.constant 0 : index
    %c8 = arith.constant 8 : index
    %c0_34 = arith.constant 0 : index
    %c0_35 = arith.constant 0 : index
    %32 = vector.load %arg1[%c0_33, %c8, %c0_34, %c0_35] : memref<1x9x25x27xf32, #tpu.memory_space<vmem>>, vector<1x1x25x27xf32>
    %33 = vector.shape_cast %32 : vector<1x1x25x27xf32> to vector<25x27xf32>
    %cst_36 = arith.constant dense<0.000000e+00> : vector<25x32xf32>
    %34 = tpu.matmul %33, %0, %cst_36 {dimension_numbers = #tpu.dot_dimension_numbers<[1], [0], [0], [1], [0, 0, 1, 1], [], []>} : vector<25x27xf32>, vector<27x32xf32>, vector<25x32xf32> -> vector<25x32xf32>
    %35 = arith.maximumf %31, %34 : vector<25x32xf32>
    %cst_37 = arith.constant 0.000000e+00 : f32
    %36 = vector.broadcast %cst_37 : f32 to vector<25x32xf32>
    %37 = arith.maximumf %35, %36 : vector<25x32xf32>
    %c0_38 = arith.constant 0 : index
    %c0_39 = arith.constant 0 : index
    %38 = vector.load %arg3[%c0_38, %c0_39] : memref<25x32xf32, #tpu.memory_space<vmem>>, vector<25x32xf32>
    %39 = arith.addf %37, %38 : vector<25x32xf32>
    %c0_40 = arith.constant 0 : index
    %c0_41 = arith.constant 0 : index
    %c0_42 = arith.constant 0 : index
    %40 = vector.load %arg4[%c0_40, %c0_41, %c0_42] : memref<2x1x32xf32, #tpu.memory_space<vmem>>, vector<1x1x32xf32>
    %41 = vector.shape_cast %40 : vector<1x1x32xf32> to vector<1x32xf32>
    %c0_43 = arith.constant 0 : index
    %c0_44 = arith.constant 0 : index
    %c0_45 = arith.constant 0 : index
    %42 = vector.load %arg5[%c0_43, %c0_44, %c0_45] : memref<2x1x32xf32, #tpu.memory_space<vmem>>, vector<1x1x32xf32>
    %43 = vector.shape_cast %42 : vector<1x1x32xf32> to vector<1x32xf32>
    %cst_46 = arith.constant dense<0.000000e+00> : vector<25xf32>
    %44 = vector.multi_reduction <add>, %39, %cst_46 [1] : vector<25x32xf32> to vector<25xf32>
    %45 = vector.shape_cast %44 : vector<25xf32> to vector<25x1xf32>
    %cst_47 = arith.constant 3.200000e+01 : f32
    %46 = vector.broadcast %cst_47 : f32 to vector<25x1xf32>
    %47 = arith.divf %45, %46 : vector<25x1xf32>
    %48 = vector.broadcast %47 : vector<25x1xf32> to vector<25x32xf32>
    %49 = arith.subf %39, %48 : vector<25x32xf32>
    %50 = arith.mulf %49, %49 : vector<25x32xf32>
    %cst_48 = arith.constant dense<0.000000e+00> : vector<25xf32>
    %51 = vector.multi_reduction <add>, %50, %cst_48 [1] : vector<25x32xf32> to vector<25xf32>
    %52 = vector.shape_cast %51 : vector<25xf32> to vector<25x1xf32>
    %cst_49 = arith.constant 3.200000e+01 : f32
    %53 = vector.broadcast %cst_49 : f32 to vector<25x1xf32>
    %54 = arith.divf %52, %53 : vector<25x1xf32>
    %cst_50 = arith.constant 9.99999974E-6 : f32
    %55 = vector.broadcast %cst_50 : f32 to vector<25x1xf32>
    %56 = arith.addf %54, %55 : vector<25x1xf32>
    %57 = math.rsqrt %56 : vector<25x1xf32>
    %58 = vector.broadcast %57 : vector<25x1xf32> to vector<25x32xf32>
    %59 = arith.mulf %49, %58 : vector<25x32xf32>
    %60 = vector.broadcast %41 : vector<1x32xf32> to vector<25x32xf32>
    %61 = arith.mulf %59, %60 : vector<25x32xf32>
    %62 = vector.broadcast %43 : vector<1x32xf32> to vector<25x32xf32>
    %63 = arith.addf %61, %62 : vector<25x32xf32>
    %c0_51 = arith.constant 0 : index
    %c0_52 = arith.constant 0 : index
    %c0_53 = arith.constant 0 : index
    %64 = vector.load %arg6[%c0_51, %c0_52, %c0_53] : memref<2x32x96xf32, #tpu.memory_space<vmem>>, vector<1x32x96xf32>
    %65 = vector.shape_cast %64 : vector<1x32x96xf32> to vector<32x96xf32>
    %cst_54 = arith.constant dense<0.000000e+00> : vector<25x96xf32>
    %66 = tpu.matmul %63, %65, %cst_54 {dimension_numbers = #tpu.dot_dimension_numbers<[1], [0], [0], [1], [0, 0, 1, 1], [], []>} : vector<25x32xf32>, vector<32x96xf32>, vector<25x96xf32> -> vector<25x96xf32>
    %c0_55 = arith.constant 0 : index
    %c0_56 = arith.constant 0 : index
    %c0_57 = arith.constant 0 : index
    %67 = vector.load %arg7[%c0_55, %c0_56, %c0_57] : memref<2x32x32xf32, #tpu.memory_space<vmem>>, vector<1x32x32xf32>
    %68 = vector.shape_cast %67 : vector<1x32x32xf32> to vector<32x32xf32>
    %69 = vector.extract_strided_slice %66 {offsets = [0, 0], sizes = [25, 8], strides = [1, 1]} : vector<25x96xf32> to vector<25x8xf32>
    %70 = vector.extract_strided_slice %66 {offsets = [0, 32], sizes = [25, 8], strides = [1, 1]} : vector<25x96xf32> to vector<25x8xf32>
    %71 = vector.extract_strided_slice %66 {offsets = [0, 64], sizes = [25, 8], strides = [1, 1]} : vector<25x96xf32> to vector<25x8xf32>
    %cst_58 = arith.constant dense<0.000000e+00> : vector<25x25xf32>
    %72 = tpu.matmul %69, %70, %cst_58 {dimension_numbers = #tpu.dot_dimension_numbers<[1], [1], [0], [0], [0, 0, 1, 0], [], []>} : vector<25x8xf32>, vector<25x8xf32>, vector<25x25xf32> -> vector<25x25xf32>
    %cst_59 = arith.constant dense<0xFF800000> : vector<25xf32>
    %73 = vector.multi_reduction <maximumf>, %72, %cst_59 [1] : vector<25x25xf32> to vector<25xf32>
    %74 = vector.shape_cast %73 : vector<25xf32> to vector<25x1xf32>
    %75 = vector.broadcast %74 : vector<25x1xf32> to vector<25x25xf32>
    %76 = arith.subf %72, %75 : vector<25x25xf32>
    %77 = math.exp %76 : vector<25x25xf32>
    %cst_60 = arith.constant dense<0.000000e+00> : vector<25xf32>
    %78 = vector.multi_reduction <add>, %77, %cst_60 [1] : vector<25x25xf32> to vector<25xf32>
    %79 = vector.shape_cast %78 : vector<25xf32> to vector<25x1xf32>
    %80 = tpu.reciprocal %79 {approx = true} : vector<25x1xf32> -> vector<25x1xf32>
    %81 = vector.broadcast %80 : vector<25x1xf32> to vector<25x25xf32>
    %82 = arith.mulf %77, %81 : vector<25x25xf32>
    %cst_61 = arith.constant dense<0.000000e+00> : vector<25x8xf32>
    %83 = tpu.matmul %82, %71, %cst_61 {dimension_numbers = #tpu.dot_dimension_numbers<[1], [0], [0], [1], [0, 0, 1, 1], [], []>} : vector<25x25xf32>, vector<25x8xf32>, vector<25x8xf32> -> vector<25x8xf32>
    %84 = vector.extract_strided_slice %68 {offsets = [0, 0], sizes = [8, 32], strides = [1, 1]} : vector<32x32xf32> to vector<8x32xf32>
    %cst_62 = arith.constant dense<0.000000e+00> : vector<25x32xf32>
    %85 = tpu.matmul %83, %84, %cst_62 {dimension_numbers = #tpu.dot_dimension_numbers<[1], [0], [0], [1], [0, 0, 1, 1], [], []>} : vector<25x8xf32>, vector<8x32xf32>, vector<25x32xf32> -> vector<25x32xf32>
    %86 = vector.extract_strided_slice %66 {offsets = [0, 8], sizes = [25, 8], strides = [1, 1]} : vector<25x96xf32> to vector<25x8xf32>
    %87 = vector.extract_strided_slice %66 {offsets = [0, 40], sizes = [25, 8], strides = [1, 1]} : vector<25x96xf32> to vector<25x8xf32>
    %88 = vector.extract_strided_slice %66 {offsets = [0, 72], sizes = [25, 8], strides = [1, 1]} : vector<25x96xf32> to vector<25x8xf32>
    %cst_63 = arith.constant dense<0.000000e+00> : vector<25x25xf32>
    %89 = tpu.matmul %86, %87, %cst_63 {dimension_numbers = #tpu.dot_dimension_numbers<[1], [1], [0], [0], [0, 0, 1, 0], [], []>} : vector<25x8xf32>, vector<25x8xf32>, vector<25x25xf32> -> vector<25x25xf32>
    %cst_64 = arith.constant dense<0xFF800000> : vector<25xf32>
    %90 = vector.multi_reduction <maximumf>, %89, %cst_64 [1] : vector<25x25xf32> to vector<25xf32>
    %91 = vector.shape_cast %90 : vector<25xf32> to vector<25x1xf32>
    %92 = vector.broadcast %91 : vector<25x1xf32> to vector<25x25xf32>
    %93 = arith.subf %89, %92 : vector<25x25xf32>
    %94 = math.exp %93 : vector<25x25xf32>
    %cst_65 = arith.constant dense<0.000000e+00> : vector<25xf32>
    %95 = vector.multi_reduction <add>, %94, %cst_65 [1] : vector<25x25xf32> to vector<25xf32>
    %96 = vector.shape_cast %95 : vector<25xf32> to vector<25x1xf32>
    %97 = tpu.reciprocal %96 {approx = true} : vector<25x1xf32> -> vector<25x1xf32>
    %98 = vector.broadcast %97 : vector<25x1xf32> to vector<25x25xf32>
    %99 = arith.mulf %94, %98 : vector<25x25xf32>
    %cst_66 = arith.constant dense<0.000000e+00> : vector<25x8xf32>
    %100 = tpu.matmul %99, %88, %cst_66 {dimension_numbers = #tpu.dot_dimension_numbers<[1], [0], [0], [1], [0, 0, 1, 1], [], []>} : vector<25x25xf32>, vector<25x8xf32>, vector<25x8xf32> -> vector<25x8xf32>
    %101 = vector.extract_strided_slice %68 {offsets = [8, 0], sizes = [8, 32], strides = [1, 1]} : vector<32x32xf32> to vector<8x32xf32>
    %cst_67 = arith.constant dense<0.000000e+00> : vector<25x32xf32>
    %102 = tpu.matmul %100, %101, %cst_67 {dimension_numbers = #tpu.dot_dimension_numbers<[1], [0], [0], [1], [0, 0, 1, 1], [], []>} : vector<25x8xf32>, vector<8x32xf32>, vector<25x32xf32> -> vector<25x32xf32>
    %103 = arith.addf %85, %102 : vector<25x32xf32>
    %104 = vector.extract_strided_slice %66 {offsets = [0, 16], sizes = [25, 8], strides = [1, 1]} : vector<25x96xf32> to vector<25x8xf32>
    %105 = vector.extract_strided_slice %66 {offsets = [0, 48], sizes = [25, 8], strides = [1, 1]} : vector<25x96xf32> to vector<25x8xf32>
    %106 = vector.extract_strided_slice %66 {offsets = [0, 80], sizes = [25, 8], strides = [1, 1]} : vector<25x96xf32> to vector<25x8xf32>
    %cst_68 = arith.constant dense<0.000000e+00> : vector<25x25xf32>
    %107 = tpu.matmul %104, %105, %cst_68 {dimension_numbers = #tpu.dot_dimension_numbers<[1], [1], [0], [0], [0, 0, 1, 0], [], []>} : vector<25x8xf32>, vector<25x8xf32>, vector<25x25xf32> -> vector<25x25xf32>
    %cst_69 = arith.constant dense<0xFF800000> : vector<25xf32>
    %108 = vector.multi_reduction <maximumf>, %107, %cst_69 [1] : vector<25x25xf32> to vector<25xf32>
    %109 = vector.shape_cast %108 : vector<25xf32> to vector<25x1xf32>
    %110 = vector.broadcast %109 : vector<25x1xf32> to vector<25x25xf32>
    %111 = arith.subf %107, %110 : vector<25x25xf32>
    %112 = math.exp %111 : vector<25x25xf32>
    %cst_70 = arith.constant dense<0.000000e+00> : vector<25xf32>
    %113 = vector.multi_reduction <add>, %112, %cst_70 [1] : vector<25x25xf32> to vector<25xf32>
    %114 = vector.shape_cast %113 : vector<25xf32> to vector<25x1xf32>
    %115 = tpu.reciprocal %114 {approx = true} : vector<25x1xf32> -> vector<25x1xf32>
    %116 = vector.broadcast %115 : vector<25x1xf32> to vector<25x25xf32>
    %117 = arith.mulf %112, %116 : vector<25x25xf32>
    %cst_71 = arith.constant dense<0.000000e+00> : vector<25x8xf32>
    %118 = tpu.matmul %117, %106, %cst_71 {dimension_numbers = #tpu.dot_dimension_numbers<[1], [0], [0], [1], [0, 0, 1, 1], [], []>} : vector<25x25xf32>, vector<25x8xf32>, vector<25x8xf32> -> vector<25x8xf32>
    %119 = vector.extract_strided_slice %68 {offsets = [16, 0], sizes = [8, 32], strides = [1, 1]} : vector<32x32xf32> to vector<8x32xf32>
    %cst_72 = arith.constant dense<0.000000e+00> : vector<25x32xf32>
    %120 = tpu.matmul %118, %119, %cst_72 {dimension_numbers = #tpu.dot_dimension_numbers<[1], [0], [0], [1], [0, 0, 1, 1], [], []>} : vector<25x8xf32>, vector<8x32xf32>, vector<25x32xf32> -> vector<25x32xf32>
    %121 = arith.addf %103, %120 : vector<25x32xf32>
    %122 = vector.extract_strided_slice %66 {offsets = [0, 24], sizes = [25, 8], strides = [1, 1]} : vector<25x96xf32> to vector<25x8xf32>
    %123 = vector.extract_strided_slice %66 {offsets = [0, 56], sizes = [25, 8], strides = [1, 1]} : vector<25x96xf32> to vector<25x8xf32>
    %124 = vector.extract_strided_slice %66 {offsets = [0, 88], sizes = [25, 8], strides = [1, 1]} : vector<25x96xf32> to vector<25x8xf32>
    %cst_73 = arith.constant dense<0.000000e+00> : vector<25x25xf32>
    %125 = tpu.matmul %122, %123, %cst_73 {dimension_numbers = #tpu.dot_dimension_numbers<[1], [1], [0], [0], [0, 0, 1, 0], [], []>} : vector<25x8xf32>, vector<25x8xf32>, vector<25x25xf32> -> vector<25x25xf32>
    %cst_74 = arith.constant dense<0xFF800000> : vector<25xf32>
    %126 = vector.multi_reduction <maximumf>, %125, %cst_74 [1] : vector<25x25xf32> to vector<25xf32>
    %127 = vector.shape_cast %126 : vector<25xf32> to vector<25x1xf32>
    %128 = vector.broadcast %127 : vector<25x1xf32> to vector<25x25xf32>
    %129 = arith.subf %125, %128 : vector<25x25xf32>
    %130 = math.exp %129 : vector<25x25xf32>
    %cst_75 = arith.constant dense<0.000000e+00> : vector<25xf32>
    %131 = vector.multi_reduction <add>, %130, %cst_75 [1] : vector<25x25xf32> to vector<25xf32>
    %132 = vector.shape_cast %131 : vector<25xf32> to vector<25x1xf32>
    %133 = tpu.reciprocal %132 {approx = true} : vector<25x1xf32> -> vector<25x1xf32>
    %134 = vector.broadcast %133 : vector<25x1xf32> to vector<25x25xf32>
    %135 = arith.mulf %130, %134 : vector<25x25xf32>
    %cst_76 = arith.constant dense<0.000000e+00> : vector<25x8xf32>
    %136 = tpu.matmul %135, %124, %cst_76 {dimension_numbers = #tpu.dot_dimension_numbers<[1], [0], [0], [1], [0, 0, 1, 1], [], []>} : vector<25x25xf32>, vector<25x8xf32>, vector<25x8xf32> -> vector<25x8xf32>
    %137 = vector.extract_strided_slice %68 {offsets = [24, 0], sizes = [8, 32], strides = [1, 1]} : vector<32x32xf32> to vector<8x32xf32>
    %cst_77 = arith.constant dense<0.000000e+00> : vector<25x32xf32>
    %138 = tpu.matmul %136, %137, %cst_77 {dimension_numbers = #tpu.dot_dimension_numbers<[1], [0], [0], [1], [0, 0, 1, 1], [], []>} : vector<25x8xf32>, vector<8x32xf32>, vector<25x32xf32> -> vector<25x32xf32>
    %139 = arith.addf %121, %138 : vector<25x32xf32>
    %c0_78 = arith.constant 0 : index
    %c0_79 = arith.constant 0 : index
    %c0_80 = arith.constant 0 : index
    %140 = vector.load %arg8[%c0_78, %c0_79, %c0_80] : memref<2x1x32xf32, #tpu.memory_space<vmem>>, vector<1x1x32xf32>
    %141 = vector.shape_cast %140 : vector<1x1x32xf32> to vector<1x32xf32>
    %142 = vector.broadcast %141 : vector<1x32xf32> to vector<25x32xf32>
    %143 = arith.addf %139, %142 : vector<25x32xf32>
    %144 = arith.addf %39, %143 : vector<25x32xf32>
    %c0_81 = arith.constant 0 : index
    %c0_82 = arith.constant 0 : index
    %c0_83 = arith.constant 0 : index
    %145 = vector.load %arg9[%c0_81, %c0_82, %c0_83] : memref<2x1x32xf32, #tpu.memory_space<vmem>>, vector<1x1x32xf32>
    %146 = vector.shape_cast %145 : vector<1x1x32xf32> to vector<1x32xf32>
    %c0_84 = arith.constant 0 : index
    %c0_85 = arith.constant 0 : index
    %c0_86 = arith.constant 0 : index
    %147 = vector.load %arg10[%c0_84, %c0_85, %c0_86] : memref<2x1x32xf32, #tpu.memory_space<vmem>>, vector<1x1x32xf32>
    %148 = vector.shape_cast %147 : vector<1x1x32xf32> to vector<1x32xf32>
    %cst_87 = arith.constant dense<0.000000e+00> : vector<25xf32>
    %149 = vector.multi_reduction <add>, %144, %cst_87 [1] : vector<25x32xf32> to vector<25xf32>
    %150 = vector.shape_cast %149 : vector<25xf32> to vector<25x1xf32>
    %cst_88 = arith.constant 3.200000e+01 : f32
    %151 = vector.broadcast %cst_88 : f32 to vector<25x1xf32>
    %152 = arith.divf %150, %151 : vector<25x1xf32>
    %153 = vector.broadcast %152 : vector<25x1xf32> to vector<25x32xf32>
    %154 = arith.subf %144, %153 : vector<25x32xf32>
    %155 = arith.mulf %154, %154 : vector<25x32xf32>
    %cst_89 = arith.constant dense<0.000000e+00> : vector<25xf32>
    %156 = vector.multi_reduction <add>, %155, %cst_89 [1] : vector<25x32xf32> to vector<25xf32>
    %157 = vector.shape_cast %156 : vector<25xf32> to vector<25x1xf32>
    %cst_90 = arith.constant 3.200000e+01 : f32
    %158 = vector.broadcast %cst_90 : f32 to vector<25x1xf32>
    %159 = arith.divf %157, %158 : vector<25x1xf32>
    %cst_91 = arith.constant 9.99999974E-6 : f32
    %160 = vector.broadcast %cst_91 : f32 to vector<25x1xf32>
    %161 = arith.addf %159, %160 : vector<25x1xf32>
    %162 = math.rsqrt %161 : vector<25x1xf32>
    %163 = vector.broadcast %162 : vector<25x1xf32> to vector<25x32xf32>
    %164 = arith.mulf %154, %163 : vector<25x32xf32>
    %165 = vector.broadcast %146 : vector<1x32xf32> to vector<25x32xf32>
    %166 = arith.mulf %164, %165 : vector<25x32xf32>
    %167 = vector.broadcast %148 : vector<1x32xf32> to vector<25x32xf32>
    %168 = arith.addf %166, %167 : vector<25x32xf32>
    %c0_92 = arith.constant 0 : index
    %c0_93 = arith.constant 0 : index
    %c0_94 = arith.constant 0 : index
    %169 = vector.load %arg11[%c0_92, %c0_93, %c0_94] : memref<2x32x64xf32, #tpu.memory_space<vmem>>, vector<1x32x64xf32>
    %170 = vector.shape_cast %169 : vector<1x32x64xf32> to vector<32x64xf32>
    %cst_95 = arith.constant dense<0.000000e+00> : vector<25x64xf32>
    %171 = tpu.matmul %168, %170, %cst_95 {dimension_numbers = #tpu.dot_dimension_numbers<[1], [0], [0], [1], [0, 0, 1, 1], [], []>} : vector<25x32xf32>, vector<32x64xf32>, vector<25x64xf32> -> vector<25x64xf32>
    %c0_96 = arith.constant 0 : index
    %c0_97 = arith.constant 0 : index
    %c0_98 = arith.constant 0 : index
    %172 = vector.load %arg12[%c0_96, %c0_97, %c0_98] : memref<2x1x64xf32, #tpu.memory_space<vmem>>, vector<1x1x64xf32>
    %173 = vector.shape_cast %172 : vector<1x1x64xf32> to vector<1x64xf32>
    %174 = vector.broadcast %173 : vector<1x64xf32> to vector<25x64xf32>
    %175 = arith.addf %171, %174 : vector<25x64xf32>
    %176 = arith.mulf %175, %175 : vector<25x64xf32>
    %177 = arith.mulf %175, %176 : vector<25x64xf32>
    %cst_99 = arith.constant 4.471500e-02 : f32
    %178 = vector.broadcast %cst_99 : f32 to vector<25x64xf32>
    %179 = arith.mulf %178, %177 : vector<25x64xf32>
    %180 = arith.addf %175, %179 : vector<25x64xf32>
    %cst_100 = arith.constant 0.797884583 : f32
    %181 = vector.broadcast %cst_100 : f32 to vector<25x64xf32>
    %182 = arith.mulf %181, %180 : vector<25x64xf32>
    %183 = math.tanh %182 : vector<25x64xf32>
    %cst_101 = arith.constant 1.000000e+00 : f32
    %184 = vector.broadcast %cst_101 : f32 to vector<25x64xf32>
    %185 = arith.addf %184, %183 : vector<25x64xf32>
    %cst_102 = arith.constant 5.000000e-01 : f32
    %186 = vector.broadcast %cst_102 : f32 to vector<25x64xf32>
    %187 = arith.mulf %186, %185 : vector<25x64xf32>
    %188 = arith.mulf %175, %187 : vector<25x64xf32>
    %c0_103 = arith.constant 0 : index
    %c0_104 = arith.constant 0 : index
    %c0_105 = arith.constant 0 : index
    %189 = vector.load %arg13[%c0_103, %c0_104, %c0_105] : memref<2x64x32xf32, #tpu.memory_space<vmem>>, vector<1x64x32xf32>
    %190 = vector.shape_cast %189 : vector<1x64x32xf32> to vector<64x32xf32>
    %cst_106 = arith.constant dense<0.000000e+00> : vector<25x32xf32>
    %191 = tpu.matmul %188, %190, %cst_106 {dimension_numbers = #tpu.dot_dimension_numbers<[1], [0], [0], [1], [0, 0, 1, 1], [], []>} : vector<25x64xf32>, vector<64x32xf32>, vector<25x32xf32> -> vector<25x32xf32>
    %c0_107 = arith.constant 0 : index
    %c0_108 = arith.constant 0 : index
    %c0_109 = arith.constant 0 : index
    %192 = vector.load %arg14[%c0_107, %c0_108, %c0_109] : memref<2x1x32xf32, #tpu.memory_space<vmem>>, vector<1x1x32xf32>
    %193 = vector.shape_cast %192 : vector<1x1x32xf32> to vector<1x32xf32>
    %194 = vector.broadcast %193 : vector<1x32xf32> to vector<25x32xf32>
    %195 = arith.addf %191, %194 : vector<25x32xf32>
    %196 = arith.addf %168, %195 : vector<25x32xf32>
    %c1_110 = arith.constant 1 : index
    %c0_111 = arith.constant 0 : index
    %c0_112 = arith.constant 0 : index
    %197 = vector.load %arg4[%c1_110, %c0_111, %c0_112] : memref<2x1x32xf32, #tpu.memory_space<vmem>>, vector<1x1x32xf32>
    %198 = vector.shape_cast %197 : vector<1x1x32xf32> to vector<1x32xf32>
    %c1_113 = arith.constant 1 : index
    %c0_114 = arith.constant 0 : index
    %c0_115 = arith.constant 0 : index
    %199 = vector.load %arg5[%c1_113, %c0_114, %c0_115] : memref<2x1x32xf32, #tpu.memory_space<vmem>>, vector<1x1x32xf32>
    %200 = vector.shape_cast %199 : vector<1x1x32xf32> to vector<1x32xf32>
    %cst_116 = arith.constant dense<0.000000e+00> : vector<25xf32>
    %201 = vector.multi_reduction <add>, %196, %cst_116 [1] : vector<25x32xf32> to vector<25xf32>
    %202 = vector.shape_cast %201 : vector<25xf32> to vector<25x1xf32>
    %cst_117 = arith.constant 3.200000e+01 : f32
    %203 = vector.broadcast %cst_117 : f32 to vector<25x1xf32>
    %204 = arith.divf %202, %203 : vector<25x1xf32>
    %205 = vector.broadcast %204 : vector<25x1xf32> to vector<25x32xf32>
    %206 = arith.subf %196, %205 : vector<25x32xf32>
    %207 = arith.mulf %206, %206 : vector<25x32xf32>
    %cst_118 = arith.constant dense<0.000000e+00> : vector<25xf32>
    %208 = vector.multi_reduction <add>, %207, %cst_118 [1] : vector<25x32xf32> to vector<25xf32>
    %209 = vector.shape_cast %208 : vector<25xf32> to vector<25x1xf32>
    %cst_119 = arith.constant 3.200000e+01 : f32
    %210 = vector.broadcast %cst_119 : f32 to vector<25x1xf32>
    %211 = arith.divf %209, %210 : vector<25x1xf32>
    %cst_120 = arith.constant 9.99999974E-6 : f32
    %212 = vector.broadcast %cst_120 : f32 to vector<25x1xf32>
    %213 = arith.addf %211, %212 : vector<25x1xf32>
    %214 = math.rsqrt %213 : vector<25x1xf32>
    %215 = vector.broadcast %214 : vector<25x1xf32> to vector<25x32xf32>
    %216 = arith.mulf %206, %215 : vector<25x32xf32>
    %217 = vector.broadcast %198 : vector<1x32xf32> to vector<25x32xf32>
    %218 = arith.mulf %216, %217 : vector<25x32xf32>
    %219 = vector.broadcast %200 : vector<1x32xf32> to vector<25x32xf32>
    %220 = arith.addf %218, %219 : vector<25x32xf32>
    %c1_121 = arith.constant 1 : index
    %c0_122 = arith.constant 0 : index
    %c0_123 = arith.constant 0 : index
    %221 = vector.load %arg6[%c1_121, %c0_122, %c0_123] : memref<2x32x96xf32, #tpu.memory_space<vmem>>, vector<1x32x96xf32>
    %222 = vector.shape_cast %221 : vector<1x32x96xf32> to vector<32x96xf32>
    %cst_124 = arith.constant dense<0.000000e+00> : vector<25x96xf32>
    %223 = tpu.matmul %220, %222, %cst_124 {dimension_numbers = #tpu.dot_dimension_numbers<[1], [0], [0], [1], [0, 0, 1, 1], [], []>} : vector<25x32xf32>, vector<32x96xf32>, vector<25x96xf32> -> vector<25x96xf32>
    %c1_125 = arith.constant 1 : index
    %c0_126 = arith.constant 0 : index
    %c0_127 = arith.constant 0 : index
    %224 = vector.load %arg7[%c1_125, %c0_126, %c0_127] : memref<2x32x32xf32, #tpu.memory_space<vmem>>, vector<1x32x32xf32>
    %225 = vector.shape_cast %224 : vector<1x32x32xf32> to vector<32x32xf32>
    %226 = vector.extract_strided_slice %223 {offsets = [0, 0], sizes = [25, 8], strides = [1, 1]} : vector<25x96xf32> to vector<25x8xf32>
    %227 = vector.extract_strided_slice %223 {offsets = [0, 32], sizes = [25, 8], strides = [1, 1]} : vector<25x96xf32> to vector<25x8xf32>
    %228 = vector.extract_strided_slice %223 {offsets = [0, 64], sizes = [25, 8], strides = [1, 1]} : vector<25x96xf32> to vector<25x8xf32>
    %cst_128 = arith.constant dense<0.000000e+00> : vector<25x25xf32>
    %229 = tpu.matmul %226, %227, %cst_128 {dimension_numbers = #tpu.dot_dimension_numbers<[1], [1], [0], [0], [0, 0, 1, 0], [], []>} : vector<25x8xf32>, vector<25x8xf32>, vector<25x25xf32> -> vector<25x25xf32>
    %cst_129 = arith.constant dense<0xFF800000> : vector<25xf32>
    %230 = vector.multi_reduction <maximumf>, %229, %cst_129 [1] : vector<25x25xf32> to vector<25xf32>
    %231 = vector.shape_cast %230 : vector<25xf32> to vector<25x1xf32>
    %232 = vector.broadcast %231 : vector<25x1xf32> to vector<25x25xf32>
    %233 = arith.subf %229, %232 : vector<25x25xf32>
    %234 = math.exp %233 : vector<25x25xf32>
    %cst_130 = arith.constant dense<0.000000e+00> : vector<25xf32>
    %235 = vector.multi_reduction <add>, %234, %cst_130 [1] : vector<25x25xf32> to vector<25xf32>
    %236 = vector.shape_cast %235 : vector<25xf32> to vector<25x1xf32>
    %237 = tpu.reciprocal %236 {approx = true} : vector<25x1xf32> -> vector<25x1xf32>
    %238 = vector.broadcast %237 : vector<25x1xf32> to vector<25x25xf32>
    %239 = arith.mulf %234, %238 : vector<25x25xf32>
    %cst_131 = arith.constant dense<0.000000e+00> : vector<25x8xf32>
    %240 = tpu.matmul %239, %228, %cst_131 {dimension_numbers = #tpu.dot_dimension_numbers<[1], [0], [0], [1], [0, 0, 1, 1], [], []>} : vector<25x25xf32>, vector<25x8xf32>, vector<25x8xf32> -> vector<25x8xf32>
    %241 = vector.extract_strided_slice %225 {offsets = [0, 0], sizes = [8, 32], strides = [1, 1]} : vector<32x32xf32> to vector<8x32xf32>
    %cst_132 = arith.constant dense<0.000000e+00> : vector<25x32xf32>
    %242 = tpu.matmul %240, %241, %cst_132 {dimension_numbers = #tpu.dot_dimension_numbers<[1], [0], [0], [1], [0, 0, 1, 1], [], []>} : vector<25x8xf32>, vector<8x32xf32>, vector<25x32xf32> -> vector<25x32xf32>
    %243 = vector.extract_strided_slice %223 {offsets = [0, 8], sizes = [25, 8], strides = [1, 1]} : vector<25x96xf32> to vector<25x8xf32>
    %244 = vector.extract_strided_slice %223 {offsets = [0, 40], sizes = [25, 8], strides = [1, 1]} : vector<25x96xf32> to vector<25x8xf32>
    %245 = vector.extract_strided_slice %223 {offsets = [0, 72], sizes = [25, 8], strides = [1, 1]} : vector<25x96xf32> to vector<25x8xf32>
    %cst_133 = arith.constant dense<0.000000e+00> : vector<25x25xf32>
    %246 = tpu.matmul %243, %244, %cst_133 {dimension_numbers = #tpu.dot_dimension_numbers<[1], [1], [0], [0], [0, 0, 1, 0], [], []>} : vector<25x8xf32>, vector<25x8xf32>, vector<25x25xf32> -> vector<25x25xf32>
    %cst_134 = arith.constant dense<0xFF800000> : vector<25xf32>
    %247 = vector.multi_reduction <maximumf>, %246, %cst_134 [1] : vector<25x25xf32> to vector<25xf32>
    %248 = vector.shape_cast %247 : vector<25xf32> to vector<25x1xf32>
    %249 = vector.broadcast %248 : vector<25x1xf32> to vector<25x25xf32>
    %250 = arith.subf %246, %249 : vector<25x25xf32>
    %251 = math.exp %250 : vector<25x25xf32>
    %cst_135 = arith.constant dense<0.000000e+00> : vector<25xf32>
    %252 = vector.multi_reduction <add>, %251, %cst_135 [1] : vector<25x25xf32> to vector<25xf32>
    %253 = vector.shape_cast %252 : vector<25xf32> to vector<25x1xf32>
    %254 = tpu.reciprocal %253 {approx = true} : vector<25x1xf32> -> vector<25x1xf32>
    %255 = vector.broadcast %254 : vector<25x1xf32> to vector<25x25xf32>
    %256 = arith.mulf %251, %255 : vector<25x25xf32>
    %cst_136 = arith.constant dense<0.000000e+00> : vector<25x8xf32>
    %257 = tpu.matmul %256, %245, %cst_136 {dimension_numbers = #tpu.dot_dimension_numbers<[1], [0], [0], [1], [0, 0, 1, 1], [], []>} : vector<25x25xf32>, vector<25x8xf32>, vector<25x8xf32> -> vector<25x8xf32>
    %258 = vector.extract_strided_slice %225 {offsets = [8, 0], sizes = [8, 32], strides = [1, 1]} : vector<32x32xf32> to vector<8x32xf32>
    %cst_137 = arith.constant dense<0.000000e+00> : vector<25x32xf32>
    %259 = tpu.matmul %257, %258, %cst_137 {dimension_numbers = #tpu.dot_dimension_numbers<[1], [0], [0], [1], [0, 0, 1, 1], [], []>} : vector<25x8xf32>, vector<8x32xf32>, vector<25x32xf32> -> vector<25x32xf32>
    %260 = arith.addf %242, %259 : vector<25x32xf32>
    %261 = vector.extract_strided_slice %223 {offsets = [0, 16], sizes = [25, 8], strides = [1, 1]} : vector<25x96xf32> to vector<25x8xf32>
    %262 = vector.extract_strided_slice %223 {offsets = [0, 48], sizes = [25, 8], strides = [1, 1]} : vector<25x96xf32> to vector<25x8xf32>
    %263 = vector.extract_strided_slice %223 {offsets = [0, 80], sizes = [25, 8], strides = [1, 1]} : vector<25x96xf32> to vector<25x8xf32>
    %cst_138 = arith.constant dense<0.000000e+00> : vector<25x25xf32>
    %264 = tpu.matmul %261, %262, %cst_138 {dimension_numbers = #tpu.dot_dimension_numbers<[1], [1], [0], [0], [0, 0, 1, 0], [], []>} : vector<25x8xf32>, vector<25x8xf32>, vector<25x25xf32> -> vector<25x25xf32>
    %cst_139 = arith.constant dense<0xFF800000> : vector<25xf32>
    %265 = vector.multi_reduction <maximumf>, %264, %cst_139 [1] : vector<25x25xf32> to vector<25xf32>
    %266 = vector.shape_cast %265 : vector<25xf32> to vector<25x1xf32>
    %267 = vector.broadcast %266 : vector<25x1xf32> to vector<25x25xf32>
    %268 = arith.subf %264, %267 : vector<25x25xf32>
    %269 = math.exp %268 : vector<25x25xf32>
    %cst_140 = arith.constant dense<0.000000e+00> : vector<25xf32>
    %270 = vector.multi_reduction <add>, %269, %cst_140 [1] : vector<25x25xf32> to vector<25xf32>
    %271 = vector.shape_cast %270 : vector<25xf32> to vector<25x1xf32>
    %272 = tpu.reciprocal %271 {approx = true} : vector<25x1xf32> -> vector<25x1xf32>
    %273 = vector.broadcast %272 : vector<25x1xf32> to vector<25x25xf32>
    %274 = arith.mulf %269, %273 : vector<25x25xf32>
    %cst_141 = arith.constant dense<0.000000e+00> : vector<25x8xf32>
    %275 = tpu.matmul %274, %263, %cst_141 {dimension_numbers = #tpu.dot_dimension_numbers<[1], [0], [0], [1], [0, 0, 1, 1], [], []>} : vector<25x25xf32>, vector<25x8xf32>, vector<25x8xf32> -> vector<25x8xf32>
    %276 = vector.extract_strided_slice %225 {offsets = [16, 0], sizes = [8, 32], strides = [1, 1]} : vector<32x32xf32> to vector<8x32xf32>
    %cst_142 = arith.constant dense<0.000000e+00> : vector<25x32xf32>
    %277 = tpu.matmul %275, %276, %cst_142 {dimension_numbers = #tpu.dot_dimension_numbers<[1], [0], [0], [1], [0, 0, 1, 1], [], []>} : vector<25x8xf32>, vector<8x32xf32>, vector<25x32xf32> -> vector<25x32xf32>
    %278 = arith.addf %260, %277 : vector<25x32xf32>
    %279 = vector.extract_strided_slice %223 {offsets = [0, 24], sizes = [25, 8], strides = [1, 1]} : vector<25x96xf32> to vector<25x8xf32>
    %280 = vector.extract_strided_slice %223 {offsets = [0, 56], sizes = [25, 8], strides = [1, 1]} : vector<25x96xf32> to vector<25x8xf32>
    %281 = vector.extract_strided_slice %223 {offsets = [0, 88], sizes = [25, 8], strides = [1, 1]} : vector<25x96xf32> to vector<25x8xf32>
    %cst_143 = arith.constant dense<0.000000e+00> : vector<25x25xf32>
    %282 = tpu.matmul %279, %280, %cst_143 {dimension_numbers = #tpu.dot_dimension_numbers<[1], [1], [0], [0], [0, 0, 1, 0], [], []>} : vector<25x8xf32>, vector<25x8xf32>, vector<25x25xf32> -> vector<25x25xf32>
    %cst_144 = arith.constant dense<0xFF800000> : vector<25xf32>
    %283 = vector.multi_reduction <maximumf>, %282, %cst_144 [1] : vector<25x25xf32> to vector<25xf32>
    %284 = vector.shape_cast %283 : vector<25xf32> to vector<25x1xf32>
    %285 = vector.broadcast %284 : vector<25x1xf32> to vector<25x25xf32>
    %286 = arith.subf %282, %285 : vector<25x25xf32>
    %287 = math.exp %286 : vector<25x25xf32>
    %cst_145 = arith.constant dense<0.000000e+00> : vector<25xf32>
    %288 = vector.multi_reduction <add>, %287, %cst_145 [1] : vector<25x25xf32> to vector<25xf32>
    %289 = vector.shape_cast %288 : vector<25xf32> to vector<25x1xf32>
    %290 = tpu.reciprocal %289 {approx = true} : vector<25x1xf32> -> vector<25x1xf32>
    %291 = vector.broadcast %290 : vector<25x1xf32> to vector<25x25xf32>
    %292 = arith.mulf %287, %291 : vector<25x25xf32>
    %cst_146 = arith.constant dense<0.000000e+00> : vector<25x8xf32>
    %293 = tpu.matmul %292, %281, %cst_146 {dimension_numbers = #tpu.dot_dimension_numbers<[1], [0], [0], [1], [0, 0, 1, 1], [], []>} : vector<25x25xf32>, vector<25x8xf32>, vector<25x8xf32> -> vector<25x8xf32>
    %294 = vector.extract_strided_slice %225 {offsets = [24, 0], sizes = [8, 32], strides = [1, 1]} : vector<32x32xf32> to vector<8x32xf32>
    %cst_147 = arith.constant dense<0.000000e+00> : vector<25x32xf32>
    %295 = tpu.matmul %293, %294, %cst_147 {dimension_numbers = #tpu.dot_dimension_numbers<[1], [0], [0], [1], [0, 0, 1, 1], [], []>} : vector<25x8xf32>, vector<8x32xf32>, vector<25x32xf32> -> vector<25x32xf32>
    %296 = arith.addf %278, %295 : vector<25x32xf32>
    %c1_148 = arith.constant 1 : index
    %c0_149 = arith.constant 0 : index
    %c0_150 = arith.constant 0 : index
    %297 = vector.load %arg8[%c1_148, %c0_149, %c0_150] : memref<2x1x32xf32, #tpu.memory_space<vmem>>, vector<1x1x32xf32>
    %298 = vector.shape_cast %297 : vector<1x1x32xf32> to vector<1x32xf32>
    %299 = vector.broadcast %298 : vector<1x32xf32> to vector<25x32xf32>
    %300 = arith.addf %296, %299 : vector<25x32xf32>
    %301 = arith.addf %196, %300 : vector<25x32xf32>
    %c1_151 = arith.constant 1 : index
    %c0_152 = arith.constant 0 : index
    %c0_153 = arith.constant 0 : index
    %302 = vector.load %arg9[%c1_151, %c0_152, %c0_153] : memref<2x1x32xf32, #tpu.memory_space<vmem>>, vector<1x1x32xf32>
    %303 = vector.shape_cast %302 : vector<1x1x32xf32> to vector<1x32xf32>
    %c1_154 = arith.constant 1 : index
    %c0_155 = arith.constant 0 : index
    %c0_156 = arith.constant 0 : index
    %304 = vector.load %arg10[%c1_154, %c0_155, %c0_156] : memref<2x1x32xf32, #tpu.memory_space<vmem>>, vector<1x1x32xf32>
    %305 = vector.shape_cast %304 : vector<1x1x32xf32> to vector<1x32xf32>
    %cst_157 = arith.constant dense<0.000000e+00> : vector<25xf32>
    %306 = vector.multi_reduction <add>, %301, %cst_157 [1] : vector<25x32xf32> to vector<25xf32>
    %307 = vector.shape_cast %306 : vector<25xf32> to vector<25x1xf32>
    %cst_158 = arith.constant 3.200000e+01 : f32
    %308 = vector.broadcast %cst_158 : f32 to vector<25x1xf32>
    %309 = arith.divf %307, %308 : vector<25x1xf32>
    %310 = vector.broadcast %309 : vector<25x1xf32> to vector<25x32xf32>
    %311 = arith.subf %301, %310 : vector<25x32xf32>
    %312 = arith.mulf %311, %311 : vector<25x32xf32>
    %cst_159 = arith.constant dense<0.000000e+00> : vector<25xf32>
    %313 = vector.multi_reduction <add>, %312, %cst_159 [1] : vector<25x32xf32> to vector<25xf32>
    %314 = vector.shape_cast %313 : vector<25xf32> to vector<25x1xf32>
    %cst_160 = arith.constant 3.200000e+01 : f32
    %315 = vector.broadcast %cst_160 : f32 to vector<25x1xf32>
    %316 = arith.divf %314, %315 : vector<25x1xf32>
    %cst_161 = arith.constant 9.99999974E-6 : f32
    %317 = vector.broadcast %cst_161 : f32 to vector<25x1xf32>
    %318 = arith.addf %316, %317 : vector<25x1xf32>
    %319 = math.rsqrt %318 : vector<25x1xf32>
    %320 = vector.broadcast %319 : vector<25x1xf32> to vector<25x32xf32>
    %321 = arith.mulf %311, %320 : vector<25x32xf32>
    %322 = vector.broadcast %303 : vector<1x32xf32> to vector<25x32xf32>
    %323 = arith.mulf %321, %322 : vector<25x32xf32>
    %324 = vector.broadcast %305 : vector<1x32xf32> to vector<25x32xf32>
    %325 = arith.addf %323, %324 : vector<25x32xf32>
    %c1_162 = arith.constant 1 : index
    %c0_163 = arith.constant 0 : index
    %c0_164 = arith.constant 0 : index
    %326 = vector.load %arg11[%c1_162, %c0_163, %c0_164] : memref<2x32x64xf32, #tpu.memory_space<vmem>>, vector<1x32x64xf32>
    %327 = vector.shape_cast %326 : vector<1x32x64xf32> to vector<32x64xf32>
    %cst_165 = arith.constant dense<0.000000e+00> : vector<25x64xf32>
    %328 = tpu.matmul %325, %327, %cst_165 {dimension_numbers = #tpu.dot_dimension_numbers<[1], [0], [0], [1], [0, 0, 1, 1], [], []>} : vector<25x32xf32>, vector<32x64xf32>, vector<25x64xf32> -> vector<25x64xf32>
    %c1_166 = arith.constant 1 : index
    %c0_167 = arith.constant 0 : index
    %c0_168 = arith.constant 0 : index
    %329 = vector.load %arg12[%c1_166, %c0_167, %c0_168] : memref<2x1x64xf32, #tpu.memory_space<vmem>>, vector<1x1x64xf32>
    %330 = vector.shape_cast %329 : vector<1x1x64xf32> to vector<1x64xf32>
    %331 = vector.broadcast %330 : vector<1x64xf32> to vector<25x64xf32>
    %332 = arith.addf %328, %331 : vector<25x64xf32>
    %333 = arith.mulf %332, %332 : vector<25x64xf32>
    %334 = arith.mulf %332, %333 : vector<25x64xf32>
    %cst_169 = arith.constant 4.471500e-02 : f32
    %335 = vector.broadcast %cst_169 : f32 to vector<25x64xf32>
    %336 = arith.mulf %335, %334 : vector<25x64xf32>
    %337 = arith.addf %332, %336 : vector<25x64xf32>
    %cst_170 = arith.constant 0.797884583 : f32
    %338 = vector.broadcast %cst_170 : f32 to vector<25x64xf32>
    %339 = arith.mulf %338, %337 : vector<25x64xf32>
    %340 = math.tanh %339 : vector<25x64xf32>
    %cst_171 = arith.constant 1.000000e+00 : f32
    %341 = vector.broadcast %cst_171 : f32 to vector<25x64xf32>
    %342 = arith.addf %341, %340 : vector<25x64xf32>
    %cst_172 = arith.constant 5.000000e-01 : f32
    %343 = vector.broadcast %cst_172 : f32 to vector<25x64xf32>
    %344 = arith.mulf %343, %342 : vector<25x64xf32>
    %345 = arith.mulf %332, %344 : vector<25x64xf32>
    %c1_173 = arith.constant 1 : index
    %c0_174 = arith.constant 0 : index
    %c0_175 = arith.constant 0 : index
    %346 = vector.load %arg13[%c1_173, %c0_174, %c0_175] : memref<2x64x32xf32, #tpu.memory_space<vmem>>, vector<1x64x32xf32>
    %347 = vector.shape_cast %346 : vector<1x64x32xf32> to vector<64x32xf32>
    %cst_176 = arith.constant dense<0.000000e+00> : vector<25x32xf32>
    %348 = tpu.matmul %345, %347, %cst_176 {dimension_numbers = #tpu.dot_dimension_numbers<[1], [0], [0], [1], [0, 0, 1, 1], [], []>} : vector<25x64xf32>, vector<64x32xf32>, vector<25x32xf32> -> vector<25x32xf32>
    %c1_177 = arith.constant 1 : index
    %c0_178 = arith.constant 0 : index
    %c0_179 = arith.constant 0 : index
    %349 = vector.load %arg14[%c1_177, %c0_178, %c0_179] : memref<2x1x32xf32, #tpu.memory_space<vmem>>, vector<1x1x32xf32>
    %350 = vector.shape_cast %349 : vector<1x1x32xf32> to vector<1x32xf32>
    %351 = vector.broadcast %350 : vector<1x32xf32> to vector<25x32xf32>
    %352 = arith.addf %348, %351 : vector<25x32xf32>
    %353 = arith.addf %325, %352 : vector<25x32xf32>
    %c0_180 = arith.constant 0 : index
    %c0_181 = arith.constant 0 : index
    %354 = vector.load %arg15[%c0_180, %c0_181] : memref<1x32xf32, #tpu.memory_space<vmem>>, vector<1x32xf32>
    %c0_182 = arith.constant 0 : index
    %c0_183 = arith.constant 0 : index
    %355 = vector.load %arg16[%c0_182, %c0_183] : memref<1x32xf32, #tpu.memory_space<vmem>>, vector<1x32xf32>
    %cst_184 = arith.constant dense<0.000000e+00> : vector<25xf32>
    %356 = vector.multi_reduction <add>, %353, %cst_184 [1] : vector<25x32xf32> to vector<25xf32>
    %357 = vector.shape_cast %356 : vector<25xf32> to vector<25x1xf32>
    %cst_185 = arith.constant 3.200000e+01 : f32
    %358 = vector.broadcast %cst_185 : f32 to vector<25x1xf32>
    %359 = arith.divf %357, %358 : vector<25x1xf32>
    %360 = vector.broadcast %359 : vector<25x1xf32> to vector<25x32xf32>
    %361 = arith.subf %353, %360 : vector<25x32xf32>
    %362 = arith.mulf %361, %361 : vector<25x32xf32>
    %cst_186 = arith.constant dense<0.000000e+00> : vector<25xf32>
    %363 = vector.multi_reduction <add>, %362, %cst_186 [1] : vector<25x32xf32> to vector<25xf32>
    %364 = vector.shape_cast %363 : vector<25xf32> to vector<25x1xf32>
    %cst_187 = arith.constant 3.200000e+01 : f32
    %365 = vector.broadcast %cst_187 : f32 to vector<25x1xf32>
    %366 = arith.divf %364, %365 : vector<25x1xf32>
    %cst_188 = arith.constant 9.99999974E-6 : f32
    %367 = vector.broadcast %cst_188 : f32 to vector<25x1xf32>
    %368 = arith.addf %366, %367 : vector<25x1xf32>
    %369 = math.rsqrt %368 : vector<25x1xf32>
    %370 = vector.broadcast %369 : vector<25x1xf32> to vector<25x32xf32>
    %371 = arith.mulf %361, %370 : vector<25x32xf32>
    %372 = vector.broadcast %354 : vector<1x32xf32> to vector<25x32xf32>
    %373 = arith.mulf %371, %372 : vector<25x32xf32>
    %374 = vector.broadcast %355 : vector<1x32xf32> to vector<25x32xf32>
    %375 = arith.addf %373, %374 : vector<25x32xf32>
    %c0_189 = arith.constant 0 : index
    %c0_190 = arith.constant 0 : index
    %376 = vector.load %arg17[%c0_189, %c0_190] : memref<1x32xf32, #tpu.memory_space<vmem>>, vector<1x32xf32>
    %377 = vector.broadcast %376 : vector<1x32xf32> to vector<25x32xf32>
    %378 = arith.mulf %375, %377 : vector<25x32xf32>
    %cst_191 = arith.constant dense<0.000000e+00> : vector<25xf32>
    %379 = vector.multi_reduction <add>, %378, %cst_191 [1] : vector<25x32xf32> to vector<25xf32>
    %380 = vector.shape_cast %379 : vector<25xf32> to vector<25x1xf32>
    %c0_192 = arith.constant 0 : index
    %c0_193 = arith.constant 0 : index
    %381 = vector.load %arg18[%c0_192, %c0_193] : memref<1x1xf32, #tpu.memory_space<vmem>>, vector<1x1xf32>
    %382 = vector.broadcast %381 : vector<1x1xf32> to vector<25x1xf32>
    %383 = arith.addf %380, %382 : vector<25x1xf32>
    %cst_194 = arith.constant dense<0xFF800000> : vector<1xf32>
    %384 = vector.multi_reduction <maximumf>, %383, %cst_194 [0] : vector<25x1xf32> to vector<1xf32>
    %385 = vector.shape_cast %384 : vector<1xf32> to vector<1x1xf32>
    %386 = vector.broadcast %385 : vector<1x1xf32> to vector<25x1xf32>
    %387 = arith.subf %383, %386 : vector<25x1xf32>
    %388 = math.exp %387 : vector<25x1xf32>
    %cst_195 = arith.constant dense<0.000000e+00> : vector<1xf32>
    %389 = vector.multi_reduction <add>, %388, %cst_195 [0] : vector<25x1xf32> to vector<1xf32>
    %390 = vector.shape_cast %389 : vector<1xf32> to vector<1x1xf32>
    %391 = tpu.reciprocal %390 {approx = true} : vector<1x1xf32> -> vector<1x1xf32>
    %392 = vector.broadcast %391 : vector<1x1xf32> to vector<25x1xf32>
    %393 = arith.mulf %388, %392 : vector<25x1xf32>
    %cst_196 = arith.constant dense<0.000000e+00> : vector<1x32xf32>
    %394 = tpu.matmul %393, %375, %cst_196 {dimension_numbers = #tpu.dot_dimension_numbers<[0], [0], [1], [1], [0, 1, 1, 1], [], []>} : vector<25x1xf32>, vector<25x32xf32>, vector<1x32xf32> -> vector<1x32xf32>
    %c0_197 = arith.constant 0 : index
    %c0_198 = arith.constant 0 : index
    %395 = vector.load %arg19[%c0_197, %c0_198] : memref<32x128xf32, #tpu.memory_space<vmem>>, vector<32x128xf32>
    %cst_199 = arith.constant dense<0.000000e+00> : vector<1x128xf32>
    %396 = tpu.matmul %394, %395, %cst_199 {dimension_numbers = #tpu.dot_dimension_numbers<[1], [0], [0], [1], [0, 0, 1, 1], [], []>} : vector<1x32xf32>, vector<32x128xf32>, vector<1x128xf32> -> vector<1x128xf32>
    %c0_200 = arith.constant 0 : index
    %c0_201 = arith.constant 0 : index
    %397 = vector.load %arg20[%c0_200, %c0_201] : memref<1x128xf32, #tpu.memory_space<vmem>>, vector<1x128xf32>
    %398 = arith.addf %396, %397 : vector<1x128xf32>
    %c0_202 = arith.constant 0 : index
    %c0_203 = arith.constant 0 : index
    %c0_204 = arith.constant 0 : index
    %399 = vector.load %arg21[%c0_202, %c0_203, %c0_204] : memref<1x1x128xf32, #tpu.memory_space<vmem>>, vector<1x1x128xf32>
    %400 = vector.shape_cast %399 : vector<1x1x128xf32> to vector<1x128xf32>
    %401 = vector.shape_cast %398 : vector<1x128xf32> to vector<1x1x128xf32>
    tpu.vector_store %arg21[%c0_202, %c0_203, %c0_204], %401 {strides = array<i32>} : memref<1x1x128xf32, #tpu.memory_space<vmem>>, vector<1x1x128xf32>,
    return
  }
  func.func @transform_0(%arg0: i32) -> (i32, i32, i32, i32) {
    %c0_i32 = arith.constant 0 : i32
    %c0_i32_0 = arith.constant 0 : i32
    %c0_i32_1 = arith.constant 0 : i32
    %c0_i32_2 = arith.constant 0 : i32
    return %arg0, %c0_i32, %c0_i32_0, %c0_i32_1 : i32, i32, i32, i32
  }
  func.func @transform_1(%arg0: i32) -> (i32, i32) {
    %c0_i32 = arith.constant 0 : i32
    %c0_i32_0 = arith.constant 0 : i32
    %c0_i32_1 = arith.constant 0 : i32
    return %c0_i32, %c0_i32_0 : i32, i32
  }
  func.func @transform_2(%arg0: i32) -> (i32, i32) {
    %c0_i32 = arith.constant 0 : i32
    %c0_i32_0 = arith.constant 0 : i32
    %c0_i32_1 = arith.constant 0 : i32
    return %c0_i32, %c0_i32_0 : i32, i32
  }
  func.func @transform_3(%arg0: i32) -> (i32, i32, i32) {
    %c0_i32 = arith.constant 0 : i32
    %c0_i32_0 = arith.constant 0 : i32
    %c0_i32_1 = arith.constant 0 : i32
    %c0_i32_2 = arith.constant 0 : i32
    return %c0_i32, %c0_i32_0, %c0_i32_1 : i32, i32, i32
  }
  func.func @transform_4(%arg0: i32) -> (i32, i32, i32) {
    %c0_i32 = arith.constant 0 : i32
    %c0_i32_0 = arith.constant 0 : i32
    %c0_i32_1 = arith.constant 0 : i32
    %c0_i32_2 = arith.constant 0 : i32
    return %c0_i32, %c0_i32_0, %c0_i32_1 : i32, i32, i32
  }
  func.func @transform_5(%arg0: i32) -> (i32, i32, i32) {
    %c0_i32 = arith.constant 0 : i32
    %c0_i32_0 = arith.constant 0 : i32
    %c0_i32_1 = arith.constant 0 : i32
    %c0_i32_2 = arith.constant 0 : i32
    return %c0_i32, %c0_i32_0, %c0_i32_1 : i32, i32, i32
  }
  func.func @transform_6(%arg0: i32) -> (i32, i32, i32) {
    %c0_i32 = arith.constant 0 : i32
    %c0_i32_0 = arith.constant 0 : i32
    %c0_i32_1 = arith.constant 0 : i32
    %c0_i32_2 = arith.constant 0 : i32
    return %c0_i32, %c0_i32_0, %c0_i32_1 : i32, i32, i32
  }
  func.func @transform_7(%arg0: i32) -> (i32, i32, i32) {
    %c0_i32 = arith.constant 0 : i32
    %c0_i32_0 = arith.constant 0 : i32
    %c0_i32_1 = arith.constant 0 : i32
    %c0_i32_2 = arith.constant 0 : i32
    return %c0_i32, %c0_i32_0, %c0_i32_1 : i32, i32, i32
  }
  func.func @transform_8(%arg0: i32) -> (i32, i32, i32) {
    %c0_i32 = arith.constant 0 : i32
    %c0_i32_0 = arith.constant 0 : i32
    %c0_i32_1 = arith.constant 0 : i32
    %c0_i32_2 = arith.constant 0 : i32
    return %c0_i32, %c0_i32_0, %c0_i32_1 : i32, i32, i32
  }
  func.func @transform_9(%arg0: i32) -> (i32, i32, i32) {
    %c0_i32 = arith.constant 0 : i32
    %c0_i32_0 = arith.constant 0 : i32
    %c0_i32_1 = arith.constant 0 : i32
    %c0_i32_2 = arith.constant 0 : i32
    return %c0_i32, %c0_i32_0, %c0_i32_1 : i32, i32, i32
  }
  func.func @transform_10(%arg0: i32) -> (i32, i32, i32) {
    %c0_i32 = arith.constant 0 : i32
    %c0_i32_0 = arith.constant 0 : i32
    %c0_i32_1 = arith.constant 0 : i32
    %c0_i32_2 = arith.constant 0 : i32
    return %c0_i32, %c0_i32_0, %c0_i32_1 : i32, i32, i32
  }
  func.func @transform_11(%arg0: i32) -> (i32, i32, i32) {
    %c0_i32 = arith.constant 0 : i32
    %c0_i32_0 = arith.constant 0 : i32
    %c0_i32_1 = arith.constant 0 : i32
    %c0_i32_2 = arith.constant 0 : i32
    return %c0_i32, %c0_i32_0, %c0_i32_1 : i32, i32, i32
  }
  func.func @transform_12(%arg0: i32) -> (i32, i32, i32) {
    %c0_i32 = arith.constant 0 : i32
    %c0_i32_0 = arith.constant 0 : i32
    %c0_i32_1 = arith.constant 0 : i32
    %c0_i32_2 = arith.constant 0 : i32
    return %c0_i32, %c0_i32_0, %c0_i32_1 : i32, i32, i32
  }
  func.func @transform_13(%arg0: i32) -> (i32, i32, i32) {
    %c0_i32 = arith.constant 0 : i32
    %c0_i32_0 = arith.constant 0 : i32
    %c0_i32_1 = arith.constant 0 : i32
    %c0_i32_2 = arith.constant 0 : i32
    return %c0_i32, %c0_i32_0, %c0_i32_1 : i32, i32, i32
  }
  func.func @transform_14(%arg0: i32) -> (i32, i32) {
    %c0_i32 = arith.constant 0 : i32
    %c0_i32_0 = arith.constant 0 : i32
    %c0_i32_1 = arith.constant 0 : i32
    return %c0_i32, %c0_i32_0 : i32, i32
  }
  func.func @transform_15(%arg0: i32) -> (i32, i32) {
    %c0_i32 = arith.constant 0 : i32
    %c0_i32_0 = arith.constant 0 : i32
    %c0_i32_1 = arith.constant 0 : i32
    return %c0_i32, %c0_i32_0 : i32, i32
  }
  func.func @transform_16(%arg0: i32) -> (i32, i32) {
    %c0_i32 = arith.constant 0 : i32
    %c0_i32_0 = arith.constant 0 : i32
    %c0_i32_1 = arith.constant 0 : i32
    return %c0_i32, %c0_i32_0 : i32, i32
  }
  func.func @transform_17(%arg0: i32) -> (i32, i32) {
    %c0_i32 = arith.constant 0 : i32
    %c0_i32_0 = arith.constant 0 : i32
    %c0_i32_1 = arith.constant 0 : i32
    return %c0_i32, %c0_i32_0 : i32, i32
  }
  func.func @transform_18(%arg0: i32) -> (i32, i32) {
    %c0_i32 = arith.constant 0 : i32
    %c0_i32_0 = arith.constant 0 : i32
    %c0_i32_1 = arith.constant 0 : i32
    return %c0_i32, %c0_i32_0 : i32, i32
  }
  func.func @transform_19(%arg0: i32) -> (i32, i32) {
    %c0_i32 = arith.constant 0 : i32
    %c0_i32_0 = arith.constant 0 : i32
    %c0_i32_1 = arith.constant 0 : i32
    return %c0_i32, %c0_i32_0 : i32, i32
  }
  func.func @transform_20(%arg0: i32) -> (i32, i32, i32) {
    %c0_i32 = arith.constant 0 : i32
    %c0_i32_0 = arith.constant 0 : i32
    %c0_i32_1 = arith.constant 0 : i32
    return %arg0, %c0_i32, %c0_i32_0 : i32, i32, i32
  }
}

</mosaic_0001>

<bundles_post_ra>
// kernel: cct_forward.1
= control target key start
LH: loop header
LB: loop body
LE: loop exit
PB: predicated region body
PF: predicated region fallthrough
CT: control target
= control target key end

     0   :  { %s5884_s0 = inlined_call_operand.vmem [shape: f32[2,9,25,27], index: 0, kind: input, shape index: {}]   ;;  %s5885_s1 = inlined_call_operand.vmem [shape: f32[27,32], index: 1, kind: input, shape index: {}]   ;;  %s5886_s2 = inlined_call_operand.vmem [shape: f32[25,32], index: 2, kind: input, shape index: {}]   ;;  %s5887_s3 = inlined_call_operand.vmem [shape: f32[2,1,32], index: 3, kind: input, shape index: {}]   ;;  %s5888_s4 = inlined_call_operand.vmem [shape: f32[2,1,32], index: 4, kind: input, shape index: {}]   ;;  %s5889_s5 = inlined_call_operand.vmem [shape: f32[2,32,96], index: 5, kind: input, shape index: {}]   ;;  %s5890_s6 = inlined_call_operand.vmem [shape: f32[2,32,32], index: 6, kind: input, shape index: {}]   ;;  %s5891_s7 = inlined_call_operand.vmem [shape: f32[2,1,32], index: 7, kind: input, shape index: {}]   ;;  %s5892_s8 = inlined_call_operand.vmem [shape: f32[2,1,32], index: 8, kind: input, shape index: {}]   ;;  %s5893_s9 = inlined_call_operand.vmem [shape: f32[2,1,32], index: 9, kind: input, shape index: {}]   ;;  %s5894_s10 = inlined_call_operand.vmem [shape: f32[2,32,64], index: 10, kind: input, shape index: {}]   ;;  %s5895_s11 = inlined_call_operand.vmem [shape: f32[2,1,64], index: 11, kind: input, shape index: {}]   ;;  %s5896_s12 = inlined_call_operand.vmem [shape: f32[2,64,32], index: 12, kind: input, shape index: {}]   ;;  %s5897_s13 = inlined_call_operand.vmem [shape: f32[2,1,32], index: 13, kind: input, shape index: {}]   ;;  %s5898_s14 = inlined_call_operand.vmem [shape: f32[1,32], index: 14, kind: input, shape index: {}]   ;;  %s5899_s15 = inlined_call_operand.vmem [shape: f32[1,32], index: 15, kind: input, shape index: {}]   ;;  %s5900_s16 = inlined_call_operand.vmem [shape: f32[1,32], index: 16, kind: input, shape index: {}]   ;;  %s5901_s17 = inlined_call_operand.<no memory space> [shape: f32[1,1], index: 17, kind: input, shape index: {}]   ;;  %s5902_s18 = inlined_call_operand.vmem [shape: f32[32,128], index: 18, kind: input, shape index: {}]   ;;  %s5903_s19 = inlined_call_operand.vmem [shape: f32[1,128], index: 19, kind: input, shape index: {}]   ;;  %s5904_s20 = inlined_call_operand.hbm [shape: f32[2,1,128], index: 20, kind: output, shape index: {}]  }
   0x1   :  { %5938 = sst [smem:[#allocation11_spill]] %s5884_s0  ;;  %v25_v0 = vstv %s5901_s17 }
   0x2   :  { %5939 = sst [smem:[#allocation12_spill]] %s5885_s1  ;;  %26 = vst [vmem:[#allocation2] sm:$0x1] %v25_v0 }
   0x3   :  { %5940 = sst [smem:[#allocation13_spill]] %s5886_s2 }
   0x4   :  { %5941 = sst [smem:[#allocation14_spill]] %s5887_s3 }
   0x5   :  { %5942 = sst [smem:[#allocation15_spill]] %s5888_s4 }
   0x6   :  { %5943 = sst [smem:[#allocation16_spill]] %s5889_s5 }
   0x7   :  { %5944 = sst [smem:[#allocation17_spill]] %s5890_s6 }
   0x8   :  { %27 = vsyncpa [#allocation4], 0 }
   0x9   :  { %29 = vsyncpa [#allocation4 + $0x1], 0  ;;  %s4647_s23 = smov 0   ;;  %s4649_s24 = smov 0  }
   0xa   :  { %s4651_s2 = smov 0   ;;  %s4653_s25 = smov 0  }
   0xb LB: > { %5945 = sst [smem:[#allocation6_spill]] %s4513_s23  ;;  %s4668_s17 = sadd.s32 4294967295, %s4525_s25   ;;  %s4525_s25 = sphi %s4653_s25, %s5972_s25   ;;  %s4521_s2 = sphi %s4651_s2, %s5974_s2   ;;  %s4517_s24 = sphi %s4649_s24, %s5976_s24   ;;  %s4513_s23 = sphi %s4647_s23, %s5975_s23  }
   0xc   : > { %5946 = sst [smem:[#allocation7_spill]] %s4521_s2  ;;  %s3882_s3 = sadd.s32 4294967294, %s4525_s25  }
   0xd   : > { %s4672_s26 = sadd.s32 1, %s4525_s25   ;;  %s467_s27 = sadd.s32 1, %s4521_s2 }
   0xe   : > { %5947 = sst [smem:[#allocation8_spill]] %s4672_s26  ;;  %s464_s28 = ssub.s32 %s4525_s25, %s4672_s26 }
   0xf   : > { %p477_p0 = scmp.ne.s32.totalorder %s4521_s2, %s4517_s24  ;;  %p465_p1 = scmp.eq.s32.totalorder %s464_s28, 0 }
  0x10   : > { %p478_p2 = scmp.eq.s32.totalorder %s4668_s17, 1  ;;  %p483_p3 = scmp.ne.s32.totalorder %s4517_s24, %s4513_s23 }
  0x11   : > { %p484_p4 = scmp.eq.s32.totalorder %s3882_s3, 1  ;;  %p3885_p7 = scmp.ge.s32.totalorder %s4525_s25, 1 }
  0x12   : > { %s4683_s4 = scalar_select %p465_p1, %s4521_s2, %s467_s27  }
  0x13   : > { %p4685_p5 = por %p478_p2, %p477_p0  ;;  %p4689_p6 = por %p484_p4, %p483_p3 }
  0x14   : > { %5948 = sst [smem:[#allocation9_spill]] %s4683_s4  ;;  %p567_p8 = scmp.lt.s32.totalorder %s4525_s25, 3 }
  0x15   : > { %s5950_s30 = scalar_select %p4689_p6, 1, 0 }
  0x16   : > { %p568_p9 = pnand %p3885_p7, %p567_p8 }
  0x17   : > { %5951 = sst [smem:[#allocation10_spill]] %s5950_s30  ;;  %p624_p10 = scmp.lt.s32.totalorder (!%p568_p9), %s4668_s17, 1 }
  0x18   : > { %571 = sbr.rel (%p568_p9) target bundleno = 5985 (0x1761), region = 100  ;;  %s5952_s1 = sld [smem:[#allocation12_spill]] (!%p568_p9) }
  0x19   : > { %s5953_s28 = sld [smem:[#allocation11_spill]] (!%p568_p9)  ;;  %s5923_s3 = smov (!%p568_p9), 80  }
  0x1a   : > { %s5954_s0 = sld [smem:[#allocation13_spill]] (!%p568_p9)  ;;  %s5961_s26 = smov (!%p568_p9), 120  }
  0x1b   : > { %s5955_s5 = sld [smem:[#allocation16_spill]] (!%p568_p9)  ;;  %s5965_s23 = smov (!%p568_p9), 112  }
  0x1c   : > { %s5956_s21 = sld [smem:[#allocation14_spill]] (!%p568_p9)  ;;  %s5966_s30 = smov (!%p568_p9), 80  }
  0x1d   : > { %vm650_vm0 = vcmask 1042432   ;;  %s625_s4 = scalar_select %p624_p10, %s4668_s17, 1  ;;  %vm637_vm1 = vcmask 220160   ;;  %vm1097_vm2 = vcmask 261120   ;;  %vm1107_vm3 = vcmask 253952  }
  0x1e   : > { %v632_v1 = vld [vmem:[%s5952_s1 + $0x18] sm:$0x7]  ;;  %v631_v2 = vld [vmem:[%s5952_s1 + $0x10] sm:$0xff]  ;;  %v630_v3 = vld [vmem:[%s5952_s1 + $0x8] sm:$0xff]  ;;  %s5957_s27 = sld [smem:[#allocation15_spill]] }
  0x1f   : > { %3887 = vmatpush.msk.msra.mxu0 %vm650_vm0, %v632_v1  ;;  %3896 = vmatpush.msk.msra.mxu1 %vm650_vm0, %v632_v1  ;;  %v629_v4 = vld [vmem:[%s5952_s1] sm:$0xff]  ;;  %s4156_s22 = smul.u32 288, %s625_s4  ;;  %s5915_s4 = smov 88  }
  0x20   : > { %3905 = vmatpush.msk.msra.mxu2 %vm650_vm0, %v632_v1  ;;  %3914 = vmatpush.msk.msra.mxu3 %vm650_vm0, %v632_v1  ;;  %s5958_s6 = sld [smem:[#allocation17_spill]]  ;;  %s5962_s1 = smov 88  }
  0x21   : > { %667 = vmatpush.msra.mxu0 %v631_v2  ;;  %713 = vmatpush.msra.mxu1 %v631_v2  ;;  %s4716_s2 = scalar_lea.vmem %s5953_s28, %s4156_s22  ;;  %s5913_s28 = smov 96  }
  0x22   : > { %763 = vmatpush.msra.mxu2 %v631_v2  ;;  %813 = vmatpush.msra.mxu3 %v631_v2  ;;  %v633_v5 = vld [vmem:[%s4716_s2] sm:$0xff]  ;;  %v634_v9 = vld [vmem:[%s4716_s2 + $0x8] sm:$0xff]  ;;  %v635_v13 = vld [vmem:[%s4716_s2 + $0x10] sm:$0xff]  ;;  %s5931_s22 = smov 72  }
  0x23   : > { %668 = vmatpush.msra.mxu0 %v630_v3  ;;  %714 = vmatpush.msra.mxu1 %v630_v3  ;;  %v3892_v6 = vld [vmem:[%s4716_s2 + $0x20] sm:$0xff]  ;;  %v3893_v10 = vld [vmem:[%s4716_s2 + $0x28] sm:$0xff]  ;;  %v3894_v14 = vld [vmem:[%s4716_s2 + $0x30] sm:$0xff] }
  0x24   : > { %764 = vmatpush.msra.mxu2 %v630_v3  ;;  %814 = vmatpush.msra.mxu3 %v630_v3  ;;  %v3901_v7 = vld [vmem:[%s4716_s2 + $0x40] sm:$0xff]  ;;  %v3902_v11 = vld [vmem:[%s4716_s2 + $0x48] sm:$0xff]  ;;  %v3903_v15 = vld [vmem:[%s4716_s2 + $0x50] sm:$0xff] }
  0x25   : > { %669 = vmatpush.msra.mxu0 %v629_v4  ;;  %715 = vmatpush.msra.mxu1 %v629_v4  ;;  %v3910_v8 = vld [vmem:[%s4716_s2 + $0x60] sm:$0xff]  ;;  %v3911_v12 = vld [vmem:[%s4716_s2 + $0x68] sm:$0xff]  ;;  %v3912_v16 = vld [vmem:[%s4716_s2 + $0x70] sm:$0xff] }
  0x26   : > { %765 = vmatpush.msra.mxu2 %v629_v4  ;;  %3888 = vmatmul.msk.f32.vlgmr.msra.gmra.mxu0 %vm637_vm1, %v633_v5  ;;  %v636_v17 = vld [vmem:[%s4716_s2 + $0x18] sm:$0x1]  ;;  %v3919_v21 = vld [vmem:[%s4716_s2 + $0x80] sm:$0xff]  ;;  %v3920_v25 = vld [vmem:[%s4716_s2 + $0x88] sm:$0xff] }
  0x27   : > { %3897 = vmatmul.msk.f32.vlgmr.msra.gmra.mxu1 %vm637_vm1, %v3892_v6  ;;  %3906 = vmatmul.msk.f32.vlgmr.msra.gmra.mxu2 %vm637_vm1, %v3901_v7  ;;  %v3895_v18 = vld [vmem:[%s4716_s2 + $0x38] sm:$0x1]  ;;  %v3937_v22 = vld [vmem:[%s4716_s2 + $0xc0] sm:$0xff]  ;;  %v3938_v26 = vld [vmem:[%s4716_s2 + $0xc8] sm:$0xff] }
  0x28   : > { %815 = vmatpush.msra.mxu3 %v629_v4  ;;  %3923 = vmatpush.msk.msrb.mxu0 %vm650_vm0, %v632_v1  ;;  %v3904_v19 = vld [vmem:[%s4716_s2 + $0x58] sm:$0x1]  ;;  %v3928_v23 = vld [vmem:[%s4716_s2 + $0xa0] sm:$0xff]  ;;  %v3929_v27 = vld [vmem:[%s4716_s2 + $0xa8] sm:$0xff] }
  0x29   : > { %3915 = vmatmul.msk.f32.vlgmr.msra.gmra.mxu3 %vm637_vm1, %v3910_v8  ;;  %3941 = vmatpush.msk.msrb.mxu2 %vm650_vm0, %v632_v1  ;;  %v3913_v20 = vld [vmem:[%s4716_s2 + $0x78] sm:$0x1]  ;;  %v3946_v24 = vld [vmem:[%s4716_s2 + $0xe0] sm:$0xff]  ;;  %v3947_v28 = vld [vmem:[%s4716_s2 + $0xe8] sm:$0xff] }
  0x2a   : > { %863 = vmatpush.msrb.mxu0 %v631_v2  ;;  %3932 = vmatpush.msk.msrb.mxu1 %vm650_vm0, %v632_v1  ;;  %v3921_v29 = vld [vmem:[%s4716_s2 + $0x90] sm:$0xff]  ;;  %v3922_v33 = vld [vmem:[%s4716_s2 + $0x98] sm:$0x1]  ;;  %v3955_v37 = vld [vmem:[%s4716_s2 + $0x100] sm:$0xff] }
  0x2b   : > { %963 = vmatpush.msrb.mxu2 %v631_v2  ;;  %3950 = vmatpush.msk.msrb.mxu3 %vm650_vm0, %v632_v1  ;;  %v3939_v30 = vld [vmem:[%s4716_s2 + $0xd0] sm:$0xff]  ;;  %v3940_v34 = vld [vmem:[%s4716_s2 + $0xd8] sm:$0x1]  ;;  %v3956_v38 = vld [vmem:[%s4716_s2 + $0x108] sm:$0xff] }
  0x2c   : > { %864 = vmatpush.msrb.mxu0 %v630_v3  ;;  %913 = vmatpush.msrb.mxu1 %v631_v2  ;;  %v3930_v31 = vld [vmem:[%s4716_s2 + $0xb0] sm:$0xff]  ;;  %v3931_v35 = vld [vmem:[%s4716_s2 + $0xb8] sm:$0x1] }
  0x2d   : > { %964 = vmatpush.msrb.mxu2 %v630_v3  ;;  %1013 = vmatpush.msrb.mxu3 %v631_v2  ;;  %v3948_v32 = vld [vmem:[%s4716_s2 + $0xf0] sm:$0xff]  ;;  %v3949_v36 = vld [vmem:[%s4716_s2 + $0xf8] sm:$0x1] }
  0x2e   : > { %3889 = vmatmul.msk.f32.gmra.mxu0 %vm637_vm1, %v634_v9  ;;  %914 = vmatpush.msrb.mxu1 %v630_v3  ;;  %v3957_v39 = vld [vmem:[%s4716_s2 + $0x110] sm:$0xff]  ;;  %v3958_v40 = vld [vmem:[%s4716_s2 + $0x118] sm:$0x1]  ;;  %s5911_s2 = smov 64  }
  0x2f   : > { %3898 = vmatmul.msk.f32.gmra.mxu1 %vm637_vm1, %v3893_v10  ;;  %3907 = vmatmul.msk.f32.gmra.mxu2 %vm637_vm1, %v3902_v11 }
  0x30   : > { %865 = vmatpush.msrb.mxu0 %v629_v4  ;;  %965 = vmatpush.msrb.mxu2 %v629_v4 }
  0x31   : > { %3916 = vmatmul.msk.f32.gmra.mxu3 %vm637_vm1, %v3911_v12  ;;  %915 = vmatpush.msrb.mxu1 %v629_v4 }
  0x32   : > { %1014 = vmatpush.msrb.mxu3 %v630_v3  ;;  %3959 = vmatpush.msk.msra.mxu0 %vm650_vm0, %v632_v1 }
  0x34   : > { %1015 = vmatpush.msrb.mxu3 %v629_v4  ;;  %1063 = vmatpush.msra.mxu0 %v631_v2 }
  0x36   : > { %3890 = vmatmul.msk.f32.gmra.mxu0 %vm637_vm1, %v635_v13 }
  0x37   : > { %3899 = vmatmul.msk.f32.gmra.mxu1 %vm637_vm1, %v3894_v14  ;;  %3908 = vmatmul.msk.f32.gmra.mxu2 %vm637_vm1, %v3903_v15 }
  0x38   : > { %1064 = vmatpush.msra.mxu0 %v630_v3 }
  0x39   : > { %3917 = vmatmul.msk.f32.gmra.mxu3 %vm637_vm1, %v3912_v16 }
  0x3a   : > { %1065 = vmatpush.msra.mxu0 %v629_v4 }
  0x3e   : > { %3891 = vmatmul.msk.f32.gmra.mxu0 %vm637_vm1, %v636_v17 }
  0x3f   : > { %3900 = vmatmul.msk.f32.gmra.mxu1 %vm637_vm1, %v3895_v18  ;;  %3909 = vmatmul.msk.f32.gmra.mxu2 %vm637_vm1, %v3904_v19  ;;  %v1087_v19 = vld [vmem:[%s5954_s0] sm:$0xff] }
  0x41   : > { %3918 = vmatmul.msk.f32.gmra.mxu3 %vm637_vm1, %v3913_v20 }
  0x46   : > { %3924 = vmatmul.msk.f32.vlgmr.msrb.gmra.mxu0 %vm637_vm1, %v3919_v21 }
  0x47   : > { %3942 = vmatmul.msk.f32.vlgmr.msrb.gmra.mxu2 %vm637_vm1, %v3937_v22  ;;  %3933 = vmatmul.msk.f32.vlgmr.msrb.gmra.mxu1 %vm637_vm1, %v3928_v23 }
  0x49   : > { %3951 = vmatmul.msk.f32.vlgmr.msrb.gmra.mxu3 %vm637_vm1, %v3946_v24 }
  0x4e   : > { %3925 = vmatmul.msk.f32.gmra.mxu0 %vm637_vm1, %v3920_v25 }
  0x4f   : > { %3943 = vmatmul.msk.f32.gmra.mxu2 %vm637_vm1, %v3938_v26  ;;  %3934 = vmatmul.msk.f32.gmra.mxu1 %vm637_vm1, %v3929_v27 }
  0x51   : > { %3952 = vmatmul.msk.f32.gmra.mxu3 %vm637_vm1, %v3947_v28 }
  0x56   : > { %3926 = vmatmul.msk.f32.gmra.mxu0 %vm637_vm1, %v3921_v29 }
  0x57   : > { %3944 = vmatmul.msk.f32.gmra.mxu2 %vm637_vm1, %v3939_v30  ;;  %3935 = vmatmul.msk.f32.gmra.mxu1 %vm637_vm1, %v3930_v31 }
  0x59   : > { %3953 = vmatmul.msk.f32.gmra.mxu3 %vm637_vm1, %v3948_v32 }
  0x5e   : > { %3927 = vmatmul.msk.f32.gmra.mxu0 %vm637_vm1, %v3922_v33 }
  0x5f   : > { %3945 = vmatmul.msk.f32.gmra.mxu2 %vm637_vm1, %v3940_v34  ;;  %3936 = vmatmul.msk.f32.gmra.mxu1 %vm637_vm1, %v3931_v35  ;;  %v1088_v35 = vld [vmem:[%s5954_s0 + $0x8] sm:$0xff] }
  0x61   : > { %3954 = vmatmul.msk.f32.gmra.mxu3 %vm637_vm1, %v3949_v36 }
  0x66   : > { %3960 = vmatmul.msk.f32.vlgmr.msra.gmra.mxu0 %vm637_vm1, %v3955_v37 }
  0x6e   : > { %3961 = vmatmul.msk.f32.gmra.mxu0 %vm637_vm1, %v3956_v38 }
  0x76   : > { %3962 = vmatmul.msk.f32.gmra.mxu0 %vm637_vm1, %v3957_v39 }
  0x7e   : > { %3963 = vmatmul.msk.f32.gmra.mxu0 %vm637_vm1, %v3958_v40  ;;  %vm1269_vm1 = vcmask 64512  }
  0xa3   : > { %v671_v41 = vpop.f32.mrf.mxu0 }
  0xa4   : > { %v717_v43 = vpop.f32.mrf.mxu1 }
  0xa5   : > { %v729_v59 = vmax.f32 %v671_v41, %v717_v43 }
  0xaa   : > { %v767_v44 = vpop.f32.mrf.mxu2 }
  0xab   : > { %v674_v42 = vpop.f32.mrf.mxu0  ;;  %v779_v60 = vmax.f32 %v729_v59, %v767_v44 }
  0xac   : > { %v817_v45 = vpop.f32.mrf.mxu3  ;;  %v720_v47 = vpop.f32.mrf.mxu1 }
  0xad   : > { %v829_v0 = vmax.f32 %v779_v60, %v817_v45  ;;  %v730_v1 = vmax.f32 %v674_v42, %v720_v47 }
  0xb2   : > { %v770_v48 = vpop.f32.mrf.mxu2 }
  0xb3   : > { %v677_v46 = vpop.f32.mrf.mxu0  ;;  %v780_v4 = vmax.f32 %v730_v1, %v770_v48  ;;  %v1089_v48 = vld [vmem:[%s5954_s0 + $0x10] sm:$0xff] }
  0xb4   : > { %v820_v49 = vpop.f32.mrf.mxu3  ;;  %v723_v51 = vpop.f32.mrf.mxu1 }
  0xb5   : > { %v830_v8 = vmax.f32 %v780_v4, %v820_v49  ;;  %v731_v11 = vmax.f32 %v677_v46, %v723_v51 }
  0xba   : > { %v773_v52 = vpop.f32.mrf.mxu2 }
  0xbb   : > { %v680_v50 = vpop.f32.mrf.mxu0  ;;  %v781_v13 = vmax.f32 %v731_v11, %v773_v52 }
  0xbc   : > { %v823_v54 = vpop.f32.mrf.mxu3  ;;  %v726_v55 = vpop.f32.mrf.mxu1 }
  0xbd   : > { %v831_v20 = vmax.f32 %v781_v13, %v823_v54  ;;  %v732_v24 = vmax.f32 %v680_v50, %v726_v55 }
  0xc2   : > { %v776_v56 = vpop.f32.mrf.mxu2 }
  0xc3   : > { %v867_v53 = vpop.f32.mrf.mxu0  ;;  %v782_v28 = vmax.f32 %v732_v24, %v776_v56  ;;  %v1211_v24 = vld [vmem:[%s5955_s5 + $0x18] sm:$0xff] }
  0xc4   : > { %v826_v58 = vpop.f32.mrf.mxu3  ;;  %v917_v61 = vpop.f32.mrf.mxu1  ;;  %v879_v2 = vmax.f32 %v829_v0, %v867_v53  ;;  %1236 = vmatpush.msra.mxu1 %v1211_v24 }
  0xc5   : > { %v832_v36 = vmax.f32 %v782_v28, %v826_v58  ;;  %v1208_v28 = vld [vmem:[%s5955_s5] sm:$0xff] }
  0xc6   : > { %v929_v6 = vmax.f32 %v879_v2, %v917_v61  ;;  %v4527_v61 = vmov 32.0  }
  0xc7   : > { %4267 = vrcp.f32 %v4527_v61 }
  0xca   : > { %v967_v63 = vpop.f32.mrf.mxu2 }
  0xcb   : > { %v870_v57 = vpop.f32.mrf.mxu0  ;;  %v979_v9 = vmax.f32 %v929_v6, %v967_v63 }
  0xcc   : > { %v1017_v3 = vpop.f32.mrf.mxu3  ;;  %v920_v7 = vpop.f32.mrf.mxu1  ;;  %v880_v12 = vmax.f32 %v830_v8, %v870_v57  ;;  %v1090_v57 = vld [vmem:[%s5954_s0 + $0x18] sm:$0x1]  ;;  %s5917_s0 = smov 120  }
  0xcd   : > { %v1029_v14 = vmax.f32 %v979_v9, %v1017_v3 }
  0xce   : > { %v930_v17 = vmax.f32 %v880_v12, %v920_v7 }
  0xd2   : > { %v970_v10 = vpop.f32.mrf.mxu2 }
  0xd3   : > { %v873_v62 = vpop.f32.mrf.mxu0  ;;  %v980_v21 = vmax.f32 %v930_v17, %v970_v10 }
  0xd4   : > { %v1020_v15 = vpop.f32.mrf.mxu3  ;;  %v923_v23 = vpop.f32.mrf.mxu1  ;;  %v881_v25 = vmax.f32 %v831_v20, %v873_v62 }
  0xd5   : > { %v1030_v29 = vmax.f32 %v980_v21, %v1020_v15  ;;  %v4268_v62 = vpop.eup %4267 }
  0xd6   : > { %v931_v32 = vmax.f32 %v881_v25, %v923_v23  ;;  %v1112_v63 = vmul.f32 32.0, %v4268_v62  ;;  %vm1116_vm4 = vweird.f32 %v4268_v62  ;;  %v1210_v25 = vld [vmem:[%s5955_s5 + $0x10] sm:$0xff] }
  0xd7   : > { %1237 = vmatpush.msra.mxu1 %v1210_v25 }
  0xd8   : > { %v1113_v0 = vsub.f32 1.0, %v1112_v63 }
  0xda   : > { %v973_v27 = vpop.f32.mrf.mxu2  ;;  %v1114_v1 = vmul.f32 %v4268_v62, %v1113_v0 }
  0xdb   : > { %v876_v5 = vpop.f32.mrf.mxu0  ;;  %v981_v37 = vmax.f32 %v931_v32, %v973_v27  ;;  %v1209_v27 = vld [vmem:[%s5955_s5 + $0x8] sm:$0xff] }
  0xdc   : > { %v1023_v34 = vpop.f32.mrf.mxu3  ;;  %v882_v39 = vmax.f32 %v832_v36, %v876_v5  ;;  %v926_v41 = vpop.f32.mrf.mxu1  ;;  %v1115_v2 = vadd.f32 %v4268_v62, %v1114_v1  ;;  %1238 = vmatpush.msra.mxu1 %v1209_v27 }
  0xdd   : > { %v1031_v42 = vmax.f32 %v981_v37, %v1023_v34 }
  0xde   : > { %v932_v46 = vmax.f32 %v882_v39, %v926_v41  ;;  %v4823_v3 = vsel %vm1116_vm4, %v4268_v62, %v1115_v2  ;;  %1239 = vmatpush.msra.mxu1 %v1208_v28  ;;  %vm1315_vm4 = vcmask 203776  }
  0xe2   : > { %v976_v44 = vpop.f32.mrf.mxu2 }
  0xe3   : > { %v1067_v16 = vpop.f32.mrf.mxu0  ;;  %v982_v49 = vmax.f32 %v932_v46, %v976_v44 }
  0xe4   : > { %v1079_v18 = vmax.f32 %v1029_v14, %v1067_v16  ;;  %v1026_v51 = vpop.f32.mrf.mxu3 }
  0xe5   : > { %v1032_v53 = vmax.f32 %v982_v49, %v1026_v51  ;;  %v4250_v51 = vld [vmem:[%s5957_s27] ss:$0 sm:$0xff] }
  0xe6   : > { %v1083_v22 = vmax.f32 %v1079_v18, 0.0 }
  0xe8   : > { %v4798_v26 = vadd.f32 %v1087_v19, %v1083_v22 }
  0xea   : > { %v1098_v30 = vsel %vm1097_vm2, %v4798_v26, 0.0 }
  0xeb   : > { %1099 = vadd.xlane.f32.xlu0 %v1098_v30  ;;  %v1070_v31 = vpop.f32.mrf.mxu0 }
  0xec   : > { %v1080_v33 = vmax.f32 %v1030_v29, %v1070_v31 }
  0xee   : > { %v1084_v38 = vmax.f32 %v1080_v33, 0.0 }
  0xf0   : > { %v4805_v40 = vadd.f32 %v1088_v35, %v1084_v38 }
  0xf2   : > { %v1101_v43 = vsel %vm1097_vm2, %v4805_v40, 0.0 }
  0xf3   : > { %1102 = vadd.xlane.f32.xlu0 %v1101_v43  ;;  %v1073_v45 = vpop.f32.mrf.mxu0 }
  0xf4   : > { %v1081_v47 = vmax.f32 %v1031_v42, %v1073_v45 }
  0xf6   : > { %v1085_v50 = vmax.f32 %v1081_v47, 0.0  ;;  %v4249_v47 = vld [vmem:[%s5956_s21] ss:$0 sm:$0xff] }
  0xf8   : > { %v4812_v52 = vadd.f32 %v1089_v48, %v1085_v50 }
  0xfa   : > { %v1104_v54 = vsel %vm1097_vm2, %v4812_v52, 0.0 }
  0xfb   : > { %1105 = vadd.xlane.f32.xlu1 %v1104_v54  ;;  %v1076_v55 = vpop.f32.mrf.mxu0 }
  0xfc   : > { %v1082_v56 = vmax.f32 %v1032_v53, %v1076_v55 }
  0xfe   : > { %v1086_v58 = vmax.f32 %v1082_v56, 0.0 }
 0x100   : > { %v4819_v59 = vadd.f32 %v1090_v57, %v1086_v58 }
 0x102   : > { %v1108_v60 = vsel %vm1107_vm3, %v4819_v59, 0.0 }
 0x103   : > { %1109 = vadd.xlane.f32.xlu1 %v1108_v60 }
 0x15e   : > { %v1100_v4 = vpop.xlane.xlu0 %1099 }
 0x15f   : > { %v1118_v5 = vmul.f32 %v4823_v3, %v1100_v4 }
 0x161   : > { %v1122_v6 = vsub.f32 %v4798_v26, %v1118_v5 }
 0x163   : > { %v1126_v7 = vmul.f32 %v1122_v6, %v1122_v6 }
 0x165   : > { %v1130_v8 = vsel %vm1097_vm2, %v1126_v7, 0.0 }
 0x166   : > { %1131 = vadd.xlane.f32.xlu2 %v1130_v8  ;;  %v1103_v9 = vpop.xlane.xlu0 %1102 }
 0x167   : > { %v1119_v10 = vmul.f32 %v4823_v3, %v1103_v9 }
 0x169   : > { %v4830_v11 = vsub.f32 %v4805_v40, %v1119_v10 }
 0x16b   : > { %v1127_v12 = vmul.f32 %v4830_v11, %v4830_v11 }
 0x16d   : > { %v1133_v13 = vsel %vm1097_vm2, %v1127_v12, 0.0 }
 0x16e   : > { %1134 = vadd.xlane.f32.xlu2 %v1133_v13  ;;  %v1106_v14 = vpop.xlane.xlu1 %1105 }
 0x16f   : > { %v1120_v15 = vmul.f32 %v4823_v3, %v1106_v14 }
 0x171   : > { %v4837_v16 = vsub.f32 %v4812_v52, %v1120_v15 }
 0x173   : > { %v1128_v17 = vmul.f32 %v4837_v16, %v4837_v16 }
 0x175   : > { %v1136_v18 = vsel %vm1097_vm2, %v1128_v17, 0.0 }
 0x176   : > { %1137 = vadd.xlane.f32.xlu0 %v1136_v18  ;;  %v1110_v19 = vpop.xlane.xlu1 %1109 }
 0x177   : > { %v1121_v20 = vmul.f32 %v4823_v3, %v1110_v19 }
 0x179   : > { %v4844_v21 = vsub.f32 %v4819_v59, %v1121_v20 }
 0x17b   : > { %v1129_v22 = vmul.f32 %v4844_v21, %v4844_v21 }
 0x17d   : > { %v1139_v23 = vsel %vm1107_vm3, %v1129_v22, 0.0 }
 0x17e   : > { %1140 = vadd.xlane.f32.xlu1 %v1139_v23 }
 0x1d9   : > { %v1132_v29 = vpop.xlane.xlu2 %1131 }
 0x1da   : > { %v1142_v30 = vmul.f32 %v1132_v29, %v4823_v3 }
 0x1dc   : > { %v1146_v31 = vadd.f32 1e-05, %v1142_v30 }
 0x1de   : > { %4269 = vrsqrt.f32 %v1146_v31  ;;  %vm1156_vm6 = vweird.f32 %v1146_v31 }
 0x1e1   : > { %v1135_v32 = vpop.xlane.xlu2 %1134 }
 0x1e2   : > { %v1143_v33 = vmul.f32 %v1135_v32, %v4823_v3 }
 0x1e4   : > { %v4270_v34 = vpop.eup %4269  ;;  %v1147_v35 = vadd.f32 1e-05, %v1143_v33 }
 0x1e5   : > { %v1151_v36 = vmul.f32 %v4270_v34, %v1146_v31  ;;  %vm1157_vm5 = vweird.f32 %v4270_v34 }
 0x1e6   : > { %4271 = vrsqrt.f32 %v1147_v35  ;;  %vm1158_vm7 = vmor %vm1156_vm6, %vm1157_vm5  ;;  %vm1166_vm9 = vweird.f32 %v1147_v35  ;;  %vm1325_vm5 = vcmask 196608   ;;  %vm1384_vm6 = vcmask 1040384  }
 0x1e7   : > { %v1152_v37 = vmul.f32 %v4270_v34, %v1151_v36 }
 0x1e9   : > { %v1153_v38 = vmul.f32 0.5, %v1152_v37  ;;  %v1138_v39 = vpop.xlane.xlu0 %1137 }
 0x1ea   : > { %v1144_v41 = vmul.f32 %v1138_v39, %v4823_v3 }
 0x1eb   : > { %v1154_v42 = vsub.f32 1.5, %v1153_v38 }
 0x1ec   : > { %v4272_v43 = vpop.eup %4271  ;;  %v1148_v44 = vadd.f32 1e-05, %v1144_v41 }
 0x1ed   : > { %v1155_v45 = vmul.f32 %v4270_v34, %v1154_v42  ;;  %v1161_v46 = vmul.f32 %v4272_v43, %v1147_v35  ;;  %vm1167_vm8 = vweird.f32 %v4272_v43 }
 0x1ee   : > { %4273 = vrsqrt.f32 %v1148_v44  ;;  %vm1168_vm10 = vmor %vm1166_vm9, %vm1167_vm8  ;;  %vm1176_vm12 = vweird.f32 %v1148_v44 }
 0x1ef   : > { %v1159_v48 = vsel %vm1158_vm7, %v4270_v34, %v1155_v45  ;;  %v1162_v49 = vmul.f32 %v4272_v43, %v1161_v46 }
 0x1f0   : > { %v1190_v50 = vmul.f32 %v1159_v48, %v1122_v6 }
 0x1f1   : > { %v1163_v53 = vmul.f32 0.5, %v1162_v49  ;;  %v1141_v54 = vpop.xlane.xlu1 %1140 }
 0x1f2   : > { %v1197_v55 = vmul.f32 %v4249_v47, %v1190_v50  ;;  %v1145_v56 = vmul.f32 %v1141_v54, %v4823_v3 }
 0x1f3   : > { %v1164_v57 = vsub.f32 1.5, %v1163_v53 }
 0x1f4   : > { %v4274_v58 = vpop.eup %4273  ;;  %v1149_v60 = vadd.f32 1e-05, %v1145_v56  ;;  %v1204_v61 = vadd.f32 %v4250_v51, %v1197_v55 }
 0x1f5   : > { %v1165_v62 = vmul.f32 %v4272_v43, %v1164_v57  ;;  %v1171_v63 = vmul.f32 %v4274_v58, %v1148_v44  ;;  %vm1177_vm11 = vweird.f32 %v4274_v58 }
 0x1f6   : > { %4275 = vrsqrt.f32 %v1149_v60  ;;  %3964 = vmatmul.msk.f32.vlgmr.msra.gmra.mxu1 %vm1097_vm2, %v1204_v61  ;;  %vm1178_vm13 = vmor %vm1176_vm12, %vm1177_vm11  ;;  %vm1186_vm15 = vweird.f32 %v1149_v60 }
 0x1f7   : > { %v1172_v0 = vmul.f32 %v4274_v58, %v1171_v63  ;;  %v1169_v1 = vsel %vm1168_vm10, %v4272_v43, %v1165_v62 }
 0x1f8   : > { %v1191_v2 = vmul.f32 %v1169_v1, %v4830_v11 }
 0x1f9   : > { %v1173_v4 = vmul.f32 0.5, %v1172_v0 }
 0x1fa   : > { %v1198_v5 = vmul.f32 %v4249_v47, %v1191_v2 }
 0x1fb   : > { %v1174_v6 = vsub.f32 1.5, %v1173_v4 }
 0x1fc   : > { %v4276_v7 = vpop.eup %4275  ;;  %v1205_v8 = vadd.f32 %v4250_v51, %v1198_v5 }
 0x1fd   : > { %v1175_v9 = vmul.f32 %v4274_v58, %v1174_v6  ;;  %v1181_v10 = vmul.f32 %v4276_v7, %v1149_v60  ;;  %vm1187_vm14 = vweird.f32 %v4276_v7 }
 0x1fe   : > { %3965 = vmatmul.msk.f32.gmra.mxu1 %vm1097_vm2, %v1205_v8  ;;  %vm1188_vm0 = vmor %vm1186_vm15, %vm1187_vm14 }
 0x1ff   : > { %v1182_v12 = vmul.f32 %v4276_v7, %v1181_v10  ;;  %v1179_v13 = vsel %vm1178_vm13, %v4274_v58, %v1175_v9  ;;  %v1253_v10 = vld [vmem:[%s5958_s6] sm:$0xff] }
 0x200   : > { %v1192_v14 = vmul.f32 %v1179_v13, %v4837_v16 }
 0x201   : > { %v1183_v15 = vmul.f32 0.5, %v1182_v12 }
 0x202   : > { %v1199_v17 = vmul.f32 %v4249_v47, %v1192_v14 }
 0x203   : > { %v1184_v18 = vsub.f32 1.5, %v1183_v15 }
 0x204   : > { %v1206_v11 = vadd.f32 %v4250_v51, %v1199_v17 }
 0x205   : > { %v1185_v19 = vmul.f32 %v4276_v7, %v1184_v18 }
 0x206   : > { %3966 = vmatmul.msk.f32.gmra.mxu1 %vm1097_vm2, %v1206_v11 }
 0x207   : > { %v1189_v20 = vsel %vm1188_vm0, %v4276_v7, %v1185_v19 }
 0x208   : > { %v1193_v22 = vmul.f32 %v1189_v20, %v4844_v21 }
 0x20a   : > { %v1200_v23 = vmul.f32 %v4249_v47, %v1193_v22 }
 0x20c   : > { %v1207_v24 = vadd.f32 %v4250_v51, %v1200_v23 }
 0x20e   : > { %3967 = vmatmul.msk.f32.gmra.mxu1 %vm1097_vm2, %v1207_v24 }
 0x273   : > { %v4878_v25 = vpop.f32.mrf.mxu1 }
 0x27b   : > { %v4880_v16 = vpop.f32.mrf.mxu1 }
 0x27c   : > { %1263 = vrot.lane.b32.xlu1 %v4880_v16, %s5913_s28 }
 0x283   : > { %v4884_v27 = vpop.f32.mrf.mxu1 }
 0x284   : > { %1265 = vrot.lane.b32.xlu0 %v4884_v27, %s5913_s28  ;;  %v4914_v41 = vpack.i.bf16 %v4880_v16, %v4884_v27 }
 0x28b   : > { %v4888_v28 = vpop.f32.mrf.mxu1 }
 0x28c   : > { %1267 = vrot.lane.b32.xlu2 %v4888_v28, %s5913_s28 }
 0x294   : > { %1261 = vrot.lane.b32.xlu2 %v4878_v25, %s5913_s28  ;;  %s5927_s28 = smov 112  }
 0x2e6   : > { %v1268_v21 = vpop.permute.xlu2 %1267 }
 0x2e7   : > { %3968 = vmatpush.xpose.msk.msra.mxu2 %vm1269_vm1, %v1268_v21 }
 0x2ee   : > { %v1264_v30 = vpop.permute.xlu1 %1263  ;;  %v1262_v31 = vpop.permute.xlu2 %1261 }
 0x2f6   : > { %v1266_v29 = vpop.permute.xlu0 %1265 }
 0x2f7   : > { %3969 = vmatpush.xpose.msk.msra.mxu2 %vm1269_vm1, %v1266_v29 }
 0x2fb   : > { %3970 = vmatpush.xpose.msk.msra.mxu2 %vm1269_vm1, %v1264_v30 }
 0x2ff   : > { %3971 = vmatpush.xpose.msk.msra.mxu2 %vm1269_vm1, %v1262_v31 }
 0x302   : > { %3972 = vmatmul.msk.f32.vlgmr.msra.gmra.mxu2 %vm1269_vm1, %v4878_v25 }
 0x30a   : > { %3973 = vmatmul.msk.f32.gmra.mxu2 %vm1269_vm1, %v4880_v16 }
 0x312   : > { %3974 = vmatmul.msk.f32.gmra.mxu2 %vm1269_vm1, %v4884_v27 }
 0x31a   : > { %3975 = vmatmul.msk.f32.gmra.mxu2 %vm1269_vm1, %v4888_v28 }
 0x385   : > { %v1303_v32 = vpop.f32.mrf.mxu2 }
 0x386   : > { %v1316_v33 = vsel %vm1315_vm4, %v1303_v32, -inf }
 0x387   : > { %1317 = vmax.xlane.f32.xlu0 %v1316_v33 }
 0x38d   : > { %v1306_v34 = vpop.f32.mrf.mxu2 }
 0x38e   : > { %v1319_v35 = vsel %vm1315_vm4, %v1306_v34, -inf }
 0x38f   : > { %1320 = vmax.xlane.f32.xlu2 %v1319_v35 }
 0x395   : > { %v1309_v36 = vpop.f32.mrf.mxu2 }
 0x396   : > { %v1322_v37 = vsel %vm1315_vm4, %v1309_v36, -inf }
 0x397   : > { %1323 = vmax.xlane.f32.xlu1 %v1322_v37 }
 0x39d   : > { %v1312_v38 = vpop.f32.mrf.mxu2 }
 0x39e   : > { %v1326_v39 = vsel %vm1325_vm5, %v1312_v38, -inf }
 0x39f   : > { %1327 = vmax.xlane.f32.xlu0 %v1326_v39 }
 0x3b0   : > { %1367 = vrot.lane.b32.xlu1 %v4888_v28, %s5911_s2 }
 0x3b3   : > { %4210 = vrot.lane.b32.xlu0 %v4914_v41, %s5911_s2 }
 0x3fa   : > { %v1318_v42 = vpop.xlane.xlu0 %1317 }
 0x3fb   : > { %v1329_v43 = vsub.f32 %v1303_v32, %v1318_v42 }
 0x3fd   : > { %v1333_v44 = vmul.f32 1.442695, %v1329_v43 }
 0x3ff   : > { %4277 = vpow2.f32 %v1333_v44 }
 0x402   : > { %v1321_v45 = vpop.xlane.xlu2 %1320 }
 0x403   : > { %v1330_v46 = vsub.f32 %v1306_v34, %v1321_v45 }
 0x405   : > { %v4918_v47 = vpop.eup %4277  ;;  %v1335_v48 = vmul.f32 1.442695, %v1330_v46 }
 0x406   : > { %v1341_v49 = vsel %vm1315_vm4, %v4918_v47, 0.0 }
 0x407   : > { %4279 = vpow2.f32 %v1335_v48  ;;  %1342 = vadd.xlane.f32.xlu2 %v1341_v49 }
 0x40a   : > { %v1324_v50 = vpop.xlane.xlu1 %1323 }
 0x40b   : > { %v1331_v51 = vsub.f32 %v1309_v36, %v1324_v50 }
 0x40d   : > { %v4922_v53 = vpop.eup %4279  ;;  %v1337_v54 = vmul.f32 1.442695, %v1331_v51 }
 0x40e   : > { %v1344_v55 = vsel %vm1315_vm4, %v4922_v53, 0.0 }
 0x40f   : > { %4281 = vpow2.f32 %v1337_v54  ;;  %1345 = vadd.xlane.f32.xlu2 %v1344_v55 }
 0x412   : > { %v1328_v56 = vpop.xlane.xlu0 %1327 }
 0x413   : > { %v1332_v57 = vsub.f32 %v1312_v38, %v1328_v56 }
 0x415   : > { %v4926_v58 = vpop.eup %4281  ;;  %v1339_v60 = vmul.f32 1.442695, %v1332_v57 }
 0x416   : > { %v1347_v61 = vsel %vm1315_vm4, %v4926_v58, 0.0 }
 0x417   : > { %4283 = vpow2.f32 %v1339_v60  ;;  %1348 = vadd.xlane.f32.xlu0 %v1347_v61 }
 0x41d   : > { %v4930_v62 = vpop.eup %4283 }
 0x41e   : > { %v1350_v63 = vsel %vm1325_vm5, %v4930_v62, 0.0 }
 0x41f   : > { %1351 = vadd.xlane.f32.xlu1 %v1350_v63 }
 0x422   : > { %v1368_v0 = vpop.permute.xlu1 %1367 }
 0x423   : > { %3976 = vmatpush.msk.msra.mxu3 %vm1384_vm6, %v1368_v0 }
 0x425   : > { %v4211_v1 = vpop.permute.xlu0 %4210 }
 0x426   : > { %v4212_v2 = vunpack.i.l.bf16 %v4211_v1  ;;  %v4213_v4 = vunpack.i.h.bf16 %v4211_v1 }
 0x427   : > { %1361 = vrot.lane.b32.xlu2 %v4878_v25, %s5911_s2  ;;  %s5929_s2 = smov 104  }
 0x428   : > { %1400 = vmatpush.msra.mxu3 %v4212_v2 }
 0x42a   : > { %1401 = vmatpush.msra.mxu3 %v4213_v4 }
 0x42b   : > { %1416 = vrot.lane.b32.xlu0 %v4878_v25, %s5917_s0 }
 0x42f   : > { %1430 = vrot.lane.b32.xlu2 %v4888_v28, %s5915_s4 }
 0x433   : > { %1875 = vrot.lane.b32.xlu0 %v4888_v28, %s5931_s22 }
 0x437   : > { %1428 = vrot.lane.b32.xlu2 %v4884_v27, %s5915_s4 }
 0x438   : > { %1418 = vrot.lane.b32.xlu1 %v4880_v16, %s5917_s0 }
 0x43b   : > { %1422 = vrot.lane.b32.xlu0 %v4888_v28, %s5917_s0 }
 0x43f   : > { %1426 = vrot.lane.b32.xlu2 %v4880_v16, %s5915_s4 }
 0x440   : > { %1873 = vrot.lane.b32.xlu1 %v4884_v27, %s5931_s22 }
 0x443   : > { %1665 = vrot.lane.b32.xlu0 %v4878_v25, %s5923_s3 }
 0x447   : > { %1424 = vrot.lane.b32.xlu2 %v4878_v25, %s5915_s4  ;;  %s5921_s4 = smov 48  }
 0x448   : > { %1871 = vrot.lane.b32.xlu1 %v4880_v16, %s5931_s22 }
 0x44b   : > { %1861 = vrot.lane.b32.xlu0 %v4878_v25, %s5929_s2 }
 0x44f   : > { %1420 = vrot.lane.b32.xlu2 %v4884_v27, %s5917_s0  ;;  %s5919_s0 = smov 56  }
 0x450   : > { %1657 = vrot.lane.b32.xlu1 %v4878_v25, %s5927_s28 }
 0x453   : > { %1661 = vrot.lane.b32.xlu0 %v4884_v27, %s5927_s28 }
 0x457   : > { %1671 = vrot.lane.b32.xlu2 %v4888_v28, %s5923_s3 }
 0x458   : > { %1863 = vrot.lane.b32.xlu1 %v4880_v16, %s5929_s2 }
 0x45b   : > { %1867 = vrot.lane.b32.xlu0 %v4888_v28, %s5929_s2 }
 0x45f   : > { %1669 = vrot.lane.b32.xlu2 %v4884_v27, %s5923_s3 }
 0x460   : > { %1663 = vrot.lane.b32.xlu1 %v4888_v28, %s5927_s28 }
 0x467   : > { %1667 = vrot.lane.b32.xlu2 %v4880_v16, %s5923_s3  ;;  %s5959_s3 = smov 96  }
 0x46f   : > { %1869 = vrot.lane.b32.xlu2 %v4878_v25, %s5931_s22 }
 0x477   : > { %1659 = vrot.lane.b32.xlu2 %v4880_v16, %s5927_s28  ;;  %s5963_s28 = smov 72  }
 0x47a   : > { %v1343_v5 = vpop.xlane.xlu2 %1342 }
 0x47b   : > { %4285 = vrcp.f32 %v1343_v5 }
 0x47f   : > { %1865 = vrot.lane.b32.xlu2 %v4884_v27, %s5929_s2  ;;  %s5964_s2 = smov 104  }
 0x481   : > { %v4286_v7 = vpop.eup %4285 }
 0x482   : > { %v1346_v6 = vpop.xlane.xlu2 %1345  ;;  %v1357_v8 = vmul.f32 %v4286_v7, %v4918_v47 }
 0x483   : > { %4287 = vrcp.f32 %v1346_v6 }
 0x489   : > { %v4288_v13 = vpop.eup %4287 }
 0x48a   : > { %v1362_v9 = vpop.permute.xlu2 %1361  ;;  %v1349_v12 = vpop.xlane.xlu0 %1348  ;;  %v1358_v15 = vmul.f32 %v4288_v13, %v4922_v53 }
 0x48b   : > { %1402 = vmatpush.msra.mxu3 %v1362_v9  ;;  %4289 = vrcp.f32 %v1349_v12 }
 0x48c   : > { %3977 = vmatmul.msk.f32.vlgmr.msra.gmra.mxu3 %vm1315_vm4, %v1357_v8 }
 0x48d   : > { %1643 = vmatpush.msrb.mxu3 %v1253_v10 }
 0x491   : > { %v4290_v18 = vpop.eup %4289 }
 0x492   : > { %v1431_v14 = vpop.permute.xlu2 %1430  ;;  %v1352_v17 = vpop.xlane.xlu1 %1351  ;;  %v1359_v19 = vmul.f32 %v4290_v18, %v4926_v58 }
 0x493   : > { %3981 = vmatpush.xpose.msk.msrb.mxu0 %vm1269_vm1, %v1431_v14  ;;  %4291 = vrcp.f32 %v1352_v17 }
 0x494   : > { %3978 = vmatmul.msk.f32.gmra.mxu3 %vm1315_vm4, %v1358_v15 }
 0x499   : > { %v4292_v22 = vpop.eup %4291 }
 0x49a   : > { %v1429_v11 = vpop.permute.xlu2 %1428  ;;  %v1360_v24 = vmul.f32 %v4292_v22, %v4930_v62 }
 0x49b   : > { %3982 = vmatpush.xpose.msk.msrb.mxu0 %vm1269_vm1, %v1429_v11 }
 0x49c   : > { %3979 = vmatmul.msk.f32.gmra.mxu3 %vm1315_vm4, %v1359_v19 }
 0x49d   : > { %v1417_v20 = vpop.permute.xlu0 %1416 }
 0x4a2   : > { %v1427_v23 = vpop.permute.xlu2 %1426 }
 0x4a3   : > { %3983 = vmatpush.xpose.msk.msrb.mxu0 %vm1269_vm1, %v1427_v23 }
 0x4a4   : > { %3980 = vmatmul.msk.f32.gmra.mxu3 %vm1315_vm4, %v1360_v24 }
 0x4a5   : > { %v1876_v16 = vpop.permute.xlu0 %1875 }
 0x4a6   : > { %4019 = vmatpush.xpose.msk.msra.mxu3 %vm1269_vm1, %v1876_v16 }
 0x4aa   : > { %v1425_v27 = vpop.permute.xlu2 %1424  ;;  %v1419_v21 = vpop.permute.xlu1 %1418 }
 0x4ab   : > { %3984 = vmatpush.xpose.msk.msrb.mxu0 %vm1269_vm1, %v1425_v27 }
 0x4ad   : > { %v1423_v34 = vpop.permute.xlu0 %1422 }
 0x4ae   : > { %3985 = vmatmul.msk.f32.vlgmr.msrb.gmra.mxu0 %vm1269_vm1, %v1417_v20 }
 0x4b2   : > { %v1421_v29 = vpop.permute.xlu2 %1420  ;;  %v1874_v30 = vpop.permute.xlu1 %1873 }
 0x4b3   : > { %4020 = vmatpush.xpose.msk.msra.mxu3 %vm1269_vm1, %v1874_v30 }
 0x4b5   : > { %v1666_v36 = vpop.permute.xlu0 %1665 }
 0x4b6   : > { %3986 = vmatmul.msk.f32.gmra.mxu0 %vm1269_vm1, %v1419_v21 }
 0x4ba   : > { %v1672_v31 = vpop.permute.xlu2 %1671  ;;  %v1872_v32 = vpop.permute.xlu1 %1871 }
 0x4bb   : > { %4002 = vmatpush.xpose.msk.msra.mxu0 %vm1269_vm1, %v1672_v31  ;;  %4021 = vmatpush.xpose.msk.msra.mxu3 %vm1269_vm1, %v1872_v32 }
 0x4bd   : > { %v1862_v39 = vpop.permute.xlu0 %1861 }
 0x4be   : > { %3987 = vmatmul.msk.f32.gmra.mxu0 %vm1269_vm1, %v1421_v29 }
 0x4c2   : > { %v1670_v33 = vpop.permute.xlu2 %1669  ;;  %v1658_v37 = vpop.permute.xlu1 %1657 }
 0x4c3   : > { %4003 = vmatpush.xpose.msk.msra.mxu0 %vm1269_vm1, %v1670_v33 }
 0x4c5   : > { %v1662_v44 = vpop.permute.xlu0 %1661 }
 0x4c6   : > { %3988 = vmatmul.msk.f32.gmra.mxu0 %vm1269_vm1, %v1423_v34 }
 0x4ca   : > { %v1668_v35 = vpop.permute.xlu2 %1667  ;;  %v1864_v43 = vpop.permute.xlu1 %1863 }
 0x4cb   : > { %4004 = vmatpush.xpose.msk.msra.mxu0 %vm1269_vm1, %v1668_v35 }
 0x4cd   : > { %v1868_v61 = vpop.permute.xlu0 %1867 }
 0x4cf   : > { %4005 = vmatpush.xpose.msk.msra.mxu0 %vm1269_vm1, %v1666_v36 }
 0x4d2   : > { %v1870_v38 = vpop.permute.xlu2 %1869  ;;  %4006 = vmatmul.msk.f32.vlgmr.msra.gmra.mxu0 %vm1269_vm1, %v1658_v37  ;;  %v1664_v45 = vpop.permute.xlu1 %1663 }
 0x4d3   : > { %4022 = vmatpush.xpose.msk.msra.mxu3 %vm1269_vm1, %v1870_v38 }
 0x4da   : > { %v1660_v42 = vpop.permute.xlu2 %1659 }
 0x4db   : > { %4007 = vmatmul.msk.f32.gmra.mxu0 %vm1269_vm1, %v1660_v42 }
 0x4e2   : > { %v1866_v57 = vpop.permute.xlu2 %1865 }
 0x4e3   : > { %4008 = vmatmul.msk.f32.gmra.mxu0 %vm1269_vm1, %v1662_v44 }
 0x4eb   : > { %4009 = vmatmul.msk.f32.gmra.mxu0 %vm1269_vm1, %v1664_v45 }
 0x50f   : > { %v1404_v46 = vpop.f32.mrf.mxu3 }
 0x510   : > { %3998 = vmatmul.msk.f32.vlgmr.msrb.gmra.mxu3 %vm1269_vm1, %v1404_v46 }
 0x517   : > { %v1407_v47 = vpop.f32.mrf.mxu3 }
 0x518   : > { %3999 = vmatmul.msk.f32.gmra.mxu3 %vm1269_vm1, %v1407_v47 }
 0x51f   : > { %v1410_v48 = vpop.f32.mrf.mxu3 }
 0x520   : > { %4000 = vmatmul.msk.f32.gmra.mxu3 %vm1269_vm1, %v1410_v48 }
 0x527   : > { %v1413_v49 = vpop.f32.mrf.mxu3 }
 0x528   : > { %4001 = vmatmul.msk.f32.gmra.mxu3 %vm1269_vm1, %v1413_v49 }
 0x52b   : > { %v1465_v50 = vpop.f32.mrf.mxu0 }
 0x52c   : > { %v1477_v51 = vsel %vm1315_vm4, %v1465_v50, -inf }
 0x52d   : > { %1478 = vmax.xlane.f32.xlu2 %v1477_v51 }
 0x530   : > { %4023 = vmatmul.msk.f32.vlgmr.msra.gmra.mxu3 %vm1269_vm1, %v1862_v39 }
 0x533   : > { %v1468_v53 = vpop.f32.mrf.mxu0 }
 0x534   : > { %v1480_v54 = vsel %vm1315_vm4, %v1468_v53, -inf }
 0x535   : > { %1481 = vmax.xlane.f32.xlu1 %v1480_v54 }
 0x538   : > { %4024 = vmatmul.msk.f32.gmra.mxu3 %vm1269_vm1, %v1864_v43 }
 0x53b   : > { %v1471_v55 = vpop.f32.mrf.mxu0 }
 0x53c   : > { %v1483_v56 = vsel %vm1315_vm4, %v1471_v55, -inf }
 0x53d   : > { %1484 = vmax.xlane.f32.xlu0 %v1483_v56 }
 0x540   : > { %4025 = vmatmul.msk.f32.gmra.mxu3 %vm1269_vm1, %v1866_v57 }
 0x543   : > { %v5026_v58 = vpop.f32.mrf.mxu0 }
 0x544   : > { %v1486_v60 = vsel %vm1325_vm5, %v5026_v58, -inf }
 0x545   : > { %1487 = vmax.xlane.f32.xlu2 %v1486_v60 }
 0x548   : > { %4026 = vmatmul.msk.f32.gmra.mxu3 %vm1269_vm1, %v1868_v61 }
 0x54f   : > { %v1706_v62 = vpop.f32.mrf.mxu0 }
 0x550   : > { %v1718_v63 = vsel %vm1315_vm4, %v1706_v62, -inf }
 0x551   : > { %1719 = vmax.xlane.f32.xlu1 %v1718_v63 }
 0x558   : > { %v5032_v0 = vpop.f32.mrf.mxu0 }
 0x559   : > { %v1721_v1 = vsel %vm1315_vm4, %v5032_v0, -inf }
 0x55a   : > { %1722 = vmax.xlane.f32.xlu0 %v1721_v1 }
 0x560   : > { %v5036_v2 = vpop.f32.mrf.mxu0 }
 0x561   : > { %v1724_v4 = vsel %vm1315_vm4, %v5036_v2, -inf }
 0x562   : > { %1725 = vmax.xlane.f32.xlu1 %v1724_v4 }
 0x568   : > { %v5040_v5 = vpop.f32.mrf.mxu0 }
 0x569   : > { %v1727_v6 = vsel %vm1325_vm5, %v5040_v5, -inf }
 0x56a   : > { %1728 = vmax.xlane.f32.xlu0 %v1727_v6 }
 0x57b   : > { %1527 = vrot.lane.b32.xlu1 %v4888_v28, %s5919_s0 }
 0x57e   : > { %4215 = vrot.lane.b32.xlu0 %v4914_v41, %s5919_s0 }
 0x593   : > { %v5048_v7 = vpop.f32.mrf.mxu3 }
 0x59b   : > { %v5050_v8 = vpop.f32.mrf.mxu3 }
 0x5a0   : > { %v1479_v9 = vpop.xlane.xlu2 %1478 }
 0x5a1   : > { %v1489_v10 = vsub.f32 %v1465_v50, %v1479_v9 }
 0x5a3   : > { %v1493_v12 = vmul.f32 1.442695, %v1489_v10  ;;  %v5052_v13 = vpop.f32.mrf.mxu3 }
 0x5a5   : > { %4293 = vpow2.f32 %v1493_v12 }
 0x5a8   : > { %v1482_v14 = vpop.xlane.xlu1 %1481 }
 0x5a9   : > { %v1490_v15 = vsub.f32 %v1468_v53, %v1482_v14 }
 0x5ab   : > { %v5054_v17 = vpop.eup %4293  ;;  %v1495_v18 = vmul.f32 1.442695, %v1490_v15  ;;  %v5058_v19 = vpop.f32.mrf.mxu3 }
 0x5ac   : > { %v1501_v11 = vsel %vm1315_vm4, %v5054_v17, 0.0 }
 0x5ad   : > { %4295 = vpow2.f32 %v1495_v18  ;;  %1502 = vadd.xlane.f32.xlu2 %v1501_v11 }
 0x5b0   : > { %v1485_v20 = vpop.xlane.xlu0 %1484 }
 0x5b1   : > { %v1491_v22 = vsub.f32 %v1471_v55, %v1485_v20 }
 0x5b3   : > { %v5060_v23 = vpop.eup %4295  ;;  %v1497_v24 = vmul.f32 1.442695, %v1491_v22  ;;  %v5064_v27 = vpop.f32.mrf.mxu3 }
 0x5b4   : > { %v1504_v16 = vsel %vm1315_vm4, %v5060_v23, 0.0  ;;  %v1922_v56 = vsel %vm1315_vm4, %v5064_v27, -inf }
 0x5b5   : > { %4297 = vpow2.f32 %v1497_v24  ;;  %1505 = vadd.xlane.f32.xlu2 %v1504_v16 }
 0x5b8   : > { %v1488_v42 = vpop.xlane.xlu2 %1487 }
 0x5b9   : > { %v1492_v43 = vsub.f32 %v5026_v58, %v1488_v42 }
 0x5bb   : > { %v5066_v21 = vpop.eup %4297  ;;  %v5070_v30 = vpop.f32.mrf.mxu3  ;;  %v1499_v45 = vmul.f32 1.442695, %v1492_v43 }
 0x5bc   : > { %v1507_v29 = vsel %vm1315_vm4, %v5066_v21, 0.0  ;;  %v1925_v54 = vsel %vm1315_vm4, %v5070_v30, -inf }
 0x5bd   : > { %1508 = vadd.xlane.f32.xlu0 %v1507_v29 }
 0x5c3   : > { %v5072_v34 = vpop.f32.mrf.mxu3 }
 0x5c4   : > { %v1720_v31 = vpop.xlane.xlu1 %1719  ;;  %v1928_v58 = vsel %vm1315_vm4, %v5072_v34, -inf }
 0x5c5   : > { %v1730_v32 = vsub.f32 %v1706_v62, %v1720_v31 }
 0x5c7   : > { %v1734_v33 = vmul.f32 1.442695, %v1730_v32 }
 0x5c9   : > { %4299 = vpow2.f32 %v1734_v33 }
 0x5ca   : > { %4301 = vpow2.f32 %v1499_v45 }
 0x5cb   : > { %v5082_v37 = vpop.f32.mrf.mxu3 }
 0x5cc   : > { %v1931_v38 = vsel %vm1325_vm5, %v5082_v37, -inf }
 0x5cd   : > { %1521 = vrot.lane.b32.xlu2 %v4878_v25, %s5919_s0  ;;  %v1723_v39 = vpop.xlane.xlu0 %1722  ;;  %s5925_s0 = smov 40  }
 0x5ce   : > { %v1731_v55 = vsub.f32 %v5032_v0, %v1723_v39 }
 0x5cf   : > { %v5076_v35 = vpop.eup %4299 }
 0x5d0   : > { %v1742_v36 = vsel %vm1315_vm4, %v5076_v35, 0.0  ;;  %v5090_v50 = vpop.eup %4301  ;;  %v1736_v57 = vmul.f32 1.442695, %v1731_v55 }
 0x5d1   : > { %1743 = vadd.xlane.f32.xlu1 %v1742_v36  ;;  %1768 = vrot.lane.b32.xlu0 %v4888_v28, %s5921_s4  ;;  %v1510_v53 = vsel %vm1325_vm5, %v5090_v50, 0.0 }
 0x5d2   : > { %4303 = vpow2.f32 %v1736_v57 }
 0x5d5   : > { %v1726_v44 = vpop.xlane.xlu1 %1725 }
 0x5d6   : > { %v1732_v61 = vsub.f32 %v5036_v2, %v1726_v44 }
 0x5d8   : > { %v5103_v60 = vpop.eup %4303  ;;  %v1738_v63 = vmul.f32 1.442695, %v1732_v61 }
 0x5d9   : > { %1932 = vmax.xlane.f32.xlu1 %v1931_v38  ;;  %v1745_v62 = vsel %vm1315_vm4, %v5103_v60, 0.0 }
 0x5da   : > { %4305 = vpow2.f32 %v1738_v63 }
 0x5dd   : > { %v5087_v46 = vpop.xlane.xlu0 %1728 }
 0x5e0   : > { %v5112_v0 = vpop.eup %4305 }
 0x5e1   : > { %v1748_v1 = vsel %vm1315_vm4, %v5112_v0, 0.0 }
 0x5ed   : > { %v1528_v47 = vpop.permute.xlu1 %1527 }
 0x5ee   : > { %3989 = vmatpush.msk.msrb.mxu1 %vm1384_vm6, %v1528_v47 }
 0x5f0   : > { %v4216_v48 = vpop.permute.xlu0 %4215 }
 0x5f1   : > { %v4217_v49 = vunpack.i.l.bf16 %v4216_v48  ;;  %v4218_v51 = vunpack.i.h.bf16 %v4216_v48 }
 0x5f2   : > { %4220 = vrot.lane.b32.xlu1 %v4914_v41, %s5921_s4 }
 0x5f3   : > { %1559 = vmatpush.msrb.mxu1 %v4217_v49 }
 0x5f5   : > { %1560 = vmatpush.msrb.mxu1 %v4218_v51 }
 0x5f6   : > { %1511 = vadd.xlane.f32.xlu2 %v1510_v53 }
 0x5fb   : > { %1926 = vmax.xlane.f32.xlu0 %v1925_v54 }
 0x5fe   : > { %1923 = vmax.xlane.f32.xlu2 %v1922_v56 }
 0x606   : > { %1929 = vmax.xlane.f32.xlu2 %v1928_v58 }
 0x60e   : > { %1746 = vadd.xlane.f32.xlu2 %v1745_v62 }
 0x60f   : > { %1762 = vrot.lane.b32.xlu0 %v4878_v25, %s5921_s4  ;;  %s5960_s4 = smov 64  }
 0x617   : > { %4225 = vrot.lane.b32.xlu0 %v4914_v41, %s5925_s0 }
 0x61c   : > { %1749 = vadd.xlane.f32.xlu1 %v1748_v1  ;;  %v1254_v1 = vld [vmem:[%s5958_s6 + $0x8] sm:$0xff] }
 0x61d   : > { %1602 = vmatpush.msrb.mxu2 %v1254_v1 }
 0x620   : > { %v1503_v2 = vpop.xlane.xlu2 %1502 }
 0x621   : > { %4307 = vrcp.f32 %v1503_v2 }
 0x626   : > { %1972 = vrot.lane.b32.xlu2 %v4888_v28, %s5925_s0 }
 0x627   : > { %v4308_v6 = vpop.eup %4307 }
 0x628   : > { %v1506_v4 = vpop.xlane.xlu2 %1505  ;;  %v1517_v9 = vmul.f32 %v4308_v6, %v5054_v17 }
 0x629   : > { %4309 = vrcp.f32 %v1506_v4  ;;  %v1733_v4 = vsub.f32 %v5040_v5, %v5087_v46 }
 0x62f   : > { %v4310_v12 = vpop.eup %4309 }
 0x630   : > { %v1522_v10 = vpop.permute.xlu2 %1521  ;;  %v1509_v41 = vpop.xlane.xlu0 %1508  ;;  %v1518_v14 = vmul.f32 %v4310_v12, %v5060_v23 }
 0x631   : > { %1561 = vmatpush.msrb.mxu1 %v1522_v10  ;;  %4311 = vrcp.f32 %v1509_v41 }
 0x632   : > { %3990 = vmatmul.msk.f32.vlgmr.msrb.gmra.mxu1 %vm1315_vm4, %v1517_v9  ;;  %v1740_v9 = vmul.f32 1.442695, %v1733_v4 }
 0x637   : > { %v4312_v15 = vpop.eup %4311 }
 0x638   : > { %v1519_v28 = vmul.f32 %v4312_v15, %v5066_v21 }
 0x63a   : > { %3991 = vmatmul.msk.f32.gmra.mxu1 %vm1315_vm4, %v1518_v14 }
 0x642   : > { %3992 = vmatmul.msk.f32.gmra.mxu1 %vm1315_vm4, %v1519_v28 }
 0x643   : > { %v1769_v18 = vpop.permute.xlu0 %1768 }
 0x644   : > { %4010 = vmatpush.msk.msra.mxu1 %vm1384_vm6, %v1769_v18  ;;  %v1744_v17 = vpop.xlane.xlu1 %1743 }
 0x64c   : > { %v1933_v11 = vpop.xlane.xlu1 %1932 }
 0x64d   : > { %v1937_v21 = vsub.f32 %v5082_v37, %v1933_v11 }
 0x64f   : > { %v1944_v42 = vmul.f32 1.442695, %v1937_v21 }
 0x664   : > { %v4221_v20 = vpop.permute.xlu1 %4220 }
 0x665   : > { %v4222_v22 = vunpack.i.l.bf16 %v4221_v20  ;;  %v4223_v24 = vunpack.i.h.bf16 %v4221_v20 }
 0x667   : > { %1800 = vmatpush.msra.mxu1 %v4222_v22 }
 0x669   : > { %v1512_v16 = vpop.xlane.xlu2 %1511  ;;  %1801 = vmatpush.msra.mxu1 %v4223_v24 }
 0x66a   : > { %4313 = vrcp.f32 %v1512_v16 }
 0x66e   : > { %v1927_v23 = vpop.xlane.xlu0 %1926 }
 0x66f   : > { %v1935_v29 = vsub.f32 %v5070_v30, %v1927_v23 }
 0x670   : > { %v4314_v31 = vpop.eup %4313 }
 0x671   : > { %v1940_v32 = vmul.f32 1.442695, %v1935_v29  ;;  %v1924_v33 = vpop.xlane.xlu2 %1923  ;;  %v1520_v36 = vmul.f32 %v4314_v31, %v5090_v50 }
 0x672   : > { %v1934_v38 = vsub.f32 %v5064_v27, %v1924_v33 }
 0x673   : > { %4315 = vpow2.f32 %v1940_v32  ;;  %3993 = vmatmul.msk.f32.gmra.mxu1 %vm1315_vm4, %v1520_v36 }
 0x674   : > { %v1938_v39 = vmul.f32 1.442695, %v1934_v38 }
 0x676   : > { %4317 = vpow2.f32 %v1938_v39  ;;  %v1256_v39 = vld [vmem:[%s5958_s6 + $0x18] sm:$0xff] }
 0x677   : > { %4319 = vrcp.f32 %v1744_v17 }
 0x678   : > { %4321 = vpow2.f32 %v1944_v42 }
 0x679   : > { %v5130_v43 = vpop.eup %4315  ;;  %v1930_v30 = vpop.xlane.xlu2 %1929 }
 0x67a   : > { %v1936_v44 = vsub.f32 %v5072_v34, %v1930_v30  ;;  %v1949_v37 = vsel %vm1315_vm4, %v5130_v43, 0.0 }
 0x67b   : > { %1950 = vadd.xlane.f32.xlu0 %v1949_v37 }
 0x67c   : > { %v4318_v45 = vpop.eup %4317  ;;  %v1942_v47 = vmul.f32 1.442695, %v1936_v44 }
 0x67d   : > { %v1946_v27 = vsel %vm1315_vm4, %v4318_v45, 0.0  ;;  %v4320_v48 = vpop.eup %4319 }
 0x67e   : > { %4323 = vpow2.f32 %v1942_v47  ;;  %1947 = vadd.xlane.f32.xlu2 %v1946_v27  ;;  %v5136_v49 = vpop.eup %4321  ;;  %v1758_v50 = vmul.f32 %v4320_v48, %v5076_v35 }
 0x67f   : > { %v1955_v34 = vsel %vm1325_vm5, %v5136_v49, 0.0 }
 0x681   : > { %v1763_v51 = vpop.permute.xlu0 %1762  ;;  %v1747_v53 = vpop.xlane.xlu2 %1746 }
 0x682   : > { %4325 = vrcp.f32 %v1747_v53  ;;  %1802 = vmatpush.msra.mxu1 %v1763_v51  ;;  %v4251_v53 = vld [vmem:[%s5891_s7] ss:$0 sm:$0xff] }
 0x683   : > { %1956 = vadd.xlane.f32.xlu0 %v1955_v34  ;;  %4011 = vmatmul.msk.f32.vlgmr.msra.gmra.mxu1 %vm1315_vm4, %v1758_v50 }
 0x684   : > { %v4324_v54 = vpop.eup %4323  ;;  %2047 = vmatpush.msrb.mxu1 %v1256_v39  ;;  %v2184_v39 = vld [vmem:[%s5894_s10 + $0x18] sm:$0xff] }
 0x685   : > { %v1952_v55 = vsel %vm1315_vm4, %v4324_v54, 0.0 }
 0x686   : > { %1953 = vadd.xlane.f32.xlu1 %v1952_v55 }
 0x688   : > { %v4326_v56 = vpop.eup %4325 }
 0x689   : > { %v4226_v57 = vpop.permute.xlu0 %4225  ;;  %v1973_v58 = vpop.permute.xlu2 %1972  ;;  %v1759_v61 = vmul.f32 %v4326_v56, %v5103_v60 }
 0x68a   : > { %v4227_v35 = vunpack.i.l.bf16 %v4226_v57  ;;  %4027 = vmatpush.msk.msrb.mxu0 %vm1384_vm6, %v1973_v58  ;;  %v4228_v62 = vunpack.i.h.bf16 %v4226_v57 }
 0x68b   : > { %4012 = vmatmul.msk.f32.gmra.mxu1 %vm1315_vm4, %v1759_v61 }
 0x68c   : > { %2004 = vmatpush.msrb.mxu0 %v4227_v35 }
 0x68e   : > { %2005 = vmatpush.msrb.mxu0 %v4228_v62 }
 0x68f   : > { %v1750_v63 = vpop.xlane.xlu1 %1749 }
 0x690   : > { %4327 = vrcp.f32 %v1750_v63 }
 0x691   : > { %4329 = vpow2.f32 %v1740_v9 }
 0x696   : > { %v4328_v2 = vpop.eup %4327  ;;  %1966 = vrot.lane.b32.xlu2 %v4878_v25, %s5925_s0  ;;  %v1255_v25 = vld [vmem:[%s5958_s6 + $0x10] sm:$0xff]  ;;  %s4483_s0 = scalar_lea.hbm %s5904_s20, 2 }
 0x697   : > { %v1760_v60 = vmul.f32 %v4328_v2, %v5112_v0  ;;  %v4330_v41 = vpop.eup %4329  ;;  %1843 = vmatpush.msra.mxu2 %v1255_v25 }
 0x698   : > { %v1751_v12 = vsel %vm1325_vm5, %v4330_v41, 0.0 }
 0x699   : > { %4013 = vmatmul.msk.f32.gmra.mxu1 %vm1315_vm4, %v1760_v60 }
 0x6af   : > { %v1563_v6 = vpop.f32.mrf.mxu1 }
 0x6b0   : > { %3994 = vmatmul.msk.f32.vlgmr.msrb.gmra.mxu2 %vm1269_vm1, %v1563_v6 }
 0x6b1   : > { %2213 = vmatpush.msrb.mxu2 %v2184_v39  ;;  %v2268_v39 = vld [vmem:[%s5896_s12 + $0x10] sm:$0xff] }
 0x6b7   : > { %v1566_v10 = vpop.f32.mrf.mxu1 }
 0x6b8   : > { %3995 = vmatmul.msk.f32.gmra.mxu2 %vm1269_vm1, %v1566_v10 }
 0x6bf   : > { %v1569_v14 = vpop.f32.mrf.mxu1  ;;  %1752 = vadd.xlane.f32.xlu2 %v1751_v12 }
 0x6c0   : > { %3996 = vmatmul.msk.f32.gmra.mxu2 %vm1269_vm1, %v1569_v14 }
 0x6ee   : > { %v1951_v0 = vpop.xlane.xlu0 %1950 }
 0x6f0   : > { %v1572_v5 = vpop.f32.mrf.mxu1 }
 0x6f1   : > { %3997 = vmatmul.msk.f32.gmra.mxu2 %vm1269_vm1, %v1572_v5  ;;  %v1948_v46 = vpop.xlane.xlu2 %1947 }
 0x6f2   : > { %4331 = vrcp.f32 %v1948_v46 }
 0x6f3   : > { %4333 = vrcp.f32 %v1951_v0 }
 0x6f6   : > { %v1957_v24 = vpop.xlane.xlu0 %1956 }
 0x6f8   : > { %v4332_v15 = vpop.eup %4331 }
 0x6f9   : > { %v1962_v28 = vmul.f32 %v4332_v15, %v4318_v45  ;;  %v1967_v18 = vpop.permute.xlu2 %1966  ;;  %v1954_v17 = vpop.xlane.xlu1 %1953 }
 0x6fa   : > { %2006 = vmatpush.msrb.mxu0 %v1967_v18  ;;  %v4334_v11 = vpop.eup %4333  ;;  %4335 = vrcp.f32 %v1954_v17 }
 0x6fb   : > { %4028 = vmatmul.msk.f32.vlgmr.msrb.gmra.mxu0 %vm1315_vm4, %v1962_v28  ;;  %v1963_v22 = vmul.f32 %v4334_v11, %v5130_v43  ;;  %4337 = vrcp.f32 %v1957_v24 }
 0x700   : > { %v1804_v20 = vpop.f32.mrf.mxu1  ;;  %v4336_v16 = vpop.eup %4335 }
 0x701   : > { %4015 = vmatmul.msk.f32.vlgmr.msra.gmra.mxu2 %vm1269_vm1, %v1804_v20  ;;  %v1964_v29 = vmul.f32 %v4336_v16, %v4324_v54  ;;  %v4338_v31 = vpop.eup %4337 }
 0x702   : > { %v1965_v21 = vmul.f32 %v4338_v31, %v5136_v49 }
 0x703   : > { %4029 = vmatmul.msk.f32.gmra.mxu0 %vm1315_vm4, %v1963_v22 }
 0x708   : > { %v1807_v23 = vpop.f32.mrf.mxu1 }
 0x709   : > { %4016 = vmatmul.msk.f32.gmra.mxu2 %vm1269_vm1, %v1807_v23 }
 0x70b   : > { %4030 = vmatmul.msk.f32.gmra.mxu0 %vm1315_vm4, %v1964_v29 }
 0x713   : > { %4031 = vmatmul.msk.f32.gmra.mxu0 %vm1315_vm4, %v1965_v21 }
 0x716   : > { %v1810_v32 = vpop.f32.mrf.mxu1 }
 0x717   : > { %4017 = vmatmul.msk.f32.gmra.mxu2 %vm1269_vm1, %v1810_v32 }
 0x732   : > { %v1753_v33 = vpop.xlane.xlu2 %1752 }
 0x733   : > { %4339 = vrcp.f32 %v1753_v33  ;;  %v1604_v45 = vpop.f32.mrf.mxu2 }
 0x734   : > { %v1646_v50 = vadd.f32 %v5048_v7, %v1604_v45 }
 0x739   : > { %v4340_v36 = vpop.eup %4339 }
 0x73a   : > { %v1761_v38 = vmul.f32 %v4340_v36, %v4330_v41 }
 0x73b   : > { %v1607_v47 = vpop.f32.mrf.mxu2 }
 0x73c   : > { %4014 = vmatmul.msk.f32.gmra.mxu1 %vm1315_vm4, %v1761_v38  ;;  %v1649_v57 = vadd.f32 %v5050_v8, %v1607_v47 }
 0x743   : > { %v1610_v27 = vpop.f32.mrf.mxu2 }
 0x744   : > { %v1652_v2 = vadd.f32 %v5052_v13, %v1610_v27 }
 0x774   : > { %v1613_v48 = vpop.f32.mrf.mxu2 }
 0x775   : > { %v1655_v12 = vadd.f32 %v5058_v19, %v1613_v48 }
 0x778   : > { %v2008_v42 = vpop.f32.mrf.mxu0 }
 0x779   : > { %4032 = vmatmul.msk.f32.vlgmr.msrb.gmra.mxu1 %vm1269_vm1, %v2008_v42  ;;  %v2183_v42 = vld [vmem:[%s5894_s10 + $0x10] sm:$0xff] }
 0x77a   : > { %2214 = vmatpush.msrb.mxu2 %v2183_v42  ;;  %v2267_v42 = vld [vmem:[%s5896_s12 + $0x8] sm:$0xff] }
 0x780   : > { %v2011_v43 = vpop.f32.mrf.mxu0 }
 0x781   : > { %4033 = vmatmul.msk.f32.gmra.mxu1 %vm1269_vm1, %v2011_v43  ;;  %v2182_v43 = vld [vmem:[%s5894_s10 + $0x8] sm:$0xff] }
 0x782   : > { %2215 = vmatpush.msrb.mxu2 %v2182_v43  ;;  %v2266_v43 = vld [vmem:[%s5896_s12] sm:$0xff] }
 0x784   : > { %v1845_v49 = vpop.f32.mrf.mxu2 }
 0x785   : > { %v1857_v51 = vadd.f32 %v1845_v49, %v1646_v50 }
 0x788   : > { %v2014_v30 = vpop.f32.mrf.mxu0 }
 0x789   : > { %4034 = vmatmul.msk.f32.gmra.mxu1 %vm1269_vm1, %v2014_v30  ;;  %v2181_v30 = vld [vmem:[%s5894_s10] sm:$0xff] }
 0x78a   : > { %2216 = vmatpush.msrb.mxu2 %v2181_v30  ;;  %v4254_v30 = vld [vmem:[%s5895_s11] ss:$0 sm:$0xff] }
 0x78c   : > { %v1848_v56 = vpop.f32.mrf.mxu2 }
 0x78d   : > { %v1858_v61 = vadd.f32 %v1848_v56, %v1649_v57 }
 0x790   : > { %v2017_v44 = vpop.f32.mrf.mxu0 }
 0x791   : > { %4035 = vmatmul.msk.f32.gmra.mxu1 %vm1269_vm1, %v2017_v44 }
 0x79a   : > { %v1851_v1 = vpop.f32.mrf.mxu2 }
 0x79b   : > { %v1859_v4 = vadd.f32 %v1851_v1, %v1652_v2  ;;  %v4253_v1 = vld [vmem:[%s5893_s9] ss:$0 sm:$0xff] }
 0x7b9   : > { %v1813_v37 = vpop.f32.mrf.mxu1 }
 0x7ba   : > { %4018 = vmatmul.msk.f32.gmra.mxu2 %vm1269_vm1, %v1813_v37 }
 0x7f6   : > { %v2049_v34 = vpop.f32.mrf.mxu1 }
 0x7f7   : > { %v2061_v54 = vadd.f32 %v2049_v34, %v1857_v51 }
 0x7f9   : > { %v2069_v55 = vadd.f32 %v4251_v53, %v2061_v54 }
 0x7fb   : > { %v2073_v58 = vadd.f32 %v2069_v55, %v4798_v26 }
 0x7fd   : > { %v2079_v35 = vsel %vm1097_vm2, %v2073_v58, 0.0 }
 0x7fe   : > { %v2052_v62 = vpop.f32.mrf.mxu1  ;;  %2080 = vadd.xlane.f32.xlu1 %v2079_v35  ;;  %v4252_v35 = vld [vmem:[%s5892_s8] ss:$0 sm:$0xff] }
 0x7ff   : > { %v2062_v63 = vadd.f32 %v2052_v62, %v1858_v61 }
 0x801   : > { %v2070_v7 = vadd.f32 %v4251_v53, %v2062_v63 }
 0x803   : > { %v2074_v60 = vadd.f32 %v2070_v7, %v4805_v40 }
 0x805   : > { %v2082_v6 = vsel %vm1097_vm2, %v2074_v60, 0.0 }
 0x806   : > { %v2055_v9 = vpop.f32.mrf.mxu1  ;;  %2083 = vadd.xlane.f32.xlu0 %v2082_v6 }
 0x807   : > { %v2063_v8 = vadd.f32 %v2055_v9, %v1859_v4 }
 0x809   : > { %v2071_v10 = vadd.f32 %v4251_v53, %v2063_v8 }
 0x80b   : > { %v2075_v26 = vadd.f32 %v2071_v10, %v4812_v52 }
 0x80d   : > { %v2085_v41 = vsel %vm1097_vm2, %v2075_v26, 0.0 }
 0x80e   : > { %2086 = vadd.xlane.f32.xlu1 %v2085_v41  ;;  %v2058_v5 = vpop.f32.mrf.mxu1 }
 0x83d   : > { %v1854_v14 = vpop.f32.mrf.mxu2 }
 0x83e   : > { %v1860_v25 = vadd.f32 %v1854_v14, %v1655_v12 }
 0x840   : > { %v2064_v13 = vadd.f32 %v2058_v5, %v1860_v25 }
 0x842   : > { %v2072_v46 = vadd.f32 %v4251_v53, %v2064_v13 }
 0x844   : > { %v2076_v40 = vadd.f32 %v2072_v46, %v4819_v59 }
 0x846   : > { %v2088_v0 = vsel %vm1107_vm3, %v2076_v40, 0.0 }
 0x847   : > { %2089 = vadd.xlane.f32.xlu0 %v2088_v0 }
 0x871   : > { %v2081_v15 = vpop.xlane.xlu1 %2080 }
 0x872   : > { %v2091_v28 = vmul.f32 %v2081_v15, %v4823_v3 }
 0x874   : > { %v2095_v18 = vsub.f32 %v2073_v58, %v2091_v28 }
 0x876   : > { %v2099_v52 = vmul.f32 %v2095_v18, %v2095_v18 }
 0x878   : > { %v2103_v17 = vsel %vm1097_vm2, %v2099_v52, 0.0 }
 0x879   : > { %v2084_v11 = vpop.xlane.xlu0 %2083  ;;  %2104 = vadd.xlane.f32.xlu1 %v2103_v17 }
 0x87a   : > { %v2092_v19 = vmul.f32 %v2084_v11, %v4823_v3 }
 0x87c   : > { %v5199_v20 = vsub.f32 %v2074_v60, %v2092_v19 }
 0x87e   : > { %v2100_v22 = vmul.f32 %v5199_v20, %v5199_v20 }
 0x880   : > { %v2106_v59 = vsel %vm1097_vm2, %v2100_v22, 0.0 }
 0x881   : > { %2107 = vadd.xlane.f32.xlu2 %v2106_v59  ;;  %v2087_v24 = vpop.xlane.xlu1 %2086 }
 0x882   : > { %v2093_v16 = vmul.f32 %v2087_v24, %v4823_v3 }
 0x884   : > { %v5205_v23 = vsub.f32 %v2075_v26, %v2093_v16 }
 0x886   : > { %v2101_v29 = vmul.f32 %v5205_v23, %v5205_v23 }
 0x888   : > { %v2109_v31 = vsel %vm1097_vm2, %v2101_v29, 0.0 }
 0x889   : > { %2110 = vadd.xlane.f32.xlu0 %v2109_v31 }
 0x8ba   : > { %v2090_v21 = vpop.xlane.xlu0 %2089 }
 0x8bb   : > { %v2094_v32 = vmul.f32 %v2090_v21, %v4823_v3  ;;  %v2273_v21 = vld [vmem:[%s5896_s12 + $0x38] sm:$0xff] }
 0x8bc   : > { %2299 = vmatpush.msrb.mxu3 %v2273_v21 }
 0x8bd   : > { %v5211_v33 = vsub.f32 %v2076_v40, %v2094_v32  ;;  %v2272_v32 = vld [vmem:[%s5896_s12 + $0x30] sm:$0xff] }
 0x8be   : > { %2300 = vmatpush.msrb.mxu3 %v2272_v32 }
 0x8bf   : > { %v2102_v36 = vmul.f32 %v5211_v33, %v5211_v33 }
 0x8c1   : > { %v2112_v38 = vsel %vm1107_vm3, %v2102_v36, 0.0  ;;  %v2270_v36 = vld [vmem:[%s5896_s12 + $0x20] sm:$0xff] }
 0x8c2   : > { %2113 = vadd.xlane.f32.xlu1 %v2112_v38  ;;  %v2269_v38 = vld [vmem:[%s5896_s12 + $0x18] sm:$0xff] }
 0x8ec   : > { %v2105_v44 = vpop.xlane.xlu1 %2104 }
 0x8ed   : > { %v2115_v37 = vmul.f32 %v2105_v44, %v4823_v3 }
 0x8ef   : > { %v2119_v45 = vadd.f32 1e-05, %v2115_v37 }
 0x8f1   : > { %4341 = vrsqrt.f32 %v2119_v45  ;;  %vm2129_vm8 = vweird.f32 %v2119_v45 }
 0x8f4   : > { %v2108_v47 = vpop.xlane.xlu2 %2107 }
 0x8f5   : > { %v2116_v27 = vmul.f32 %v2108_v47, %v4823_v3 }
 0x8f7   : > { %v4342_v48 = vpop.eup %4341  ;;  %v2120_v49 = vadd.f32 1e-05, %v2116_v27 }
 0x8f8   : > { %v2124_v50 = vmul.f32 %v4342_v48, %v2119_v45  ;;  %vm2130_vm7 = vweird.f32 %v4342_v48 }
 0x8f9   : > { %4343 = vrsqrt.f32 %v2120_v49  ;;  %vm2131_vm9 = vmor %vm2129_vm8, %vm2130_vm7  ;;  %vm2139_vm11 = vweird.f32 %v2120_v49 }
 0x8fa   : > { %v2125_v51 = vmul.f32 %v4342_v48, %v2124_v50 }
 0x8fc   : > { %v2126_v53 = vmul.f32 0.5, %v2125_v51  ;;  %v2111_v34 = vpop.xlane.xlu0 %2110 }
 0x8fd   : > { %v2117_v54 = vmul.f32 %v2111_v34, %v4823_v3 }
 0x8fe   : > { %v2127_v55 = vsub.f32 1.5, %v2126_v53 }
 0x8ff   : > { %v4344_v56 = vpop.eup %4343  ;;  %v2121_v57 = vadd.f32 1e-05, %v2117_v54 }
 0x900   : > { %v2128_v58 = vmul.f32 %v4342_v48, %v2127_v55  ;;  %v2134_v61 = vmul.f32 %v4344_v56, %v2120_v49  ;;  %vm2140_vm10 = vweird.f32 %v4344_v56 }
 0x901   : > { %4345 = vrsqrt.f32 %v2121_v57  ;;  %vm2141_vm12 = vmor %vm2139_vm11, %vm2140_vm10  ;;  %vm2149_vm14 = vweird.f32 %v2121_v57 }
 0x902   : > { %v2132_v62 = vsel %vm2131_vm9, %v4342_v48, %v2128_v58  ;;  %v2135_v63 = vmul.f32 %v4344_v56, %v2134_v61  ;;  %vm2278_vm9 = vcmask 523264  }
 0x903   : > { %v2163_v7 = vmul.f32 %v2132_v62, %v2095_v18 }
 0x904   : > { %v2136_v2 = vmul.f32 0.5, %v2135_v63 }
 0x905   : > { %v2170_v60 = vmul.f32 %v4252_v35, %v2163_v7 }
 0x906   : > { %v2137_v4 = vsub.f32 1.5, %v2136_v2 }
 0x907   : > { %v4346_v6 = vpop.eup %4345  ;;  %v5237_v9 = vadd.f32 %v4253_v1, %v2170_v60 }
 0x908   : > { %v2138_v8 = vmul.f32 %v4344_v56, %v2137_v4  ;;  %v2144_v10 = vmul.f32 %v4346_v6, %v2121_v57  ;;  %vm2150_vm13 = vweird.f32 %v4346_v6 }
 0x909   : > { %4036 = vmatmul.msk.f32.vlgmr.msrb.gmra.mxu2 %vm1097_vm2, %v5237_v9  ;;  %vm2151_vm15 = vmor %vm2149_vm14, %vm2150_vm13 }
 0x90a   : > { %v2142_v26 = vsel %vm2141_vm12, %v4344_v56, %v2138_v8  ;;  %v2145_v41 = vmul.f32 %v4346_v6, %v2144_v10 }
 0x90b   : > { %v2164_v12 = vmul.f32 %v2142_v26, %v5199_v20 }
 0x90c   : > { %v2146_v14 = vmul.f32 0.5, %v2145_v41 }
 0x90d   : > { %v2171_v25 = vmul.f32 %v4252_v35, %v2164_v12 }
 0x90e   : > { %v2147_v5 = vsub.f32 1.5, %v2146_v14 }
 0x90f   : > { %v5242_v13 = vadd.f32 %v4253_v1, %v2171_v25 }
 0x910   : > { %v2148_v46 = vmul.f32 %v4346_v6, %v2147_v5 }
 0x911   : > { %4037 = vmatmul.msk.f32.gmra.mxu2 %vm1097_vm2, %v5242_v13 }
 0x912   : > { %v2152_v40 = vsel %vm2151_vm15, %v4346_v6, %v2148_v46 }
 0x913   : > { %v2165_v0 = vmul.f32 %v2152_v40, %v5205_v23 }
 0x915   : > { %v2172_v15 = vmul.f32 %v4252_v35, %v2165_v0 }
 0x917   : > { %v5247_v28 = vadd.f32 %v4253_v1, %v2172_v15 }
 0x919   : > { %4038 = vmatmul.msk.f32.gmra.mxu2 %vm1097_vm2, %v5247_v28 }
 0x935   : > { %v2114_v18 = vpop.xlane.xlu1 %2113 }
 0x936   : > { %v2118_v52 = vmul.f32 %v2114_v18, %v4823_v3 }
 0x938   : > { %v2122_v17 = vadd.f32 1e-05, %v2118_v52 }
 0x93a   : > { %4347 = vrsqrt.f32 %v2122_v17  ;;  %vm2159_vm7 = vweird.f32 %v2122_v17 }
 0x940   : > { %v4348_v11 = vpop.eup %4347 }
 0x941   : > { %v2154_v19 = vmul.f32 %v4348_v11, %v2122_v17  ;;  %vm2160_vm0 = vweird.f32 %v4348_v11 }
 0x942   : > { %vm2161_vm8 = vmor %vm2159_vm7, %vm2160_vm0 }
 0x943   : > { %v2155_v20 = vmul.f32 %v4348_v11, %v2154_v19 }
 0x945   : > { %v2156_v22 = vmul.f32 0.5, %v2155_v20 }
 0x947   : > { %v2157_v59 = vsub.f32 1.5, %v2156_v22  ;;  %v4255_v22 = vld [vmem:[%s5897_s13] ss:$0 sm:$0xff] }
 0x949   : > { %v2158_v24 = vmul.f32 %v4348_v11, %v2157_v59 }
 0x94b   : > { %v2162_v16 = vsel %vm2161_vm8, %v4348_v11, %v2158_v24 }
 0x94c   : > { %v2166_v23 = vmul.f32 %v2162_v16, %v5211_v33  ;;  %v2271_v33 = vld [vmem:[%s5896_s12 + $0x28] sm:$0xff] }
 0x94d   : > { %2301 = vmatpush.msrb.mxu3 %v2271_v33 }
 0x94e   : > { %v2173_v29 = vmul.f32 %v4252_v35, %v2166_v23 }
 0x94f   : > { %2302 = vmatpush.msrb.mxu3 %v2270_v36 }
 0x950   : > { %v5253_v31 = vadd.f32 %v4253_v1, %v2173_v29 }
 0x951   : > { %2303 = vmatpush.msrb.mxu3 %v2269_v38 }
 0x952   : > { %4039 = vmatmul.msk.f32.gmra.mxu2 %vm1097_vm2, %v5253_v31 }
 0x953   : > { %2304 = vmatpush.msrb.mxu3 %v2268_v39 }
 0x955   : > { %2305 = vmatpush.msrb.mxu3 %v2267_v42 }
 0x957   : > { %2306 = vmatpush.msrb.mxu3 %v2266_v43 }
 0x98c   : > { %v2218_v44 = vpop.f32.mrf.mxu2 }
 0x98d   : > { %v2219_v37 = vadd.f32 %v4254_v30, %v2218_v44 }
 0x98f   : > { %v2230_v45 = vmul.f32 %v2219_v37, %v2219_v37 }
 0x991   : > { %v2234_v47 = vmul.f32 %v2230_v45, %v2219_v37 }
 0x993   : > { %v2238_v27 = vmul.f32 0.044715, %v2234_v47 }
 0x994   : > { %v2221_v48 = vpop.f32.mrf.mxu2 }
 0x995   : > { %v2242_v49 = vadd.f32 %v2238_v27, %v2219_v37  ;;  %v2222_v50 = vadd.f32 %v4254_v30, %v2221_v48 }
 0x997   : > { %v2246_v51 = vmul.f32 0.7978846, %v2242_v49  ;;  %v2231_v53 = vmul.f32 %v2222_v50, %v2222_v50 }
 0x999   : > { %4349 = vtanh.f32 %v2246_v51  ;;  %v2235_v34 = vmul.f32 %v2231_v53, %v2222_v50 }
 0x99b   : > { %v2239_v54 = vmul.f32 0.044715, %v2235_v34 }
 0x99c   : > { %v2224_v55 = vpop.f32.mrf.mxu2 }
 0x99d   : > { %v2243_v56 = vadd.f32 %v2239_v54, %v2222_v50  ;;  %v2225_v57 = vadd.f32 %v4254_v30, %v2224_v55 }
 0x99f   : > { %v4350_v58 = vpop.eup %4349  ;;  %v2232_v61 = vmul.f32 %v2225_v57, %v2225_v57  ;;  %v2247_v35 = vmul.f32 0.7978846, %v2243_v56 }
 0x9a0   : > { %v2254_v62 = vadd.f32 1.0, %v4350_v58 }
 0x9a1   : > { %v2236_v63 = vmul.f32 %v2232_v61, %v2225_v57  ;;  %4351 = vtanh.f32 %v2247_v35 }
 0x9a2   : > { %v2258_v7 = vmul.f32 0.5, %v2254_v62  ;;  %v4049_v62 = vld [vmem:[%s5955_s5 + $0x38] sm:$0xff] }
 0x9a3   : > { %v2240_v1 = vmul.f32 0.044715, %v2236_v63  ;;  %2459 = vmatpush.msra.mxu0 %v4049_v62  ;;  %v4048_v63 = vld [vmem:[%s5955_s5 + $0x30] sm:$0xff] }
 0x9a4   : > { %v2262_v2 = vmul.f32 %v2258_v7, %v2219_v37  ;;  %v4047_v7 = vld [vmem:[%s5955_s5 + $0x28] sm:$0xff] }
 0x9a5   : > { %v2244_v60 = vadd.f32 %v2240_v1, %v2225_v57  ;;  %2460 = vmatpush.msra.mxu0 %v4048_v63  ;;  %v4046_v1 = vld [vmem:[%s5955_s5 + $0x20] sm:$0xff] }
 0x9a6   : > { %4040 = vmatmul.msk.f32.vlgmr.msrb.gmra.mxu3 %vm2278_vm9, %v2262_v2 }
 0x9a7   : > { %v4352_v4 = vpop.eup %4351  ;;  %v2248_v6 = vmul.f32 0.7978846, %v2244_v60  ;;  %2461 = vmatpush.msra.mxu0 %v4047_v7 }
 0x9a8   : > { %v2255_v8 = vadd.f32 1.0, %v4352_v4 }
 0x9a9   : > { %4353 = vtanh.f32 %v2248_v6  ;;  %2462 = vmatpush.msra.mxu0 %v4046_v1 }
 0x9aa   : > { %v2259_v10 = vmul.f32 0.5, %v2255_v8 }
 0x9ac   : > { %v2263_v26 = vmul.f32 %v2259_v10, %v2222_v50 }
 0x9ae   : > { %4041 = vmatmul.msk.f32.gmra.mxu3 %vm2278_vm9, %v2263_v26 }
 0x9af   : > { %v4354_v41 = vpop.eup %4353 }
 0x9b0   : > { %v2256_v12 = vadd.f32 1.0, %v4354_v41 }
 0x9b2   : > { %v2260_v14 = vmul.f32 0.5, %v2256_v12 }
 0x9b4   : > { %v2264_v25 = vmul.f32 %v2260_v14, %v2225_v57 }
 0x9b6   : > { %4042 = vmatmul.msk.f32.gmra.mxu3 %vm2278_vm9, %v2264_v25 }
 0x9d5   : > { %v2227_v5 = vpop.f32.mrf.mxu2 }
 0x9d6   : > { %v2228_v46 = vadd.f32 %v4254_v30, %v2227_v5 }
 0x9d8   : > { %v2233_v40 = vmul.f32 %v2228_v46, %v2228_v46 }
 0x9da   : > { %v2237_v0 = vmul.f32 %v2233_v40, %v2228_v46 }
 0x9dc   : > { %v2241_v15 = vmul.f32 0.044715, %v2237_v0 }
 0x9de   : > { %v2245_v18 = vadd.f32 %v2241_v15, %v2228_v46 }
 0x9e0   : > { %v2249_v52 = vmul.f32 0.7978846, %v2245_v18 }
 0x9e2   : > { %4355 = vtanh.f32 %v2249_v52  ;;  %v4256_v52 = vld [vmem:[%s5956_s21 + $0x1] ss:$0 sm:$0xff] }
 0x9e8   : > { %v4356_v17 = vpop.eup %4355 }
 0x9e9   : > { %v2257_v11 = vadd.f32 1.0, %v4356_v17 }
 0x9eb   : > { %v2261_v19 = vmul.f32 0.5, %v2257_v11 }
 0x9ed   : > { %v2265_v20 = vmul.f32 %v2261_v19, %v2228_v46  ;;  %v4257_v19 = vld [vmem:[%s5957_s27 + $0x1] ss:$0 sm:$0xff] }
 0x9ef   : > { %4043 = vmatmul.msk.f32.gmra.mxu3 %vm2278_vm9, %v2265_v20 }
 0xa29   : > { %v2308_v59 = vpop.f32.mrf.mxu3 }
 0xa2a   : > { %v2309_v24 = vadd.f32 %v4255_v22, %v2308_v59 }
 0xa2c   : > { %v5292_v16 = vadd.f32 %v2309_v24, %v5237_v9 }
 0xa2e   : > { %v2328_v23 = vsel %vm1097_vm2, %v5292_v16, 0.0 }
 0xa2f   : > { %2329 = vadd.xlane.f32.xlu2 %v2328_v23 }
 0xa31   : > { %v2311_v29 = vpop.f32.mrf.mxu3 }
 0xa32   : > { %v2312_v21 = vadd.f32 %v4255_v22, %v2311_v29 }
 0xa34   : > { %v5297_v32 = vadd.f32 %v2312_v21, %v5242_v13 }
 0xa36   : > { %v2331_v33 = vsel %vm1097_vm2, %v5297_v32, 0.0 }
 0xa37   : > { %2332 = vadd.xlane.f32.xlu0 %v2331_v33 }
 0xa39   : > { %v2314_v36 = vpop.f32.mrf.mxu3 }
 0xa3a   : > { %v2315_v38 = vadd.f32 %v4255_v22, %v2314_v36 }
 0xa3c   : > { %v5302_v39 = vadd.f32 %v2315_v38, %v5247_v28 }
 0xa3e   : > { %v2334_v9 = vsel %vm1097_vm2, %v5302_v39, 0.0 }
 0xa3f   : > { %2335 = vadd.xlane.f32.xlu1 %v2334_v9 }
 0xa72   : > { %v2317_v42 = vpop.f32.mrf.mxu3 }
 0xa73   : > { %v2318_v43 = vadd.f32 %v4255_v22, %v2317_v42 }
 0xa75   : > { %v5307_v30 = vadd.f32 %v2318_v43, %v5253_v31 }
 0xa77   : > { %v2337_v13 = vsel %vm1107_vm3, %v5307_v30, 0.0 }
 0xa78   : > { %2338 = vadd.xlane.f32.xlu2 %v2337_v13 }
 0xaa2   : > { %v2330_v44 = vpop.xlane.xlu2 %2329 }
 0xaa3   : > { %v2340_v37 = vmul.f32 %v2330_v44, %v4823_v3 }
 0xaa5   : > { %v2344_v45 = vsub.f32 %v5292_v16, %v2340_v37 }
 0xaa7   : > { %v2348_v28 = vmul.f32 %v2344_v45, %v2344_v45 }
 0xaa9   : > { %v2352_v47 = vsel %vm1097_vm2, %v2348_v28, 0.0 }
 0xaaa   : > { %v2333_v27 = vpop.xlane.xlu0 %2332  ;;  %2353 = vadd.xlane.f32.xlu0 %v2352_v47 }
 0xaab   : > { %v2341_v48 = vmul.f32 %v2333_v27, %v4823_v3 }
 0xaad   : > { %v5316_v49 = vsub.f32 %v5297_v32, %v2341_v48 }
 0xaaf   : > { %v2349_v31 = vmul.f32 %v5316_v49, %v5316_v49 }
 0xab1   : > { %v2355_v50 = vsel %vm1097_vm2, %v2349_v31, 0.0 }
 0xab2   : > { %2356 = vadd.xlane.f32.xlu1 %v2355_v50  ;;  %v2336_v51 = vpop.xlane.xlu1 %2335 }
 0xab3   : > { %v2342_v53 = vmul.f32 %v2336_v51, %v4823_v3 }
 0xab5   : > { %v5323_v34 = vsub.f32 %v5302_v39, %v2342_v53 }
 0xab7   : > { %v2350_v54 = vmul.f32 %v5323_v34, %v5323_v34 }
 0xab9   : > { %v2358_v55 = vsel %vm1097_vm2, %v2350_v54, 0.0 }
 0xaba   : > { %2359 = vadd.xlane.f32.xlu2 %v2358_v55 }
 0xaeb   : > { %v2339_v56 = vpop.xlane.xlu2 %2338 }
 0xaec   : > { %v2343_v57 = vmul.f32 %v2339_v56, %v4823_v3 }
 0xaee   : > { %v5330_v58 = vsub.f32 %v5307_v30, %v2343_v57 }
 0xaf0   : > { %v2351_v61 = vmul.f32 %v5330_v58, %v5330_v58 }
 0xaf2   : > { %v2361_v35 = vsel %vm1107_vm3, %v2351_v61, 0.0 }
 0xaf3   : > { %2362 = vadd.xlane.f32.xlu0 %v2361_v35 }
 0xb1d   : > { %v2354_v2 = vpop.xlane.xlu0 %2353 }
 0xb1e   : > { %v2364_v60 = vmul.f32 %v2354_v2, %v4823_v3 }
 0xb20   : > { %v2368_v4 = vadd.f32 1e-05, %v2364_v60 }
 0xb22   : > { %4357 = vrsqrt.f32 %v2368_v4  ;;  %vm2378_vm11 = vweird.f32 %v2368_v4 }
 0xb25   : > { %v2357_v6 = vpop.xlane.xlu1 %2356 }
 0xb26   : > { %v2365_v8 = vmul.f32 %v2357_v6, %v4823_v3 }
 0xb28   : > { %v4358_v10 = vpop.eup %4357  ;;  %v2369_v26 = vadd.f32 1e-05, %v2365_v8 }
 0xb29   : > { %v2373_v41 = vmul.f32 %v4358_v10, %v2368_v4  ;;  %vm2379_vm10 = vweird.f32 %v4358_v10 }
 0xb2a   : > { %4359 = vrsqrt.f32 %v2369_v26  ;;  %vm2380_vm12 = vmor %vm2378_vm11, %vm2379_vm10  ;;  %vm2388_vm14 = vweird.f32 %v2369_v26 }
 0xb2b   : > { %v2374_v12 = vmul.f32 %v4358_v10, %v2373_v41 }
 0xb2d   : > { %v2375_v14 = vmul.f32 0.5, %v2374_v12  ;;  %v2360_v25 = vpop.xlane.xlu2 %2359 }
 0xb2e   : > { %v2366_v5 = vmul.f32 %v2360_v25, %v4823_v3 }
 0xb2f   : > { %v2376_v46 = vsub.f32 1.5, %v2375_v14 }
 0xb30   : > { %v4360_v40 = vpop.eup %4359  ;;  %v2370_v0 = vadd.f32 1e-05, %v2366_v5 }
 0xb31   : > { %v2377_v15 = vmul.f32 %v4358_v10, %v2376_v46  ;;  %v2383_v18 = vmul.f32 %v4360_v40, %v2369_v26  ;;  %vm2389_vm13 = vweird.f32 %v4360_v40 }
 0xb32   : > { %4361 = vrsqrt.f32 %v2370_v0  ;;  %vm2390_vm15 = vmor %vm2388_vm14, %vm2389_vm13  ;;  %vm2398_vm7 = vweird.f32 %v2370_v0 }
 0xb33   : > { %v2381_v17 = vsel %vm2380_vm12, %v4358_v10, %v2377_v15  ;;  %v2384_v11 = vmul.f32 %v4360_v40, %v2383_v18 }
 0xb34   : > { %v2412_v20 = vmul.f32 %v2381_v17, %v2344_v45 }
 0xb35   : > { %v2385_v22 = vmul.f32 0.5, %v2384_v11 }
 0xb36   : > { %v2419_v59 = vmul.f32 %v4256_v52, %v2412_v20 }
 0xb37   : > { %v2386_v24 = vsub.f32 1.5, %v2385_v22 }
 0xb38   : > { %v4362_v23 = vpop.eup %4361  ;;  %v2426_v29 = vadd.f32 %v4257_v19, %v2419_v59 }
 0xb39   : > { %v2387_v21 = vmul.f32 %v4360_v40, %v2386_v24  ;;  %v2393_v33 = vmul.f32 %v4362_v23, %v2370_v0  ;;  %vm2399_vm0 = vweird.f32 %v4362_v23 }
 0xb3a   : > { %4050 = vmatmul.msk.f32.vlgmr.msra.gmra.mxu0 %vm1097_vm2, %v2426_v29  ;;  %vm2400_vm8 = vmor %vm2398_vm7, %vm2399_vm0 }
 0xb3b   : > { %v2391_v36 = vsel %vm2390_vm15, %v4360_v40, %v2387_v21  ;;  %v2394_v38 = vmul.f32 %v4362_v23, %v2393_v33 }
 0xb3c   : > { %v2413_v9 = vmul.f32 %v2391_v36, %v5316_v49 }
 0xb3d   : > { %v2395_v42 = vmul.f32 0.5, %v2394_v38 }
 0xb3e   : > { %v2420_v43 = vmul.f32 %v4256_v52, %v2413_v9 }
 0xb3f   : > { %v2396_v13 = vsub.f32 1.5, %v2395_v42 }
 0xb40   : > { %v2427_v44 = vadd.f32 %v4257_v19, %v2420_v43 }
 0xb41   : > { %v2397_v37 = vmul.f32 %v4362_v23, %v2396_v13 }
 0xb42   : > { %4051 = vmatmul.msk.f32.gmra.mxu0 %vm1097_vm2, %v2427_v44 }
 0xb43   : > { %v2401_v45 = vsel %vm2400_vm8, %v4362_v23, %v2397_v37 }
 0xb44   : > { %v2414_v28 = vmul.f32 %v2401_v45, %v5323_v34 }
 0xb46   : > { %v2421_v47 = vmul.f32 %v4256_v52, %v2414_v28 }
 0xb48   : > { %v2428_v27 = vadd.f32 %v4257_v19, %v2421_v47 }
 0xb4a   : > { %4052 = vmatmul.msk.f32.gmra.mxu0 %vm1097_vm2, %v2428_v27 }
 0xb66   : > { %v2363_v48 = vpop.xlane.xlu0 %2362 }
 0xb67   : > { %v2367_v49 = vmul.f32 %v2363_v48, %v4823_v3 }
 0xb69   : > { %v2371_v31 = vadd.f32 1e-05, %v2367_v49 }
 0xb6b   : > { %4363 = vrsqrt.f32 %v2371_v31  ;;  %vm2408_vm11 = vweird.f32 %v2371_v31 }
 0xb71   : > { %v4364_v50 = vpop.eup %4363 }
 0xb72   : > { %v2403_v51 = vmul.f32 %v4364_v50, %v2371_v31  ;;  %vm2409_vm10 = vweird.f32 %v4364_v50 }
 0xb73   : > { %vm2410_vm12 = vmor %vm2408_vm11, %vm2409_vm10 }
 0xb74   : > { %v2404_v53 = vmul.f32 %v4364_v50, %v2403_v51  ;;  %v4054_v51 = vld [vmem:[%s5958_s6 + $0x20] sm:$0xff] }
 0xb76   : > { %v2405_v54 = vmul.f32 0.5, %v2404_v53 }
 0xb78   : > { %v2406_v55 = vsub.f32 1.5, %v2405_v54 }
 0xb7a   : > { %v2407_v56 = vmul.f32 %v4364_v50, %v2406_v55 }
 0xb7c   : > { %v2411_v57 = vsel %vm2410_vm12, %v4364_v50, %v2407_v56 }
 0xb7d   : > { %v2415_v34 = vmul.f32 %v2411_v57, %v5330_v58 }
 0xb7f   : > { %v2422_v61 = vmul.f32 %v4256_v52, %v2415_v34 }
 0xb81   : > { %v2429_v35 = vadd.f32 %v4257_v19, %v2422_v61 }
 0xb83   : > { %4053 = vmatmul.msk.f32.gmra.mxu0 %vm1097_vm2, %v2429_v35 }
 0xbb7   : > { %v5364_v62 = vpop.f32.mrf.mxu0 }
 0xbbf   : > { %v5366_v63 = vpop.f32.mrf.mxu0 }
 0xbc0   : > { %2487 = vrot.lane.b32.xlu0 %v5366_v63, %s5959_s3 }
 0xbc7   : > { %v5370_v7 = vpop.f32.mrf.mxu0 }
 0xbc8   : > { %2489 = vrot.lane.b32.xlu2 %v5370_v7, %s5959_s3  ;;  %v5400_v5 = vpack.i.bf16 %v5366_v63, %v5370_v7 }
 0xc00   : > { %v5374_v1 = vpop.f32.mrf.mxu0 }
 0xc01   : > { %2491 = vrot.lane.b32.xlu1 %v5374_v1, %s5959_s3 }
 0xc09   : > { %2485 = vrot.lane.b32.xlu1 %v5364_v62, %s5959_s3  ;;  %s5967_s3 = smov 56  }
 0xc22   : > { %v2490_v2 = vpop.permute.xlu2 %2489 }
 0xc32   : > { %v2488_v60 = vpop.permute.xlu0 %2487 }
 0xc73   : > { %v2492_v58 = vpop.permute.xlu1 %2491 }
 0xc74   : > { %4058 = vmatpush.xpose.msk.msra.mxu1 %vm1269_vm1, %v2492_v58 }
 0xc78   : > { %4059 = vmatpush.xpose.msk.msra.mxu1 %vm1269_vm1, %v2490_v2 }
 0xc7b   : > { %v2486_v4 = vpop.permute.xlu1 %2485 }
 0xc7c   : > { %4060 = vmatpush.xpose.msk.msra.mxu1 %vm1269_vm1, %v2488_v60 }
 0xc80   : > { %4061 = vmatpush.xpose.msk.msra.mxu1 %vm1269_vm1, %v2486_v4 }
 0xc83   : > { %4062 = vmatmul.msk.f32.vlgmr.msra.gmra.mxu1 %vm1269_vm1, %v5364_v62 }
 0xc8b   : > { %4063 = vmatmul.msk.f32.gmra.mxu1 %vm1269_vm1, %v5366_v63 }
 0xc93   : > { %4064 = vmatmul.msk.f32.gmra.mxu1 %vm1269_vm1, %v5370_v7 }
 0xc9b   : > { %4065 = vmatmul.msk.f32.gmra.mxu1 %vm1269_vm1, %v5374_v1 }
 0xd00   : > { %v2526_v6 = vpop.f32.mrf.mxu1 }
 0xd01   : > { %v2538_v8 = vsel %vm1315_vm4, %v2526_v6, -inf }
 0xd02   : > { %2539 = vmax.xlane.f32.xlu0 %v2538_v8 }
 0xd08   : > { %v2529_v10 = vpop.f32.mrf.mxu1 }
 0xd09   : > { %v2541_v26 = vsel %vm1315_vm4, %v2529_v10, -inf }
 0xd0a   : > { %2542 = vmax.xlane.f32.xlu2 %v2541_v26 }
 0xd10   : > { %v2532_v41 = vpop.f32.mrf.mxu1 }
 0xd11   : > { %v2544_v12 = vsel %vm1315_vm4, %v2532_v41, -inf }
 0xd12   : > { %2545 = vmax.xlane.f32.xlu1 %v2544_v12 }
 0xd18   : > { %v2535_v14 = vpop.f32.mrf.mxu1 }
 0xd19   : > { %v2547_v25 = vsel %vm1325_vm5, %v2535_v14, -inf }
 0xd1a   : > { %2548 = vmax.xlane.f32.xlu0 %v2547_v25 }
 0xd2b   : > { %2588 = vrot.lane.b32.xlu1 %v5374_v1, %s5960_s4 }
 0xd2e   : > { %4230 = vrot.lane.b32.xlu0 %v5400_v5, %s5960_s4 }
 0xd75   : > { %v2540_v46 = vpop.xlane.xlu0 %2539 }
 0xd76   : > { %v2550_v40 = vsub.f32 %v2526_v6, %v2540_v46 }
 0xd78   : > { %v2554_v0 = vmul.f32 1.442695, %v2550_v40 }
 0xd7a   : > { %4365 = vpow2.f32 %v2554_v0 }
 0xd7d   : > { %v2543_v15 = vpop.xlane.xlu2 %2542 }
 0xd7e   : > { %v2551_v18 = vsub.f32 %v2529_v10, %v2543_v15 }
 0xd80   : > { %v4366_v52 = vpop.eup %4365  ;;  %v2556_v17 = vmul.f32 1.442695, %v2551_v18 }
 0xd81   : > { %v2562_v11 = vsel %vm1315_vm4, %v4366_v52, 0.0 }
 0xd82   : > { %4367 = vpow2.f32 %v2556_v17  ;;  %2563 = vadd.xlane.f32.xlu2 %v2562_v11 }
 0xd85   : > { %v2546_v19 = vpop.xlane.xlu1 %2545 }
 0xd86   : > { %v2552_v20 = vsub.f32 %v2532_v41, %v2546_v19 }
 0xd88   : > { %v4368_v22 = vpop.eup %4367  ;;  %v2558_v59 = vmul.f32 1.442695, %v2552_v20 }
 0xd89   : > { %v2565_v24 = vsel %vm1315_vm4, %v4368_v22, 0.0 }
 0xd8a   : > { %4369 = vpow2.f32 %v2558_v59  ;;  %2566 = vadd.xlane.f32.xlu2 %v2565_v24 }
 0xd8d   : > { %v2549_v23 = vpop.xlane.xlu0 %2548 }
 0xd8e   : > { %v2553_v29 = vsub.f32 %v2535_v14, %v2549_v23 }
 0xd90   : > { %v4370_v21 = vpop.eup %4369  ;;  %v2560_v33 = vmul.f32 1.442695, %v2553_v29 }
 0xd91   : > { %v2568_v36 = vsel %vm1315_vm4, %v4370_v21, 0.0 }
 0xd92   : > { %4371 = vpow2.f32 %v2560_v33  ;;  %2569 = vadd.xlane.f32.xlu0 %v2568_v36 }
 0xd98   : > { %v5407_v38 = vpop.eup %4371 }
 0xd99   : > { %v2571_v9 = vsel %vm1325_vm5, %v5407_v38, 0.0 }
 0xd9a   : > { %2572 = vadd.xlane.f32.xlu1 %v2571_v9 }
 0xd9d   : > { %v2589_v42 = vpop.permute.xlu1 %2588 }
 0xd9e   : > { %4066 = vmatpush.msk.msra.mxu2 %vm1384_vm6, %v2589_v42 }
 0xda0   : > { %v4231_v43 = vpop.permute.xlu0 %4230 }
 0xda1   : > { %v4232_v13 = vunpack.i.l.bf16 %v4231_v43  ;;  %v4233_v44 = vunpack.i.h.bf16 %v4231_v43 }
 0xda2   : > { %2582 = vrot.lane.b32.xlu2 %v5364_v62, %s5960_s4  ;;  %s5968_s4 = smov 40  }
 0xda3   : > { %2620 = vmatpush.msra.mxu2 %v4232_v13 }
 0xda5   : > { %2621 = vmatpush.msra.mxu2 %v4233_v44 }
 0xda6   : > { %2636 = vrot.lane.b32.xlu0 %v5364_v62, %s5961_s26 }
 0xdaa   : > { %2650 = vrot.lane.b32.xlu2 %v5374_v1, %s5962_s1 }
 0xdae   : > { %3093 = vrot.lane.b32.xlu0 %v5370_v7, %s5963_s28 }
 0xdb2   : > { %2648 = vrot.lane.b32.xlu2 %v5370_v7, %s5962_s1 }
 0xdb3   : > { %2638 = vrot.lane.b32.xlu1 %v5366_v63, %s5961_s26 }
 0xdb6   : > { %3091 = vrot.lane.b32.xlu0 %v5366_v63, %s5963_s28 }
 0xdba   : > { %2646 = vrot.lane.b32.xlu2 %v5366_v63, %s5962_s1 }
 0xdbb   : > { %2642 = vrot.lane.b32.xlu1 %v5374_v1, %s5961_s26 }
 0xdbe   : > { %3089 = vrot.lane.b32.xlu0 %v5364_v62, %s5963_s28 }
 0xdc2   : > { %2644 = vrot.lane.b32.xlu2 %v5364_v62, %s5962_s1 }
 0xdc3   : > { %3081 = vrot.lane.b32.xlu1 %v5364_v62, %s5964_s2 }
 0xdc6   : > { %2877 = vrot.lane.b32.xlu0 %v5364_v62, %s5965_s23 }
 0xdca   : > { %3095 = vrot.lane.b32.xlu2 %v5374_v1, %s5963_s28 }
 0xdcb   : > { %3083 = vrot.lane.b32.xlu1 %v5366_v63, %s5964_s2 }
 0xdce   : > { %3085 = vrot.lane.b32.xlu0 %v5370_v7, %s5964_s2 }
 0xdd2   : > { %2640 = vrot.lane.b32.xlu2 %v5370_v7, %s5961_s26  ;;  %s5969_s26 = smov 48  }
 0xdd3   : > { %2881 = vrot.lane.b32.xlu1 %v5370_v7, %s5965_s23 }
 0xdd6   : > { %2883 = vrot.lane.b32.xlu0 %v5374_v1, %s5965_s23 }
 0xdda   : > { %2891 = vrot.lane.b32.xlu2 %v5374_v1, %s5966_s30 }
 0xde2   : > { %2889 = vrot.lane.b32.xlu2 %v5370_v7, %s5966_s30 }
 0xdea   : > { %2887 = vrot.lane.b32.xlu2 %v5366_v63, %s5966_s30 }
 0xdf2   : > { %2885 = vrot.lane.b32.xlu2 %v5364_v62, %s5966_s30  ;;  %s622_s30 = sand.u32 1, %s4517_s24  }
 0xdf3   : > { %s623_s1 = scalar_lea.vmem [#allocation3], %s622_s30 }
 0xdf4   : > { %s3825_s28 = sshll.u32 %s623_s1, 4  ;;  %s3826_s28 = int_to_ptr.vmem [resolvable:$true] %s3825_s28 }
 0xdf5   : > { %v2564_v37 = vpop.xlane.xlu2 %2563 }
 0xdf6   : > { %4373 = vrcp.f32 %v2564_v37 }
 0xdfa   : > { %2879 = vrot.lane.b32.xlu2 %v5366_v63, %s5965_s23  ;;  %s3815_s23 = scalar_lea.sflag [#allocation4], %s622_s30 }
 0xdfc   : > { %v4374_v28 = vpop.eup %4373 }
 0xdfd   : > { %v2567_v45 = vpop.xlane.xlu2 %2566  ;;  %v2578_v47 = vmul.f32 %v4374_v28, %v4366_v52 }
 0xdfe   : > { %4375 = vrcp.f32 %v2567_v45 }
 0xe02   : > { %3087 = vrot.lane.b32.xlu2 %v5374_v1, %s5964_s2 }
 0xe04   : > { %v4376_v49 = vpop.eup %4375 }
 0xe05   : > { %v2583_v27 = vpop.permute.xlu2 %2582  ;;  %v2570_v48 = vpop.xlane.xlu0 %2569  ;;  %v2579_v50 = vmul.f32 %v4376_v49, %v4368_v22 }
 0xe06   : > { %2622 = vmatpush.msra.mxu2 %v2583_v27  ;;  %4377 = vrcp.f32 %v2570_v48 }
 0xe07   : > { %4067 = vmatmul.msk.f32.vlgmr.msra.gmra.mxu2 %vm1315_vm4, %v2578_v47 }
 0xe08   : > { %2863 = vmatpush.msrb.mxu2 %v4054_v51 }
 0xe0c   : > { %v4378_v54 = vpop.eup %4377 }
 0xe0d   : > { %v2651_v31 = vpop.permute.xlu2 %2650  ;;  %v2573_v53 = vpop.xlane.xlu1 %2572  ;;  %v2580_v56 = vmul.f32 %v4378_v54, %v4370_v21 }
 0xe0e   : > { %4071 = vmatpush.xpose.msk.msra.mxu3 %vm1269_vm1, %v2651_v31  ;;  %4379 = vrcp.f32 %v2573_v53 }
 0xe0f   : > { %4068 = vmatmul.msk.f32.gmra.mxu2 %vm1315_vm4, %v2579_v50 }
 0xe14   : > { %v4380_v57 = vpop.eup %4379 }
 0xe15   : > { %v2649_v55 = vpop.permute.xlu2 %2648  ;;  %v2581_v35 = vmul.f32 %v4380_v57, %v5407_v38 }
 0xe16   : > { %4072 = vmatpush.xpose.msk.msra.mxu3 %vm1269_vm1, %v2649_v55 }
 0xe17   : > { %4069 = vmatmul.msk.f32.gmra.mxu2 %vm1315_vm4, %v2580_v56 }
 0xe18   : > { %v2637_v34 = vpop.permute.xlu0 %2636 }
 0xe1d   : > { %v2647_v61 = vpop.permute.xlu2 %2646 }
 0xe1e   : > { %4073 = vmatpush.xpose.msk.msra.mxu3 %vm1269_vm1, %v2647_v61 }
 0xe1f   : > { %4070 = vmatmul.msk.f32.gmra.mxu2 %vm1315_vm4, %v2581_v35 }
 0xe20   : > { %v3094_v63 = vpop.permute.xlu0 %3093 }
 0xe25   : > { %v2645_v7 = vpop.permute.xlu2 %2644  ;;  %v2639_v60 = vpop.permute.xlu1 %2638 }
 0xe26   : > { %4074 = vmatpush.xpose.msk.msra.mxu3 %vm1269_vm1, %v2645_v7 }
 0xe28   : > { %v3092_v2 = vpop.permute.xlu0 %3091 }
 0xe29   : > { %4075 = vmatmul.msk.f32.vlgmr.msra.gmra.mxu3 %vm1269_vm1, %v2637_v34 }
 0xe2d   : > { %v3096_v58 = vpop.permute.xlu2 %3095  ;;  %v2643_v10 = vpop.permute.xlu1 %2642 }
 0xe2e   : > { %4109 = vmatpush.xpose.msk.msra.mxu2 %vm1269_vm1, %v3096_v58 }
 0xe30   : > { %v3090_v6 = vpop.permute.xlu0 %3089 }
 0xe31   : > { %4076 = vmatmul.msk.f32.gmra.mxu3 %vm1269_vm1, %v2639_v60 }
 0xe32   : > { %4110 = vmatpush.xpose.msk.msra.mxu2 %vm1269_vm1, %v3094_v63 }
 0xe35   : > { %v2641_v4 = vpop.permute.xlu2 %2640  ;;  %v3082_v12 = vpop.permute.xlu1 %3081 }
 0xe36   : > { %4111 = vmatpush.xpose.msk.msra.mxu2 %vm1269_vm1, %v3092_v2 }
 0xe38   : > { %v2878_v25 = vpop.permute.xlu0 %2877 }
 0xe39   : > { %4077 = vmatmul.msk.f32.gmra.mxu3 %vm1269_vm1, %v2641_v4 }
 0xe3a   : > { %4112 = vmatpush.xpose.msk.msra.mxu2 %vm1269_vm1, %v3090_v6 }
 0xe3d   : > { %v2892_v8 = vpop.permute.xlu2 %2891  ;;  %v3084_v46 = vpop.permute.xlu1 %3083 }
 0xe3e   : > { %4092 = vmatpush.xpose.msk.msrb.mxu3 %vm1269_vm1, %v2892_v8 }
 0xe40   : > { %v3086_v0 = vpop.permute.xlu0 %3085 }
 0xe41   : > { %4078 = vmatmul.msk.f32.gmra.mxu3 %vm1269_vm1, %v2643_v10 }
 0xe45   : > { %v2890_v26 = vpop.permute.xlu2 %2889  ;;  %v2882_v15 = vpop.permute.xlu1 %2881 }
 0xe46   : > { %4093 = vmatpush.xpose.msk.msrb.mxu3 %vm1269_vm1, %v2890_v26 }
 0xe48   : > { %v2884_v18 = vpop.permute.xlu0 %2883 }
 0xe4d   : > { %v2888_v41 = vpop.permute.xlu2 %2887 }
 0xe4e   : > { %4094 = vmatpush.xpose.msk.msrb.mxu3 %vm1269_vm1, %v2888_v41 }
 0xe55   : > { %v2886_v14 = vpop.permute.xlu2 %2885 }
 0xe56   : > { %4095 = vmatpush.xpose.msk.msrb.mxu3 %vm1269_vm1, %v2886_v14 }
 0xe59   : > { %4096 = vmatmul.msk.f32.vlgmr.msrb.gmra.mxu3 %vm1269_vm1, %v2878_v25 }
 0xe5d   : > { %v2880_v40 = vpop.permute.xlu2 %2879 }
 0xe61   : > { %4097 = vmatmul.msk.f32.gmra.mxu3 %vm1269_vm1, %v2880_v40 }
 0xe65   : > { %v3088_v21 = vpop.permute.xlu2 %3087 }
 0xe69   : > { %4098 = vmatmul.msk.f32.gmra.mxu3 %vm1269_vm1, %v2882_v15 }
 0xe71   : > { %4099 = vmatmul.msk.f32.gmra.mxu3 %vm1269_vm1, %v2884_v18 }
 0xe8a   : > { %v2624_v52 = vpop.f32.mrf.mxu2 }
 0xe8b   : > { %4088 = vmatmul.msk.f32.vlgmr.msrb.gmra.mxu2 %vm1269_vm1, %v2624_v52 }
 0xe92   : > { %v2627_v17 = vpop.f32.mrf.mxu2 }
 0xe93   : > { %4089 = vmatmul.msk.f32.gmra.mxu2 %vm1269_vm1, %v2627_v17 }
 0xe9a   : > { %v2630_v11 = vpop.f32.mrf.mxu2 }
 0xe9b   : > { %4090 = vmatmul.msk.f32.gmra.mxu2 %vm1269_vm1, %v2630_v11 }
 0xea2   : > { %v2633_v19 = vpop.f32.mrf.mxu2 }
 0xea3   : > { %4091 = vmatmul.msk.f32.gmra.mxu2 %vm1269_vm1, %v2633_v19 }
 0xeab   : > { %4113 = vmatmul.msk.f32.vlgmr.msra.gmra.mxu2 %vm1269_vm1, %v3082_v12 }
 0xeac   : > { %v2685_v20 = vpop.f32.mrf.mxu3 }
 0xead   : > { %v2697_v22 = vsel %vm1315_vm4, %v2685_v20, -inf }
 0xeae   : > { %2698 = vmax.xlane.f32.xlu1 %v2697_v22 }
 0xeb3   : > { %4114 = vmatmul.msk.f32.gmra.mxu2 %vm1269_vm1, %v3084_v46 }
 0xeb4   : > { %v2688_v59 = vpop.f32.mrf.mxu3 }
 0xeb5   : > { %v2700_v24 = vsel %vm1315_vm4, %v2688_v59, -inf }
 0xeb6   : > { %2701 = vmax.xlane.f32.xlu2 %v2700_v24 }
 0xebb   : > { %4115 = vmatmul.msk.f32.gmra.mxu2 %vm1269_vm1, %v3086_v0 }
 0xebc   : > { %v2691_v23 = vpop.f32.mrf.mxu3 }
 0xebd   : > { %v2703_v29 = vsel %vm1315_vm4, %v2691_v23, -inf }
 0xebe   : > { %2704 = vmax.xlane.f32.xlu0 %v2703_v29 }
 0xec3   : > { %4116 = vmatmul.msk.f32.gmra.mxu2 %vm1269_vm1, %v3088_v21 }
 0xec4   : > { %v2694_v33 = vpop.f32.mrf.mxu3 }
 0xec5   : > { %v2706_v36 = vsel %vm1325_vm5, %v2694_v33, -inf }
 0xec6   : > { %2707 = vmax.xlane.f32.xlu1 %v2706_v36 }
 0xedc   : > { %v2926_v38 = vpop.f32.mrf.mxu3 }
 0xedd   : > { %v2938_v9 = vsel %vm1315_vm4, %v2926_v38, -inf }
 0xede   : > { %2939 = vmax.xlane.f32.xlu0 %v2938_v9 }
 0xee4   : > { %v5503_v42 = vpop.f32.mrf.mxu3 }
 0xee5   : > { %v2941_v43 = vsel %vm1315_vm4, %v5503_v42, -inf }
 0xee6   : > { %2942 = vmax.xlane.f32.xlu2 %v2941_v43 }
 0xeec   : > { %v5507_v13 = vpop.f32.mrf.mxu3 }
 0xeed   : > { %v2944_v44 = vsel %vm1315_vm4, %v5507_v13, -inf }
 0xeee   : > { %2945 = vmax.xlane.f32.xlu1 %v2944_v44 }
 0xef2   : > { %4235 = vrot.lane.b32.xlu0 %v5400_v5, %s5967_s3 }
 0xef4   : > { %v5527_v56 = vpop.f32.mrf.mxu3 }
 0xef5   : > { %v2947_v61 = vsel %vm1325_vm5, %v5527_v56, -inf }
 0xf07   : > { %2747 = vrot.lane.b32.xlu1 %v5374_v1, %s5967_s3 }
 0xf0e   : > { %v5515_v37 = vpop.f32.mrf.mxu2 }
 0xf16   : > { %v5517_v45 = vpop.f32.mrf.mxu2 }
 0xf1e   : > { %v5519_v27 = vpop.f32.mrf.mxu2 }
 0xf21   : > { %v2699_v28 = vpop.xlane.xlu1 %2698 }
 0xf22   : > { %v2709_v47 = vsub.f32 %v2685_v20, %v2699_v28 }
 0xf24   : > { %v2713_v48 = vmul.f32 1.442695, %v2709_v47 }
 0xf26   : > { %4381 = vpow2.f32 %v2713_v48  ;;  %v5525_v53 = vpop.f32.mrf.mxu2 }
 0xf29   : > { %v2702_v49 = vpop.xlane.xlu2 %2701 }
 0xf2a   : > { %v2710_v50 = vsub.f32 %v2688_v59, %v2702_v49 }
 0xf2c   : > { %v5521_v31 = vpop.eup %4381  ;;  %v2715_v54 = vmul.f32 1.442695, %v2710_v50 }
 0xf2d   : > { %v2721_v51 = vsel %vm1315_vm4, %v5521_v31, 0.0 }
 0xf2e   : > { %2722 = vadd.xlane.f32.xlu2 %v2721_v51  ;;  %4383 = vpow2.f32 %v2715_v54  ;;  %v5531_v35 = vpop.f32.mrf.mxu2 }
 0xf2f   : > { %v3142_v11 = vsel %vm1315_vm4, %v5531_v35, -inf }
 0xf31   : > { %v2705_v55 = vpop.xlane.xlu0 %2704 }
 0xf32   : > { %v2711_v57 = vsub.f32 %v2691_v23, %v2705_v55 }
 0xf34   : > { %v2717_v34 = vmul.f32 1.442695, %v2711_v57  ;;  %v5533_v7 = vpop.eup %4383 }
 0xf35   : > { %v2724_v4 = vsel %vm1315_vm4, %v5533_v7, 0.0 }
 0xf36   : > { %4385 = vpow2.f32 %v2717_v34  ;;  %2948 = vmax.xlane.f32.xlu2 %v2947_v61  ;;  %v3133_v8 = vpop.f32.mrf.mxu2 }
 0xf37   : > { %v3145_v41 = vsel %vm1315_vm4, %v3133_v8, -inf }
 0xf39   : > { %v2708_v63 = vpop.xlane.xlu1 %2707 }
 0xf3a   : > { %v2712_v58 = vsub.f32 %v2694_v33, %v2708_v63 }
 0xf3c   : > { %v5535_v2 = vpop.eup %4385  ;;  %v2719_v60 = vmul.f32 1.442695, %v2712_v58 }
 0xf3d   : > { %v2727_v6 = vsel %vm1315_vm4, %v5535_v2, 0.0 }
 0xf3e   : > { %4387 = vpow2.f32 %v2719_v60  ;;  %2725 = vadd.xlane.f32.xlu2 %v2724_v4  ;;  %2728 = vadd.xlane.f32.xlu1 %v2727_v6  ;;  %v5559_v19 = vpop.f32.mrf.mxu2 }
 0xf3f   : > { %v3148_v22 = vsel %vm1315_vm4, %v5559_v19, -inf }
 0xf44   : > { %v5541_v10 = vpop.eup %4387 }
 0xf45   : > { %v2730_v26 = vsel %vm1325_vm5, %v5541_v10, 0.0 }
 0xf46   : > { %2731 = vadd.xlane.f32.xlu0 %v2730_v26  ;;  %3146 = vmax.xlane.f32.xlu1 %v3145_v41  ;;  %v5565_v59 = vpop.f32.mrf.mxu2 }
 0xf47   : > { %v3151_v23 = vsel %vm1325_vm5, %v5565_v59, -inf }
 0xf51   : > { %v2940_v12 = vpop.xlane.xlu0 %2939 }
 0xf52   : > { %v2950_v14 = vsub.f32 %v2926_v38, %v2940_v12 }
 0xf54   : > { %v2954_v25 = vmul.f32 1.442695, %v2950_v14 }
 0xf56   : > { %4389 = vpow2.f32 %v2954_v25  ;;  %2741 = vrot.lane.b32.xlu2 %v5364_v62, %s5967_s3  ;;  %s3823_s3 = scalar_lea.hbm %s5904_s20, %s4668_s17 }
 0xf57   : > { %s3827_s2 = sshll.u32 %s3823_s3, 4  ;;  %s3828_s2 = int_to_ptr.hbm [resolvable:$true] %s3827_s2 }
 0xf58   : > { %s4477_s5 = sshra.s32 %s3828_s2, 4  ;;  %s4478_s5 = int_to_ptr.hbm [resolvable:$true] %s4477_s5 }
 0xf59   : > { %v5561_v20 = vpop.xlane.xlu2 %2942  ;;  %p4484_p0 = scmp.lt.s32.totalorder %s4478_s5, %s5904_s20 }
 0xf5c   : > { %v5548_v46 = vpop.eup %4389 }
 0xf5d   : > { %v2962_v40 = vsel %vm1315_vm4, %v5548_v46, 0.0 }
 0xf5e   : > { %2963 = vadd.xlane.f32.xlu0 %v2962_v40 }
 0xf5f   : > { %3192 = vrot.lane.b32.xlu1 %v5374_v1, %s5968_s4 }
 0xf61   : > { %v2946_v0 = vpop.xlane.xlu1 %2945 }
 0xf62   : > { %v2952_v28 = vsub.f32 %v5507_v13, %v2946_v0 }
 0xf64   : > { %v4236_v15 = vpop.permute.xlu0 %4235  ;;  %v2958_v49 = vmul.f32 1.442695, %v2952_v28 }
 0xf65   : > { %v4237_v52 = vunpack.i.l.bf16 %v4236_v15  ;;  %v4238_v17 = vunpack.i.h.bf16 %v4236_v15 }
 0xf72   : > { %4240 = vrot.lane.b32.xlu0 %v5400_v5, %s5968_s4 }
 0xf79   : > { %v2748_v18 = vpop.permute.xlu1 %2747 }
 0xf7a   : > { %4079 = vmatpush.msk.msrb.mxu0 %vm1384_vm6, %v2748_v18 }
 0xf7c   : > { %2779 = vmatpush.msrb.mxu0 %v4237_v52 }
 0xf7e   : > { %2780 = vmatpush.msrb.mxu0 %v4238_v17 }
 0xf7f   : > { %3143 = vmax.xlane.f32.xlu2 %v3142_v11 }
 0xf9c   : > { %3149 = vmax.xlane.f32.xlu0 %v3148_v22 }
 0xfa1   : > { %v2723_v24 = vpop.xlane.xlu2 %2722 }
 0xfa2   : > { %4391 = vrcp.f32 %v2723_v24 }
 0xfa4   : > { %3152 = vmax.xlane.f32.xlu0 %v3151_v23 }
 0xfa8   : > { %v4392_v36 = vpop.eup %4391 }
 0xfa9   : > { %v5569_v29 = vpop.xlane.xlu2 %2948  ;;  %v2737_v38 = vmul.f32 %v4392_v36, %v5521_v31 }
 0xfaa   : > { %v2953_v0 = vsub.f32 %v5527_v56, %v5569_v29  ;;  %v2951_v56 = vsub.f32 %v5503_v42, %v5561_v20 }
 0xfac   : > { %v2960_v52 = vmul.f32 1.442695, %v2953_v0 }
 0xfb1   : > { %v2726_v21 = vpop.xlane.xlu2 %2725  ;;  %v2729_v33 = vpop.xlane.xlu1 %2728 }
 0xfb2   : > { %4393 = vrcp.f32 %v2726_v21 }
 0xfb8   : > { %4245 = vrot.lane.b32.xlu0 %v5400_v5, %s5969_s26  ;;  %v4394_v48 = vpop.eup %4393 }
 0xfb9   : > { %v2742_v9 = vpop.permute.xlu2 %2741  ;;  %v3147_v43 = vpop.xlane.xlu1 %3146  ;;  %v2738_v5 = vmul.f32 %v4394_v48, %v5533_v7 }
 0xfba   : > { %2781 = vmatpush.msrb.mxu0 %v2742_v9  ;;  %v3155_v44 = vsub.f32 %v3133_v8, %v3147_v43  ;;  %v2732_v50 = vpop.xlane.xlu0 %2731 }
 0xfbb   : > { %4080 = vmatmul.msk.f32.vlgmr.msrb.gmra.mxu0 %vm1315_vm4, %v2737_v38 }
 0xfbc   : > { %v3160_v47 = vmul.f32 1.442695, %v3155_v44 }
 0xfbe   : > { %4395 = vpow2.f32 %v3160_v47 }
 0xfbf   : > { %4397 = vrcp.f32 %v2729_v33 }
 0xfc0   : > { %3186 = vrot.lane.b32.xlu0 %v5364_v62, %s5968_s4  ;;  %4399 = vpow2.f32 %v2958_v49 }
 0xfc1   : > { %4401 = vrcp.f32 %v2732_v50 }
 0xfc3   : > { %4081 = vmatmul.msk.f32.gmra.mxu0 %vm1315_vm4, %v2738_v5 }
 0xfc4   : > { %v5580_v31 = vpop.eup %4395 }
 0xfc5   : > { %v4398_v51 = vpop.eup %4397  ;;  %v3169_v13 = vsel %vm1315_vm4, %v5580_v31, 0.0 }
 0xfc6   : > { %3170 = vadd.xlane.f32.xlu1 %v3169_v13  ;;  %v2739_v54 = vmul.f32 %v4398_v51, %v5535_v2  ;;  %v5587_v55 = vpop.eup %4399 }
 0xfc7   : > { %v4402_v57 = vpop.eup %4401  ;;  %v2968_v34 = vsel %vm1315_vm4, %v5587_v55, 0.0 }
 0xfc8   : > { %2982 = vrot.lane.b32.xlu0 %v5364_v62, %s5969_s26  ;;  %v2740_v63 = vmul.f32 %v4402_v57, %v5541_v10 }
 0xfcb   : > { %4082 = vmatmul.msk.f32.gmra.mxu0 %vm1315_vm4, %v2739_v54 }
 0xfce   : > { %2969 = vadd.xlane.f32.xlu1 %v2968_v34 }
 0xfd1   : > { %v3193_v61 = vpop.permute.xlu1 %3192  ;;  %v2964_v7 = vpop.xlane.xlu0 %2963 }
 0xfd2   : > { %4117 = vmatpush.msk.msra.mxu3 %vm1384_vm6, %v3193_v61 }
 0xfd3   : > { %4083 = vmatmul.msk.f32.gmra.mxu0 %vm1315_vm4, %v2740_v63 }
 0xfe4   : > { %v4241_v62 = vpop.permute.xlu0 %4240 }
 0xfe5   : > { %v4242_v58 = vunpack.i.l.bf16 %v4241_v62  ;;  %v4243_v2 = vunpack.i.h.bf16 %v4241_v62 }
 0xfe7   : > { %3224 = vmatpush.msra.mxu3 %v4242_v58 }
 0xfe9   : > { %3225 = vmatpush.msra.mxu3 %v4243_v2 }
 0xff2   : > { %v3144_v60 = vpop.xlane.xlu2 %3143 }
 0xff3   : > { %v3154_v4 = vsub.f32 %v5531_v35, %v3144_v60  ;;  %v4055_v35 = vld [vmem:[%s5958_s6 + $0x28] sm:$0xff] }
 0xff4   : > { %2822 = vmatpush.msrb.mxu1 %v4055_v35 }
 0xff5   : > { %v3158_v6 = vmul.f32 1.442695, %v3154_v4 }
 0xff7   : > { %4403 = vpow2.f32 %v3158_v6 }
 0xffd   : > { %v4404_v8 = vpop.eup %4403 }
 0xffe   : > { %v3166_v26 = vsel %vm1315_vm4, %v4404_v8, 0.0 }
 0xfff   : > { %3167 = vadd.xlane.f32.xlu2 %v3166_v26  ;;  %v4057_v26 = vld [vmem:[%s5958_s6 + $0x38] sm:$0xff] }
0x100f   : > { %v3150_v10 = vpop.xlane.xlu0 %3149 }
0x1010   : > { %v3156_v41 = vsub.f32 %v5559_v19, %v3150_v10 }
0x1012   : > { %v3162_v12 = vmul.f32 1.442695, %v3156_v41 }
0x1014   : > { %4405 = vpow2.f32 %v3162_v12 }
0x1017   : > { %2988 = vrot.lane.b32.xlu2 %v5374_v1, %s5969_s26  ;;  %v3153_v14 = vpop.xlane.xlu0 %3152 }
0x1018   : > { %v3157_v25 = vsub.f32 %v5565_v59, %v3153_v14  ;;  %v2956_v59 = vmul.f32 1.442695, %v2951_v56 }
0x101a   : > { %v4406_v40 = vpop.eup %4405  ;;  %v3164_v15 = vmul.f32 1.442695, %v3157_v25 }
0x101b   : > { %v3172_v18 = vsel %vm1315_vm4, %v4406_v40, 0.0 }
0x101c   : > { %4407 = vpow2.f32 %v3164_v15  ;;  %3173 = vadd.xlane.f32.xlu0 %v3172_v18 }
0x101d   : > { %4409 = vpow2.f32 %v2960_v52 }
0x101e   : > { %4411 = vpow2.f32 %v2956_v59 }
0x1022   : > { %v4408_v17 = vpop.eup %4407 }
0x1023   : > { %v3175_v1 = vsel %vm1325_vm5, %v4408_v17, 0.0  ;;  %v5608_v11 = vpop.eup %4409 }
0x1024   : > { %3176 = vadd.xlane.f32.xlu1 %v3175_v1  ;;  %v2971_v22 = vsel %vm1325_vm5, %v5608_v11, 0.0  ;;  %v4412_v29 = vpop.eup %4411 }
0x1025   : > { %v2965_v21 = vsel %vm1315_vm4, %v4412_v29, 0.0 }
0x102a   : > { %v4246_v19 = vpop.permute.xlu0 %4245 }
0x102b   : > { %v4247_v28 = vunpack.i.l.bf16 %v4246_v19  ;;  %v4248_v48 = vunpack.i.h.bf16 %v4246_v19  ;;  %v4258_v19 = vld [vmem:[%s5891_s7 + $0x1] ss:$0 sm:$0xff] }
0x102c   : > { %2972 = vadd.xlane.f32.xlu1 %v2971_v22 }
0x1032   : > { %v3187_v24 = vpop.permute.xlu0 %3186 }
0x1033   : > { %3226 = vmatpush.msra.mxu3 %v3187_v24 }
0x1038   : > { %v2783_v23 = vpop.f32.mrf.mxu0 }
0x1039   : > { %4084 = vmatmul.msk.f32.vlgmr.msrb.gmra.mxu1 %vm1269_vm1, %v2783_v23  ;;  %v3171_v20 = vpop.xlane.xlu1 %3170 }
0x103a   : > { %v2983_v50 = vpop.permute.xlu0 %2982 }
0x1040   : > { %v2786_v33 = vpop.f32.mrf.mxu0  ;;  %2966 = vadd.xlane.f32.xlu2 %v2965_v21 }
0x1041   : > { %4085 = vmatmul.msk.f32.gmra.mxu1 %vm1269_vm1, %v2786_v33  ;;  %v2970_v13 = vpop.xlane.xlu1 %2969 }
0x1048   : > { %v2789_v36 = vpop.f32.mrf.mxu0 }
0x1049   : > { %4086 = vmatmul.msk.f32.gmra.mxu1 %vm1269_vm1, %v2789_v36 }
0x1050   : > { %v2792_v38 = vpop.f32.mrf.mxu0 }
0x1051   : > { %4087 = vmatmul.msk.f32.gmra.mxu1 %vm1269_vm1, %v2792_v38 }
0x1072   : > { %v3168_v42 = vpop.xlane.xlu2 %3167 }
0x1073   : > { %4413 = vrcp.f32 %v3168_v42 }
0x1074   : > { %4415 = vrcp.f32 %v2964_v7 }
0x1075   : > { %4417 = vrcp.f32 %v3171_v20 }
0x1079   : > { %v4414_v9 = vpop.eup %4413 }
0x107a   : > { %v3182_v43 = vmul.f32 %v4414_v9, %v4404_v8  ;;  %v2989_v44 = vpop.permute.xlu2 %2988  ;;  %v4416_v47 = vpop.eup %4415  ;;  %v4056_v8 = vld [vmem:[%s5958_s6 + $0x30] sm:$0xff]  ;;  %s4479_s6 = scalar_lea.hbm %s4478_s5, 1 }
0x107b   : > { %4100 = vmatpush.msk.msra.mxu0 %vm1384_vm6, %v2989_v44  ;;  %v4418_v49 = vpop.eup %4417  ;;  %v2978_v5 = vmul.f32 %v4416_v47, %v5548_v46  ;;  %3063 = vmatpush.msra.mxu1 %v4056_v8  ;;  %p4480_p11 = scmp.ne.s32.totalorder %s4478_s5, %s4479_s6  ;;  %p4485_p1 = scmp.lt.s32.totalorder %s4483_s0, %s4479_s6 }
0x107c   : > { %4118 = vmatmul.msk.f32.vlgmr.msra.gmra.mxu3 %vm1315_vm4, %v3182_v43  ;;  %v3183_v51 = vmul.f32 %v4418_v49, %v5580_v31 }
0x107d   : > { %3020 = vmatpush.msra.mxu0 %v4247_v28  ;;  %p4481_p12 = pnand %p4480_p11, %p4685_p5  ;;  %p4486_p2 = por %p4485_p1, %p4484_p0 }
0x107f   : > { %3021 = vmatpush.msra.mxu0 %v4248_v48  ;;  %p4482_p13 = pneg %p4481_p12 }
0x1081   : > { %3022 = vmatpush.msra.mxu0 %v2983_v50  ;;  %p4487_p3 = pnand %p4486_p2, %p4482_p13 }
0x1082   : > { %4101 = vmatmul.msk.f32.vlgmr.msra.gmra.mxu0 %vm1315_vm4, %v2978_v5 }
0x1083   : > { %3267 = vmatpush.msrb.mxu0 %v4057_v26 }
0x1084   : > { %4119 = vmatmul.msk.f32.gmra.mxu3 %vm1315_vm4, %v3183_v51 }
0x108f   : > { %v3174_v54 = vpop.xlane.xlu0 %3173 }
0x1090   : > { %4419 = vrcp.f32 %v3174_v54 }
0x1096   : > { %v4420_v57 = vpop.eup %4419 }
0x1097   : > { %v3177_v34 = vpop.xlane.xlu1 %3176  ;;  %v3184_v61 = vmul.f32 %v4420_v57, %v4406_v40 }
0x1098   : > { %4421 = vrcp.f32 %v3177_v34 }
0x1099   : > { %4120 = vmatmul.msk.f32.gmra.mxu3 %vm1315_vm4, %v3184_v61 }
0x109e   : > { %v4422_v63 = vpop.eup %4421 }
0x109f   : > { %v3185_v7 = vmul.f32 %v4422_v63, %v4408_v17  ;;  %v2973_v58 = vpop.xlane.xlu1 %2972 }
0x10a1   : > { %4121 = vmatmul.msk.f32.gmra.mxu3 %vm1315_vm4, %v3185_v7 }
0x10b3   : > { %v2967_v46 = vpop.xlane.xlu2 %2966 }
0x10b4   : > { %4423 = vrcp.f32 %v2967_v46 }
0x10b5   : > { %4425 = vrcp.f32 %v2970_v13 }
0x10b6   : > { %4427 = vrcp.f32 %v2973_v58  ;;  %v2824_v0 = vpop.f32.mrf.mxu1 }
0x10b7   : > { %v2866_v17 = vadd.f32 %v5515_v37, %v2824_v0 }
0x10ba   : > { %v4424_v62 = vpop.eup %4423 }
0x10bb   : > { %v2979_v31 = vmul.f32 %v4424_v62, %v4412_v29  ;;  %v4426_v2 = vpop.eup %4425 }
0x10bc   : > { %v2980_v60 = vmul.f32 %v4426_v2, %v5587_v55  ;;  %v4428_v4 = vpop.eup %4427 }
0x10bd   : > { %4102 = vmatmul.msk.f32.gmra.mxu0 %vm1315_vm4, %v2979_v31  ;;  %v2981_v6 = vmul.f32 %v4428_v4, %v5608_v11 }
0x10be   : > { %v2827_v15 = vpop.f32.mrf.mxu1 }
0x10bf   : > { %v2869_v29 = vadd.f32 %v5517_v45, %v2827_v15 }
0x10c5   : > { %4103 = vmatmul.msk.f32.gmra.mxu0 %vm1315_vm4, %v2980_v60 }
0x10c6   : > { %v2830_v18 = vpop.f32.mrf.mxu1 }
0x10c7   : > { %v2872_v42 = vadd.f32 %v5519_v27, %v2830_v18 }
0x10cd   : > { %4104 = vmatmul.msk.f32.gmra.mxu0 %vm1315_vm4, %v2981_v6 }
0x10ce   : > { %v2833_v52 = vpop.f32.mrf.mxu1 }
0x10cf   : > { %v2875_v48 = vadd.f32 %v5525_v53, %v2833_v52 }
0x10ff   : > { %v3024_v10 = vpop.f32.mrf.mxu0  ;;  %v3228_v41 = vpop.f32.mrf.mxu3 }
0x1100   : > { %4105 = vmatmul.msk.f32.vlgmr.msra.gmra.mxu1 %vm1269_vm1, %v3024_v10  ;;  %4122 = vmatmul.msk.f32.vlgmr.msrb.gmra.mxu0 %vm1269_vm1, %v3228_v41 }
0x1107   : > { %v3231_v55 = vpop.f32.mrf.mxu3 }
0x1108   : > { %4123 = vmatmul.msk.f32.gmra.mxu0 %vm1269_vm1, %v3231_v55  ;;  %v4132_v55 = vld [vmem:[%s5894_s10 + $0x38] sm:$0xff] }
0x1109   : > { %3438 = vmatpush.msrb.mxu1 %v4132_v55  ;;  %v4140_v55 = vld [vmem:[%s5896_s12 + $0x50] sm:$0xff] }
0x111c   : > { %v3234_v12 = vpop.f32.mrf.mxu3 }
0x111d   : > { %4124 = vmatmul.msk.f32.gmra.mxu0 %vm1269_vm1, %v3234_v12  ;;  %v4131_v12 = vld [vmem:[%s5894_s10 + $0x30] sm:$0xff] }
0x111e   : > { %3439 = vmatpush.msrb.mxu1 %v4131_v12  ;;  %v4139_v12 = vld [vmem:[%s5896_s12 + $0x48] sm:$0xff] }
0x1124   : > { %v3237_v14 = vpop.f32.mrf.mxu3 }
0x1125   : > { %4125 = vmatmul.msk.f32.gmra.mxu0 %vm1269_vm1, %v3237_v14  ;;  %v4130_v14 = vld [vmem:[%s5894_s10 + $0x28] sm:$0xff] }
0x1126   : > { %3440 = vmatpush.msrb.mxu1 %v4130_v14  ;;  %v4138_v14 = vld [vmem:[%s5896_s12 + $0x40] sm:$0xff] }
0x113a   : > { %v3027_v25 = vpop.f32.mrf.mxu0 }
0x113b   : > { %4106 = vmatmul.msk.f32.gmra.mxu1 %vm1269_vm1, %v3027_v25  ;;  %v4129_v25 = vld [vmem:[%s5894_s10 + $0x20] sm:$0xff] }
0x113c   : > { %3441 = vmatpush.msrb.mxu1 %v4129_v25  ;;  %v4261_v25 = vld [vmem:[%s5895_s11 + $0x1] ss:$0 sm:$0xff] }
0x1142   : > { %v3030_v35 = vpop.f32.mrf.mxu0 }
0x1143   : > { %4107 = vmatmul.msk.f32.gmra.mxu1 %vm1269_vm1, %v3030_v35 }
0x114a   : > { %v3033_v40 = vpop.f32.mrf.mxu0 }
0x114b   : > { %4108 = vmatmul.msk.f32.gmra.mxu1 %vm1269_vm1, %v3033_v40 }
0x117d   : > { %v3065_v1 = vpop.f32.mrf.mxu1  ;;  %v3269_v22 = vpop.f32.mrf.mxu0 }
0x117e   : > { %v3077_v11 = vadd.f32 %v3065_v1, %v2866_v17 }
0x1180   : > { %v3281_v56 = vadd.f32 %v3269_v22, %v3077_v11 }
0x1182   : > { %v3290_v59 = vadd.f32 %v4258_v19, %v3281_v56  ;;  %v4260_v56 = vld [vmem:[%s5893_s9 + $0x1] ss:$0 sm:$0xff] }
0x1184   : > { %v3294_v24 = vadd.f32 %v3290_v59, %v5292_v16 }
0x1185   : > { %v3272_v21 = vpop.f32.mrf.mxu0 }
0x1186   : > { %v3302_v23 = vsel %vm1097_vm2, %v3294_v24, 0.0 }
0x1187   : > { %3303 = vadd.xlane.f32.xlu2 %v3302_v23 }
0x119a   : > { %v3275_v9 = vpop.f32.mrf.mxu0 }
0x11a2   : > { %v3278_v51 = vpop.f32.mrf.mxu0 }
0x11b8   : > { %v3068_v33 = vpop.f32.mrf.mxu1 }
0x11b9   : > { %v3078_v36 = vadd.f32 %v3068_v33, %v2869_v29 }
0x11bb   : > { %v3282_v37 = vadd.f32 %v3272_v21, %v3078_v36 }
0x11bd   : > { %v3291_v38 = vadd.f32 %v4258_v19, %v3282_v37 }
0x11bf   : > { %v3295_v20 = vadd.f32 %v3291_v38, %v5297_v32 }
0x11c0   : > { %v3071_v43 = vpop.f32.mrf.mxu1 }
0x11c1   : > { %v3079_v44 = vadd.f32 %v3071_v43, %v2872_v42  ;;  %v3305_v28 = vsel %vm1097_vm2, %v3295_v20, 0.0 }
0x11c2   : > { %3306 = vadd.xlane.f32.xlu1 %v3305_v28 }
0x11c3   : > { %v3283_v16 = vadd.f32 %v3275_v9, %v3079_v44 }
0x11c5   : > { %v3292_v47 = vadd.f32 %v4258_v19, %v3283_v16 }
0x11c7   : > { %v3296_v45 = vadd.f32 %v3292_v47, %v5302_v39 }
0x11c8   : > { %v3074_v49 = vpop.f32.mrf.mxu1 }
0x11c9   : > { %v3080_v5 = vadd.f32 %v3074_v49, %v2875_v48  ;;  %v3308_v50 = vsel %vm1097_vm2, %v3296_v45, 0.0 }
0x11ca   : > { %3309 = vadd.xlane.f32.xlu2 %v3308_v50 }
0x11cb   : > { %v3284_v27 = vadd.f32 %v3278_v51, %v3080_v5 }
0x11cd   : > { %v3293_v32 = vadd.f32 %v4258_v19, %v3284_v27  ;;  %v4259_v19 = vld [vmem:[%s5892_s8 + $0x1] ss:$0 sm:$0xff] }
0x11cf   : > { %v3297_v13 = vadd.f32 %v3293_v32, %v5307_v30 }
0x11d1   : > { %v3311_v54 = vsel %vm1107_vm3, %v3297_v13, 0.0 }
0x11d2   : > { %3312 = vadd.xlane.f32.xlu0 %v3311_v54 }
0x11fa   : > { %v3304_v57 = vpop.xlane.xlu2 %3303 }
0x11fb   : > { %v3314_v34 = vmul.f32 %v3304_v57, %v4823_v3 }
0x11fd   : > { %v3318_v61 = vsub.f32 %v3294_v24, %v3314_v34 }
0x11ff   : > { %v3322_v53 = vmul.f32 %v3318_v61, %v3318_v61 }
0x1201   : > { %v3326_v39 = vsel %vm1097_vm2, %v3322_v53, 0.0 }
0x1202   : > { %3327 = vadd.xlane.f32.xlu1 %v3326_v39 }
0x1235   : > { %v3307_v63 = vpop.xlane.xlu1 %3306 }
0x1236   : > { %v3315_v7 = vmul.f32 %v3307_v63, %v4823_v3 }
0x1238   : > { %v5664_v46 = vsub.f32 %v3295_v20, %v3315_v7 }
0x123a   : > { %v3323_v62 = vmul.f32 %v5664_v46, %v5664_v46 }
0x123c   : > { %v3329_v30 = vsel %vm1097_vm2, %v3323_v62, 0.0 }
0x123d   : > { %3330 = vadd.xlane.f32.xlu2 %v3329_v30  ;;  %v3310_v31 = vpop.xlane.xlu2 %3309 }
0x123e   : > { %v3316_v58 = vmul.f32 %v3310_v31, %v4823_v3 }
0x1240   : > { %v5670_v2 = vsub.f32 %v3296_v45, %v3316_v58 }
0x1242   : > { %v3324_v60 = vmul.f32 %v5670_v2, %v5670_v2 }
0x1244   : > { %v3332_v4 = vsel %vm1097_vm2, %v3324_v60, 0.0 }
0x1245   : > { %v3313_v6 = vpop.xlane.xlu0 %3312  ;;  %3333 = vadd.xlane.f32.xlu0 %v3332_v4 }
0x1246   : > { %v3317_v8 = vmul.f32 %v3313_v6, %v4823_v3 }
0x1248   : > { %v5676_v26 = vsub.f32 %v3297_v13, %v3317_v8  ;;  %v4144_v8 = vld [vmem:[%s5896_s12 + $0x70] sm:$0xff] }
0x124a   : > { %v3325_v10 = vmul.f32 %v5676_v26, %v5676_v26 }
0x124c   : > { %v3335_v41 = vsel %vm1107_vm3, %v3325_v10, 0.0  ;;  %v4142_v10 = vld [vmem:[%s5896_s12 + $0x60] sm:$0xff] }
0x124d   : > { %3336 = vadd.xlane.f32.xlu1 %v3335_v41  ;;  %v4141_v41 = vld [vmem:[%s5896_s12 + $0x58] sm:$0xff] }
0x1275   : > { %v3328_v35 = vpop.xlane.xlu1 %3327 }
0x1276   : > { %v3338_v40 = vmul.f32 %v3328_v35, %v4823_v3 }
0x1278   : > { %v3342_v0 = vadd.f32 1e-05, %v3338_v40 }
0x127a   : > { %4429 = vrsqrt.f32 %v3342_v0  ;;  %vm3352_vm5 = vweird.f32 %v3342_v0 }
0x1280   : > { %v4430_v15 = vpop.eup %4429 }
0x1281   : > { %v3347_v18 = vmul.f32 %v4430_v15, %v3342_v0  ;;  %vm3353_vm1 = vweird.f32 %v4430_v15 }
0x1282   : > { %vm3354_vm13 = vmor %vm3352_vm5, %vm3353_vm1 }
0x1283   : > { %v3348_v52 = vmul.f32 %v4430_v15, %v3347_v18 }
0x1285   : > { %v3349_v17 = vmul.f32 0.5, %v3348_v52 }
0x1287   : > { %v3350_v1 = vsub.f32 1.5, %v3349_v17 }
0x1289   : > { %v3351_v11 = vmul.f32 %v4430_v15, %v3350_v1 }
0x128b   : > { %v3355_v22 = vsel %vm3354_vm13, %v4430_v15, %v3351_v11 }
0x128c   : > { %v3386_v59 = vmul.f32 %v3355_v22, %v3318_v61 }
0x128e   : > { %v3393_v24 = vmul.f32 %v4259_v19, %v3386_v59 }
0x1290   : > { %v5700_v23 = vadd.f32 %v4260_v56, %v3393_v24 }
0x1292   : > { %4134 = vmatmul.msk.f32.vlgmr.msrb.gmra.mxu1 %vm1097_vm2, %v5700_v23 }
0x12b0   : > { %v3331_v29 = vpop.xlane.xlu2 %3330 }
0x12b1   : > { %v3339_v21 = vmul.f32 %v3331_v29, %v4823_v3 }
0x12b3   : > { %v3343_v33 = vadd.f32 1e-05, %v3339_v21 }
0x12b5   : > { %4431 = vrsqrt.f32 %v3343_v33  ;;  %vm3362_vm15 = vweird.f32 %v3343_v33 }
0x12b8   : > { %v3334_v36 = vpop.xlane.xlu0 %3333 }
0x12b9   : > { %v3340_v37 = vmul.f32 %v3334_v36, %v4823_v3 }
0x12bb   : > { %v4432_v38 = vpop.eup %4431  ;;  %v3344_v42 = vadd.f32 1e-05, %v3340_v37 }
0x12bc   : > { %v3357_v20 = vmul.f32 %v4432_v38, %v3343_v33  ;;  %vm3363_vm14 = vweird.f32 %v4432_v38 }
0x12bd   : > { %4433 = vrsqrt.f32 %v3344_v42  ;;  %vm3364_vm0 = vmor %vm3362_vm15, %vm3363_vm14  ;;  %vm3372_vm8 = vweird.f32 %v3344_v42 }
0x12be   : > { %v3358_v9 = vmul.f32 %v4432_v38, %v3357_v20 }
0x12c0   : > { %v3359_v43 = vmul.f32 0.5, %v3358_v9  ;;  %v3337_v44 = vpop.xlane.xlu1 %3336 }
0x12c1   : > { %v3341_v28 = vmul.f32 %v3337_v44, %v4823_v3 }
0x12c2   : > { %v3360_v16 = vsub.f32 1.5, %v3359_v43 }
0x12c3   : > { %v4434_v47 = vpop.eup %4433  ;;  %v3345_v48 = vadd.f32 1e-05, %v3341_v28 }
0x12c4   : > { %v3361_v45 = vmul.f32 %v4432_v38, %v3360_v16  ;;  %v3367_v49 = vmul.f32 %v4434_v47, %v3344_v42  ;;  %vm3373_vm7 = vweird.f32 %v4434_v47 }
0x12c5   : > { %4435 = vrsqrt.f32 %v3345_v48  ;;  %vm3374_vm10 = vmor %vm3372_vm8, %vm3373_vm7  ;;  %vm3382_vm12 = vweird.f32 %v3345_v48 }
0x12c6   : > { %v3365_v5 = vsel %vm3364_vm0, %v4432_v38, %v3361_v45  ;;  %v3368_v50 = vmul.f32 %v4434_v47, %v3367_v49 }
0x12c7   : > { %v3387_v51 = vmul.f32 %v3365_v5, %v5664_v46 }
0x12c8   : > { %v3369_v27 = vmul.f32 0.5, %v3368_v50 }
0x12c9   : > { %v3394_v32 = vmul.f32 %v4259_v19, %v3387_v51 }
0x12ca   : > { %v3370_v13 = vsub.f32 1.5, %v3369_v27 }
0x12cb   : > { %v4436_v54 = vpop.eup %4435  ;;  %v5708_v57 = vadd.f32 %v4260_v56, %v3394_v32 }
0x12cc   : > { %v3371_v34 = vmul.f32 %v4434_v47, %v3370_v13  ;;  %v3377_v61 = vmul.f32 %v4436_v54, %v3345_v48  ;;  %vm3383_vm11 = vweird.f32 %v4436_v54 }
0x12cd   : > { %4135 = vmatmul.msk.f32.gmra.mxu1 %vm1097_vm2, %v5708_v57  ;;  %vm3384_vm1 = vmor %vm3382_vm12, %vm3383_vm11 }
0x12ce   : > { %v3375_v53 = vsel %vm3374_vm10, %v4434_v47, %v3371_v34  ;;  %v3378_v39 = vmul.f32 %v4436_v54, %v3377_v61 }
0x12cf   : > { %v3388_v63 = vmul.f32 %v3375_v53, %v5670_v2  ;;  %v4145_v2 = vld [vmem:[%s5896_s12 + $0x78] sm:$0xff] }
0x12d0   : > { %v3379_v7 = vmul.f32 0.5, %v3378_v39  ;;  %3525 = vmatpush.msrb.mxu2 %v4145_v2 }
0x12d1   : > { %v3395_v46 = vmul.f32 %v4259_v19, %v3388_v63 }
0x12d2   : > { %v3380_v62 = vsub.f32 1.5, %v3379_v7  ;;  %3526 = vmatpush.msrb.mxu2 %v4144_v8 }
0x12d3   : > { %v5713_v30 = vadd.f32 %v4260_v56, %v3395_v46  ;;  %v4262_v46 = vld [vmem:[%s5897_s13 + $0x1] ss:$0 sm:$0xff] }
0x12d4   : > { %v3381_v31 = vmul.f32 %v4436_v54, %v3380_v62 }
0x12d5   : > { %4136 = vmatmul.msk.f32.gmra.mxu1 %vm1097_vm2, %v5713_v30 }
0x12d6   : > { %v3385_v58 = vsel %vm3384_vm1, %v4436_v54, %v3381_v31 }
0x12d7   : > { %v3389_v60 = vmul.f32 %v3385_v58, %v5676_v26  ;;  %v4143_v26 = vld [vmem:[%s5896_s12 + $0x68] sm:$0xff] }
0x12d8   : > { %3527 = vmatpush.msrb.mxu2 %v4143_v26 }
0x12d9   : > { %v3396_v4 = vmul.f32 %v4259_v19, %v3389_v60 }
0x12da   : > { %3528 = vmatpush.msrb.mxu2 %v4142_v10 }
0x12db   : > { %v5718_v6 = vadd.f32 %v4260_v56, %v3396_v4 }
0x12dc   : > { %3529 = vmatpush.msrb.mxu2 %v4141_v41 }
0x12dd   : > { %4137 = vmatmul.msk.f32.gmra.mxu1 %vm1097_vm2, %v5718_v6 }
0x12de   : > { %3530 = vmatpush.msrb.mxu2 %v4140_v55 }
0x12e0   : > { %3531 = vmatpush.msrb.mxu2 %v4139_v12 }
0x12e2   : > { %3532 = vmatpush.msrb.mxu2 %v4138_v14 }
0x130f   : > { %v3443_v35 = vpop.f32.mrf.mxu1 }
0x1310   : > { %v3444_v40 = vadd.f32 %v4261_v25, %v3443_v35 }
0x1312   : > { %v3455_v0 = vmul.f32 %v3444_v40, %v3444_v40 }
0x1314   : > { %v3459_v15 = vmul.f32 %v3455_v0, %v3444_v40 }
0x1316   : > { %v3463_v18 = vmul.f32 0.044715, %v3459_v15 }
0x1318   : > { %v3467_v52 = vadd.f32 %v3463_v18, %v3444_v40 }
0x131a   : > { %v3471_v17 = vmul.f32 0.7978846, %v3467_v52 }
0x131c   : > { %4437 = vtanh.f32 %v3471_v17 }
0x1322   : > { %v4438_v1 = vpop.eup %4437 }
0x1323   : > { %v3479_v11 = vadd.f32 1.0, %v4438_v1 }
0x1325   : > { %v3483_v19 = vmul.f32 0.5, %v3479_v11 }
0x1327   : > { %v3487_v22 = vmul.f32 %v3483_v19, %v3444_v40 }
0x1329   : > { %4147 = vmatmul.msk.f32.vlgmr.msrb.gmra.mxu2 %vm2278_vm9, %v3487_v22 }
0x134a   : > { %v3446_v56 = vpop.f32.mrf.mxu1 }
0x134b   : > { %v3447_v59 = vadd.f32 %v4261_v25, %v3446_v56 }
0x134d   : > { %v3456_v24 = vmul.f32 %v3447_v59, %v3447_v59 }
0x134f   : > { %v3460_v29 = vmul.f32 %v3456_v24, %v3447_v59 }
0x1351   : > { %v3464_v21 = vmul.f32 0.044715, %v3460_v29 }
0x1352   : > { %v3449_v33 = vpop.f32.mrf.mxu1 }
0x1353   : > { %v3468_v36 = vadd.f32 %v3464_v21, %v3447_v59  ;;  %v3450_v37 = vadd.f32 %v4261_v25, %v3449_v33 }
0x1355   : > { %v3472_v38 = vmul.f32 0.7978846, %v3468_v36  ;;  %v3457_v42 = vmul.f32 %v3450_v37, %v3450_v37 }
0x1357   : > { %4439 = vtanh.f32 %v3472_v38  ;;  %v3461_v20 = vmul.f32 %v3457_v42, %v3450_v37 }
0x1359   : > { %v3465_v9 = vmul.f32 0.044715, %v3461_v20 }
0x135a   : > { %v3452_v43 = vpop.f32.mrf.mxu1 }
0x135b   : > { %v3469_v44 = vadd.f32 %v3465_v9, %v3450_v37  ;;  %v3453_v28 = vadd.f32 %v4261_v25, %v3452_v43 }
0x135d   : > { %v4440_v16 = vpop.eup %4439  ;;  %v3473_v47 = vmul.f32 0.7978846, %v3469_v44  ;;  %v3458_v48 = vmul.f32 %v3453_v28, %v3453_v28 }
0x135e   : > { %v3480_v45 = vadd.f32 1.0, %v4440_v16 }
0x135f   : > { %4441 = vtanh.f32 %v3473_v47  ;;  %v3462_v49 = vmul.f32 %v3458_v48, %v3453_v28  ;;  %v5788_v47 = vld [vmem:[%s5898_s14] ss:$0 sm:$0xff] }
0x1360   : > { %v3484_v5 = vmul.f32 0.5, %v3480_v45 }
0x1361   : > { %v3466_v50 = vmul.f32 0.044715, %v3462_v49  ;;  %v5793_v49 = vld [vmem:[%s5899_s15] ss:$0 sm:$0xff] }
0x1362   : > { %v3488_v51 = vmul.f32 %v3484_v5, %v3447_v59 }
0x1363   : > { %v3470_v27 = vadd.f32 %v3466_v50, %v3453_v28  ;;  %v5799_v50 = vld [vmem:[%s5900_s16] ss:$0 sm:$0xff] }
0x1364   : > { %4148 = vmatmul.msk.f32.gmra.mxu2 %vm2278_vm9, %v3488_v51 }
0x1365   : > { %v4442_v32 = vpop.eup %4441  ;;  %v3474_v13 = vmul.f32 0.7978846, %v3470_v27 }
0x1366   : > { %v3481_v54 = vadd.f32 1.0, %v4442_v32 }
0x1367   : > { %4443 = vtanh.f32 %v3474_v13 }
0x1368   : > { %v3485_v34 = vmul.f32 0.5, %v3481_v54 }
0x136a   : > { %v3489_v61 = vmul.f32 %v3485_v34, %v3450_v37 }
0x136c   : > { %4149 = vmatmul.msk.f32.gmra.mxu2 %vm2278_vm9, %v3489_v61 }
0x136d   : > { %v4444_v53 = vpop.eup %4443 }
0x136e   : > { %v3482_v39 = vadd.f32 1.0, %v4444_v53 }
0x1370   : > { %v3486_v63 = vmul.f32 0.5, %v3482_v39 }
0x1372   : > { %v3490_v7 = vmul.f32 %v3486_v63, %v3453_v28 }
0x1374   : > { %4150 = vmatmul.msk.f32.gmra.mxu2 %vm2278_vm9, %v3490_v7 }
0x13ac   : > { %v3534_v62 = vpop.f32.mrf.mxu2 }
0x13ad   : > { %v3535_v31 = vadd.f32 %v4262_v46, %v3534_v62 }
0x13af   : > { %v3546_v58 = vadd.f32 %v3535_v31, %v5700_v23 }
0x13b1   : > { %v3552_v60 = vsel %vm1097_vm2, %v3546_v58, 0.0 }
0x13b2   : > { %3553 = vadd.xlane.f32.xlu2 %v3552_v60 }
0x13e7   : > { %v3537_v4 = vpop.f32.mrf.mxu2 }
0x13e8   : > { %v3538_v2 = vadd.f32 %v4262_v46, %v3537_v4 }
0x13ea   : > { %v3547_v8 = vadd.f32 %v3538_v2, %v5708_v57 }
0x13ec   : > { %v3555_v26 = vsel %vm1097_vm2, %v3547_v8, 0.0 }
0x13ed   : > { %3556 = vadd.xlane.f32.xlu0 %v3555_v26 }
0x13ef   : > { %v3540_v10 = vpop.f32.mrf.mxu2 }
0x13f0   : > { %v3541_v41 = vadd.f32 %v4262_v46, %v3540_v10 }
0x13f2   : > { %v3548_v55 = vadd.f32 %v3541_v41, %v5713_v30 }
0x13f4   : > { %v3558_v12 = vsel %vm1097_vm2, %v3548_v55, 0.0 }
0x13f5   : > { %3559 = vadd.xlane.f32.xlu1 %v3558_v12 }
0x13f7   : > { %v3543_v14 = vpop.f32.mrf.mxu2 }
0x13f8   : > { %v3544_v25 = vadd.f32 %v4262_v46, %v3543_v14 }
0x13fa   : > { %v3549_v23 = vadd.f32 %v3544_v25, %v5718_v6 }
0x13fc   : > { %v3561_v35 = vsel %vm1107_vm3, %v3549_v23, 0.0 }
0x13fd   : > { %3562 = vadd.xlane.f32.xlu2 %v3561_v35 }
0x1425   : > { %v3554_v40 = vpop.xlane.xlu2 %3553 }
0x1426   : > { %v3564_v57 = vmul.f32 %v3554_v40, %v4823_v3 }
0x1428   : > { %v3568_v0 = vsub.f32 %v3546_v58, %v3564_v57 }
0x142a   : > { %v3572_v15 = vmul.f32 %v3568_v0, %v3568_v0 }
0x142c   : > { %v3576_v18 = vsel %vm1097_vm2, %v3572_v15, 0.0 }
0x142d   : > { %3577 = vadd.xlane.f32.xlu0 %v3576_v18 }
0x1460   : > { %v3557_v52 = vpop.xlane.xlu0 %3556 }
0x1461   : > { %v3565_v30 = vmul.f32 %v3557_v52, %v4823_v3 }
0x1463   : > { %v5767_v17 = vsub.f32 %v3547_v8, %v3565_v30 }
0x1465   : > { %v3573_v1 = vmul.f32 %v5767_v17, %v5767_v17 }
0x1467   : > { %v3579_v6 = vsel %vm1097_vm2, %v3573_v1, 0.0 }
0x1468   : > { %v3560_v11 = vpop.xlane.xlu1 %3559  ;;  %3580 = vadd.xlane.f32.xlu1 %v3579_v6 }
0x1469   : > { %v3566_v19 = vmul.f32 %v3560_v11, %v4823_v3 }
0x146b   : > { %v5773_v22 = vsub.f32 %v3548_v55, %v3566_v19 }
0x146d   : > { %v3574_v56 = vmul.f32 %v5773_v22, %v5773_v22 }
0x146f   : > { %v3582_v59 = vsel %vm1097_vm2, %v3574_v56, 0.0 }
0x1470   : > { %3583 = vadd.xlane.f32.xlu2 %v3582_v59  ;;  %v3563_v24 = vpop.xlane.xlu2 %3562 }
0x1471   : > { %v3567_v29 = vmul.f32 %v3563_v24, %v4823_v3 }
0x1473   : > { %v5779_v21 = vsub.f32 %v3549_v23, %v3567_v29 }
0x1475   : > { %v3575_v33 = vmul.f32 %v5779_v21, %v5779_v21 }
0x1477   : > { %v3585_v36 = vsel %vm1107_vm3, %v3575_v33, 0.0 }
0x1478   : > { %3586 = vadd.xlane.f32.xlu0 %v3585_v36 }
0x14a0   : > { %v3578_v37 = vpop.xlane.xlu0 %3577 }
0x14a1   : > { %v3588_v38 = vmul.f32 %v3578_v37, %v4823_v3 }
0x14a3   : > { %v3592_v42 = vadd.f32 1e-05, %v3588_v38  ;;  %v4266_v38 = vld [vmem:[#allocation2] ss:$0 sm:$0xff] }
0x14a5   : > { %4445 = vrsqrt.f32 %v3592_v42  ;;  %vm3602_vm5 = vweird.f32 %v3592_v42 }
0x14ab   : > { %v4446_v20 = vpop.eup %4445 }
0x14ac   : > { %v3597_v9 = vmul.f32 %v4446_v20, %v3592_v42  ;;  %vm3603_vm9 = vweird.f32 %v4446_v20 }
0x14ad   : > { %vm3604_vm13 = vmor %vm3602_vm5, %vm3603_vm9  ;;  %vm3682_vm9 = vcmask 7168   ;;  %vm3686_vm5 = vcmask 0  }
0x14ae   : > { %v3598_v43 = vmul.f32 %v4446_v20, %v3597_v9 }
0x14b0   : > { %v3599_v44 = vmul.f32 0.5, %v3598_v43 }
0x14b2   : > { %v3600_v28 = vsub.f32 1.5, %v3599_v44 }
0x14b4   : > { %v3601_v16 = vmul.f32 %v4446_v20, %v3600_v28 }
0x14b6   : > { %v3605_v48 = vsel %vm3604_vm13, %v4446_v20, %v3601_v16 }
0x14b7   : > { %v3636_v45 = vmul.f32 %v3605_v48, %v3568_v0 }
0x14b9   : > { %v3643_v5 = vmul.f32 %v5788_v47, %v3636_v45 }
0x14bb   : > { %v5802_v51 = vadd.f32 %v5793_v49, %v3643_v5 }
0x14bd   : > { %v3658_v27 = vmul.f32 %v5799_v50, %v5802_v51 }
0x14bf   : > { %v3662_v32 = vsel %vm1097_vm2, %v3658_v27, 0.0 }
0x14c0   : > { %3663 = vadd.xlane.f32.xlu1 %v3662_v32 }
0x14db   : > { %v3581_v13 = vpop.xlane.xlu1 %3580 }
0x14dc   : > { %v3589_v54 = vmul.f32 %v3581_v13, %v4823_v3 }
0x14de   : > { %v3593_v34 = vadd.f32 1e-05, %v3589_v54 }
0x14e0   : > { %4447 = vrsqrt.f32 %v3593_v34  ;;  %vm3612_vm15 = vweird.f32 %v3593_v34 }
0x14e3   : > { %v3584_v61 = vpop.xlane.xlu2 %3583 }
0x14e4   : > { %v3590_v53 = vmul.f32 %v3584_v61, %v4823_v3 }
0x14e6   : > { %v4448_v39 = vpop.eup %4447  ;;  %v3594_v63 = vadd.f32 1e-05, %v3590_v53 }
0x14e7   : > { %v3607_v7 = vmul.f32 %v4448_v39, %v3593_v34  ;;  %vm3613_vm14 = vweird.f32 %v4448_v39 }
0x14e8   : > { %4449 = vrsqrt.f32 %v3594_v63  ;;  %vm3614_vm0 = vmor %vm3612_vm15, %vm3613_vm14  ;;  %vm3622_vm8 = vweird.f32 %v3594_v63 }
0x14e9   : > { %v3608_v46 = vmul.f32 %v4448_v39, %v3607_v7 }
0x14eb   : > { %v3609_v62 = vmul.f32 0.5, %v3608_v46  ;;  %v3587_v31 = vpop.xlane.xlu0 %3586 }
0x14ec   : > { %v3591_v58 = vmul.f32 %v3587_v31, %v4823_v3 }
0x14ed   : > { %v3610_v60 = vsub.f32 1.5, %v3609_v62 }
0x14ee   : > { %v4450_v4 = vpop.eup %4449  ;;  %v3595_v2 = vadd.f32 1e-05, %v3591_v58 }
0x14ef   : > { %v3611_v8 = vmul.f32 %v4448_v39, %v3610_v60  ;;  %v3617_v26 = vmul.f32 %v4450_v4, %v3594_v63  ;;  %vm3623_vm7 = vweird.f32 %v4450_v4 }
0x14f0   : > { %4451 = vrsqrt.f32 %v3595_v2  ;;  %vm3624_vm10 = vmor %vm3622_vm8, %vm3623_vm7  ;;  %vm3632_vm12 = vweird.f32 %v3595_v2 }
0x14f1   : > { %v3615_v10 = vsel %vm3614_vm0, %v4448_v39, %v3611_v8  ;;  %v3618_v41 = vmul.f32 %v4450_v4, %v3617_v26 }
0x14f2   : > { %v3637_v55 = vmul.f32 %v3615_v10, %v5767_v17 }
0x14f3   : > { %v3619_v12 = vmul.f32 0.5, %v3618_v41 }
0x14f4   : > { %v3644_v14 = vmul.f32 %v5788_v47, %v3637_v55 }
0x14f5   : > { %v3620_v25 = vsub.f32 1.5, %v3619_v12 }
0x14f6   : > { %v4452_v23 = vpop.eup %4451  ;;  %v3651_v3 = vadd.f32 %v5793_v49, %v3644_v14 }
0x14f7   : > { %v3621_v35 = vmul.f32 %v4450_v4, %v3620_v25  ;;  %v3627_v40 = vmul.f32 %v4452_v23, %v3595_v2  ;;  %vm3633_vm11 = vweird.f32 %v4452_v23 }
0x14f8   : > { %v3659_v57 = vmul.f32 %v5799_v50, %v3651_v3  ;;  %vm3634_vm1 = vmor %vm3632_vm12, %vm3633_vm11 }
0x14f9   : > { %v3625_v0 = vsel %vm3624_vm10, %v4450_v4, %v3621_v35  ;;  %v3628_v15 = vmul.f32 %v4452_v23, %v3627_v40 }
0x14fa   : > { %v3665_v18 = vsel %vm1097_vm2, %v3659_v57, 0.0  ;;  %v3638_v52 = vmul.f32 %v3625_v0, %v5773_v22 }
0x14fb   : > { %v3629_v30 = vmul.f32 0.5, %v3628_v15  ;;  %3666 = vadd.xlane.f32.xlu2 %v3665_v18 }
0x14fc   : > { %v3645_v17 = vmul.f32 %v5788_v47, %v3638_v52 }
0x14fd   : > { %v3630_v1 = vsub.f32 1.5, %v3629_v30 }
0x14fe   : > { %v3652_v6 = vadd.f32 %v5793_v49, %v3645_v17  ;;  %v3788_v17 = vld [vmem:[%s5902_s18 + $0x18] sm:$0xff] }
0x14ff   : > { %v3631_v11 = vmul.f32 %v4452_v23, %v3630_v1  ;;  %v3787_v1 = vld [vmem:[%s5902_s18 + $0x10] sm:$0xff] }
0x1500   : > { %v3660_v19 = vmul.f32 %v5799_v50, %v3652_v6 }
0x1501   : > { %v3635_v56 = vsel %vm3634_vm1, %v4452_v23, %v3631_v11  ;;  %v3785_v11 = vld [vmem:[%s5902_s18] sm:$0xff] }
0x1502   : > { %v3639_v59 = vmul.f32 %v3635_v56, %v5779_v21  ;;  %v3668_v24 = vsel %vm1097_vm2, %v3660_v19, 0.0 }
0x1503   : > { %3669 = vadd.xlane.f32.xlu0 %v3668_v24 }
0x1504   : > { %v3646_v22 = vmul.f32 %v5788_v47, %v3639_v59  ;;  %v3789_v59 = vld [vmem:[%s5903_s19] sm:$0x1] }
0x1506   : > { %v3653_v29 = vadd.f32 %v5793_v49, %v3646_v22 }
0x1508   : > { %4151 = vmatpush.msk.msrb.mxu3 %vm1384_vm6, %v3653_v29  ;;  %v3661_v33 = vmul.f32 %v5799_v50, %v3653_v29 }
0x150a   : > { %3778 = vmatpush.msrb.mxu3 %v3652_v6  ;;  %v3671_v36 = vsel %vm1107_vm3, %v3661_v33, 0.0  ;;  %v3786_v6 = vld [vmem:[%s5902_s18 + $0x8] sm:$0xff] }
0x150b   : > { %3672 = vadd.xlane.f32.xlu1 %v3671_v36 }
0x150c   : > { %3779 = vmatpush.msrb.mxu3 %v3651_v3 }
0x150e   : > { %3780 = vmatpush.msrb.mxu3 %v5802_v51 }
0x1510   : > { %3805 = vmatpush.msra.mxu3 %v3788_v17 }
0x1512   : > { %3806 = vmatpush.msra.mxu3 %v3787_v1 }
0x1514   : > { %3807 = vmatpush.msra.mxu3 %v3786_v6 }
0x1516   : > { %3808 = vmatpush.msra.mxu3 %v3785_v11 }
0x1533   : > { %v3664_v37 = vpop.xlane.xlu1 %3663 }
0x1534   : > { %v3678_v9 = vadd.f32 %v4266_v38, %v3664_v37 }
0x1536   : > { %v3683_v47 = vsel %vm3682_vm9, %v3678_v9, -inf }
0x156e   : > { %v3667_v21 = vpop.xlane.xlu2 %3666 }
0x156f   : > { %v3679_v20 = vadd.f32 %v4266_v38, %v3667_v21 }
0x1571   : > { %v3684_v28 = vsel %vm3682_vm9, %v3679_v20, -inf }
0x1572   : > { %v3688_v49 = vmax.f32 %v3683_v47, %v3684_v28 }
0x1576   : > { %v3670_v42 = vpop.xlane.xlu0 %3669 }
0x1577   : > { %v3680_v43 = vadd.f32 %v4266_v38, %v3670_v42 }
0x1579   : > { %v3685_v48 = vsel %vm3682_vm9, %v3680_v43, -inf }
0x157e   : > { %v3673_v44 = vpop.xlane.xlu1 %3672 }
0x157f   : > { %v3681_v16 = vadd.f32 %v4266_v38, %v3673_v44 }
0x1581   : > { %v3687_v45 = vsel %vm3686_vm5, %v3681_v16, -inf }
0x1582   : > { %v3689_v5 = vmax.f32 %v3685_v48, %v3687_v45 }
0x1584   : > { %v3690_v50 = vmax.f32 %v3688_v49, %v3689_v5 }
0x1586   : > { %v3691_v51 = vrot.slane %v3690_v50, 4 }
0x1588   : > { %v3692_v27 = vmax.f32 %v3690_v50, %v3691_v51 }
0x158a   : > { %v3693_v32 = vrot.slane %v3692_v27, 2 }
0x158c   : > { %v3694_v13 = vmax.f32 %v3692_v27, %v3693_v32 }
0x158e   : > { %v3695_v54 = vrot.slane %v3694_v13, 1 }
0x1590   : > { %v3696_v34 = vmax.f32 %v3694_v13, %v3695_v54 }
0x1592   : > { %v3697_v61 = vsub.f32 %v3678_v9, %v3696_v34  ;;  %v3698_v53 = vsub.f32 %v3679_v20, %v3696_v34  ;;  %v3699_v39 = vsub.f32 %v3680_v43, %v3696_v34  ;;  %v3700_v63 = vsub.f32 %v3681_v16, %v3696_v34 }
0x1594   : > { %v3701_v7 = vmul.f32 1.442695, %v3697_v61  ;;  %v3703_v46 = vmul.f32 1.442695, %v3698_v53  ;;  %v3705_v62 = vmul.f32 1.442695, %v3699_v39 }
0x1595   : > { %v3707_v31 = vmul.f32 1.442695, %v3700_v63 }
0x1596   : > { %4453 = vpow2.f32 %v3701_v7 }
0x1597   : > { %4455 = vpow2.f32 %v3703_v46 }
0x1598   : > { %4457 = vpow2.f32 %v3705_v62 }
0x1599   : > { %4459 = vpow2.f32 %v3707_v31 }
0x159c   : > { %v4454_v58 = vpop.eup %4453 }
0x159d   : > { %v4456_v60 = vpop.eup %4455  ;;  %v3709_v4 = vsel %vm3682_vm9, %v4454_v58, 0.0 }
0x159e   : > { %v4458_v2 = vpop.eup %4457  ;;  %v3710_v8 = vsel %vm3682_vm9, %v4456_v60, 0.0 }
0x159f   : > { %v4460_v26 = vpop.eup %4459  ;;  %v3711_v10 = vadd.f32 %v3710_v8, %v3709_v4  ;;  %v3712_v41 = vsel %vm3682_vm9, %v4458_v2, 0.0 }
0x15a0   : > { %v3714_v12 = vsel %vm3686_vm5, %v4460_v26, 0.0 }
0x15a1   : > { %v3713_v55 = vadd.f32 %v3712_v41, %v3711_v10 }
0x15a3   : > { %v3715_v14 = vadd.f32 %v3714_v12, %v3713_v55 }
0x15a5   : > { %v3716_v25 = vrot.slane %v3715_v14, 4 }
0x15a7   : > { %v3717_v23 = vadd.f32 %v3716_v25, %v3715_v14 }
0x15a9   : > { %v3718_v3 = vrot.slane %v3717_v23, 2 }
0x15ab   : > { %v3719_v35 = vadd.f32 %v3718_v3, %v3717_v23 }
0x15ad   : > { %v3720_v40 = vrot.slane %v3719_v35, 1 }
0x15af   : > { %v3721_v57 = vadd.f32 %v3720_v40, %v3719_v35 }
0x15b1   : > { %4461 = vrcp.f32 %v3721_v57 }
0x15b7   : > { %v4462_v0 = vpop.eup %4461 }
0x15b8   : > { %v3723_v15 = vmul.f32 %v4462_v0, %v4454_v58  ;;  %v3724_v18 = vmul.f32 %v4462_v0, %v4456_v60  ;;  %v3725_v52 = vmul.f32 %v4462_v0, %v4458_v2  ;;  %v3726_v30 = vmul.f32 %v4462_v0, %v4460_v26 }
0x15ba   : > { %3727 = vxpose.xlu2.b32.start [1/4] (short) (narrow) %v3723_v15, 8 }
0x15c2   : > { %3728 = vxpose.xlu2.b32.cont [2/4] (short) (narrow) %v3724_v18, 8 }
0x15ca   : > { %3729 = vxpose.xlu2.b32.cont [3/4] (short) (narrow) %v3725_v52, 8 }
0x15d2   : > { %3730 = vxpose.xlu2.b32.end [4/4] (short) (narrow) %v3726_v30, 8 }
0x1653   : > { %v3743_v19 = vpop.trf.xlu2 }
0x1654   : > { %4152 = vmatmul.msk.f32.vlgmr.msrb.gmra.mxu3 %vm1315_vm4, %v3743_v19 }
0x16d7   : > { %v3782_v56 = vpop.f32.mrf.mxu3 }
0x16d8   : > { %4153 = vmatmul.msk.f32.vlgmr.msra.gmra.mxu3 %vm1097_vm2, %v3782_v56 }
0x175b   : > { %v3810_v24 = vpop.f32.mrf.mxu3 }
0x175c   : > { %v3811_v22 = vadd.f32 %v3810_v24, %v3789_v59 }
0x175e   : > { %3813 = vst [vmem:[%s623_s1] sm:$0x1] %v3811_v22 }
0x175f   : > { %4490 = shalt.err (!%p4487_p3)
}
0x1760   : > { %4157 = dma.vmem_to_hbm [thread:$0]  (%p4685_p5), %s3826_s28, 16, %s3828_s2, %s3815_s23  }
0x1761 PF: > { %s5970_s30 = sld [smem:[#allocation6_spill]]  ;;  %p4163_p4 = scmp.ge.s32.totalorder %s4525_s25, 2 }
0x1763   : > { %p4160_p7 = pnand %p4163_p4, %p4689_p6 }
0x1765   : > { %p4161_p8 = pneg %p4160_p7 }
0x1767   : > { %s3839_s1 = sand.u32 1, %s5970_s30  }
0x1768   : > { %s3840_s17 = scalar_lea.sflag [#allocation4], %s3839_s1 }
0x1769   : > { %4508 = dma.done.wait (%p4161_p8), %s3840_s17, 16  }
0x176a   : > { %4510 = vsyncadd (%p4161_p8), %s3840_s17, 4294967280  ;;  %s5972_s25 = sld [smem:[#allocation8_spill]]  ;;  %s5975_s23 = smov %s4517_s24 }
0x176b   : > { %s5973_s5 = sld [smem:[#allocation7_spill]] }
0x176c   : > { %s5974_s2 = sld [smem:[#allocation9_spill]] }
0x1770   : > { %p32_p9 = scmp.ge.s32.totalorder %s5972_s25, 4  }
0x1771   : > { %s5976_s24 = smov %s5973_s5 }
0x1772   :  { %34 = sbr.rel (!%p32_p9) target bundleno = 11 (0xb), region = 154 }
0x1777   :  { %3845 = vsyncpa [#allocation4], 1 }
0x1778   :  { %3847 = vsyncpa [#allocation4 + $0x1], 1 }

</bundles_post_ra>
